<compile_context>
chip_gen: v7x
topology: tpu7x:2x2x1
jax: 0.10.0
libtpu: 0.0.40
codegen_flags: <defaults>
</compile_context>

<pallas_src>
import functools

import jax
import jax.numpy as jnp
from jax.experimental import pallas as pl
from jax.experimental.pallas import tpu as pltpu


_LANES = 128
_ROW_GRANULE = 1024        # keeps (tile_m // 128) a multiple of 8 for the output block
_MAX_TILE_M = 32768        # generous row cap (output buffer is tiny now)


def _epic_kernel(x_ref, w_ref, b_ref, o_ref):
    # x_ref: (TM, D)         row tile of flattened inputs (VMEM)
    # w_ref: (1, D)          lane-dense linear weight (VMEM, resident across the grid)
    # b_ref: (1, 1)          linear bias (SMEM scalar)
    # o_ref: (TM//128, 128)  lane-dense output tile
    g, lanes = o_ref.shape
    d = x_ref.shape[-1]

    x = x_ref[...]
    # Multiply in the input dtype (bf16 VALU on v6e/v7x; widened automatically on v5e),
    # accumulate the per-row reduction in f32.
    w = w_ref[...].astype(x.dtype)                 # (1, D)
    b = b_ref[0, 0].astype(jnp.float32)

    xw = x * w                                     # (TM, D)  VPU
    # Free regrouping of the sublane axis: minor (lane) dim unchanged -> no relayout.
    xw3 = xw.reshape(g, lanes, d)                  # (TM//128, 128, D)
    # Per-row dot product: XLU cross-lane reduce, f32 accumulation; result is
    # lane-dense so EUP transcendentals and the store run at full lane occupancy.
    z = jnp.sum(xw3, axis=-1, dtype=jnp.float32) + b     # (TM//128, 128) f32

    # PyTorch Softplus (beta=1, threshold=20): log1p(exp(z)) for z <= 20, else z.
    sp = jnp.where(z > 20.0, z, jnp.log1p(jnp.exp(jnp.minimum(z, 20.0))))
    # Final: log1p(softplus(z)); unmasked lane-dense store.
    o_ref[...] = jnp.log1p(sp).astype(o_ref.dtype)


def _round_up(x, m):
    return ((x + m - 1) // m) * m


def _vmem_capacity_bytes():
    try:
        cap = int(pltpu.get_tpu_info().vmem_capacity_bytes)
        if cap > 0:
            return cap
    except Exception:
        pass
    return 64 * 1024 * 1024  # conservative default (v7x per-TC VMEM)


def _pick_tiling(n_rows, dim, itemsize):
    vmem_cap = _vmem_capacity_bytes()
    if vmem_cap <= 80 * 1024 * 1024:          # v7x-class: 64 MiB VMEM per TC
        target_block_bytes = 16 * 1024 * 1024
    else:                                     # v5e/v6e: 128 MiB VMEM
        target_block_bytes = 24 * 1024 * 1024
    vmem_limit = min(96 * 1024 * 1024, (vmem_cap * 7) // 8)

    tile_m = target_block_bytes // max(1, dim * itemsize)
    tile_m = (tile_m // _ROW_GRANULE) * _ROW_GRANULE
    tile_m = max(_ROW_GRANULE, min(tile_m, _MAX_TILE_M))
    tile_m = min(tile_m, _round_up(n_rows, _ROW_GRANULE))   # don't over-tile tiny inputs
    return tile_m, vmem_limit


@functools.partial(jax.jit, static_argnames=("tile_m", "vmem_limit"))
def _epic_forward(x2d, w, b, *, tile_m, vmem_limit):
    n, d = x2d.shape
    n_tiles = pl.cdiv(n, tile_m)
    padded_n = n_tiles * tile_m

    cost = pl.CostEstimate(
        flops=2 * n * d,
        transcendentals=3 * n,
        bytes_accessed=n * d * x2d.dtype.itemsize + d * 4 + n * x2d.dtype.itemsize,
    )

    out = pl.pallas_call(
        _epic_kernel,
        out_shape=jax.ShapeDtypeStruct((padded_n // _LANES, _LANES), x2d.dtype),
        grid_spec=pltpu.PrefetchScalarGridSpec(
            num_scalar_prefetch=0,
            grid=(n_tiles,),
            in_specs=[
                pl.BlockSpec((tile_m, d), lambda i: (i, 0)),          # big row tile of x
                pl.BlockSpec((1, d), lambda i: (0, 0)),               # lane-dense weight
                pl.BlockSpec(memory_space=pltpu.MemorySpace.SMEM),    # bias scalar
            ],
            out_specs=pl.BlockSpec((tile_m // _LANES, _LANES), lambda i: (i, 0)),
        ),
        compiler_params=pltpu.CompilerParams(
            # Single row-tile axis, "parallel" so the runtime can shard it across both
            # TensorCores on v7x.
            # TODO(synk): verify 2-TC sharding on v7x in an xprof profile.
            dimension_semantics=("parallel",),
            vmem_limit_bytes=vmem_limit,
        ),
        cost_estimate=cost,
    )(x2d, w, b)

    flat = out.reshape(padded_n)
    if padded_n != n:
        flat = flat[:n]          # drop junk rows produced by the padded last tile
    return flat


def epic_term_importance(inputs, weight, bias, *, tile_m=None):
    """
    inputs: (batch, seq, dim)
    weight: (1, dim)  -- PyTorch nn.Linear(dim, 1) weight layout
    bias:   (1,)      -- PyTorch nn.Linear(dim, 1) bias
    returns (batch, seq, 1)
    """
    B, S, D = inputs.shape
    N = B * S
    x2d = inputs.reshape(N, D)
    w = weight.reshape(1, D)
    b = jnp.asarray(bias, dtype=jnp.float32).reshape(1, 1)

    auto_tile, vmem_limit = _pick_tiling(N, D, x2d.dtype.itemsize)
    if tile_m is None:
        tile_m = auto_tile
    else:
        assert tile_m % _ROW_GRANULE == 0, "tile_m must be a multiple of 1024"

    flat = _epic_forward(x2d, w, b, tile_m=int(tile_m), vmem_limit=int(vmem_limit))
    return flat.reshape(B, S, 1)


def _reference(inputs, weight, bias):
    z = jnp.einsum(
        "bsd,od->bso",
        inputs.astype(jnp.float32),
        weight.astype(jnp.float32),
    ) + bias.astype(jnp.float32)
    sp = jnp.where(z > 20.0, z, jnp.log1p(jnp.exp(jnp.minimum(z, 20.0))))
    return jnp.log1p(sp).astype(inputs.dtype)


if __name__ == "__main__":
    key = jax.random.PRNGKey(0)
    k_x, k_w, k_b = jax.random.split(key, 3)

    batch, seq, dim = 2, 8, 32  # small shapes consistent with (..., dim) input

    x = jax.random.normal(k_x, (batch, seq, dim), dtype=jnp.float32)
    # Deterministic "Linear(dim, 1)" parameters (synthetic, not a checkpoint load)
    bound = 1.0 / (dim ** 0.5)
    weight = jax.random.uniform(k_w, (1, dim), minval=-bound, maxval=bound,
                                dtype=jnp.float32)
    bias = jax.random.uniform(k_b, (1,), minval=-bound, maxval=bound,
                              dtype=jnp.float32)

    out = epic_term_importance(x, weight, bias)
    out = jax.block_until_ready(out)

    ref = _reference(x, weight, bias)
    assert out.shape == (batch, seq, 1), out.shape
    assert jnp.allclose(out, ref, atol=1e-5, rtol=1e-5), float(jnp.max(jnp.abs(out - ref)))

    print("KERNEL_OK")
</pallas_src>

<mosaic_0001>
module attributes {stable_mosaic.version = 11 : i64} {
  func.func @_epic_kernel(%arg0: i32, %arg1: memref<1024x32xf32, #tpu.memory_space<vmem>>, %arg2: memref<1x32xf32, #tpu.memory_space<vmem>>, %arg3: memref<1x1xf32, #tpu.memory_space<smem>>, %arg4: memref<8x128xf32, #tpu.memory_space<vmem>>) attributes {dimension_semantics = [#tpu.dimension_semantics<parallel>], iteration_bounds = array<i64: 1>, scalar_prefetch = 0 : i64, scratch_operands = 0 : i64, tpu.core_type = #tpu.core_type<tc>, window_params = [{transform_indices = @transform_0, window_bounds = array<i64: 1024, 32>}, {pipeline_mode = #tpu.pipeline_mode<synchronous>, transform_indices = @transform_1, window_bounds = array<i64: 1, 32>}, {transform_indices = @transform_2, window_bounds = array<i64: 1, 1>}, {transform_indices = @transform_3, window_bounds = array<i64: 8, 128>}]} {
    %c0 = arith.constant 0 : index
    %c0_0 = arith.constant 0 : index
    %0 = vector.load %arg1[%c0, %c0_0] : memref<1024x32xf32, #tpu.memory_space<vmem>>, vector<1024x32xf32>
    %c0_1 = arith.constant 0 : index
    %c0_2 = arith.constant 0 : index
    %1 = vector.load %arg2[%c0_1, %c0_2] : memref<1x32xf32, #tpu.memory_space<vmem>>, vector<1x32xf32>
    %c0_3 = arith.constant 0 : index
    %c0_4 = arith.constant 0 : index
    %2 = memref.load %arg3[%c0_3, %c0_4] : memref<1x1xf32, #tpu.memory_space<smem>>
    %3 = vector.broadcast %1 : vector<1x32xf32> to vector<1024x32xf32>
    %4 = arith.mulf %0, %3 : vector<1024x32xf32>
    %5 = vector.shape_cast %4 : vector<1024x32xf32> to vector<8x128x32xf32>
    %cst = arith.constant dense<0.000000e+00> : vector<8x128xf32>
    %6 = vector.multi_reduction <add>, %5, %cst [2] : vector<8x128x32xf32> to vector<8x128xf32>
    %7 = vector.broadcast %2 : f32 to vector<8x128xf32>
    %8 = arith.addf %6, %7 : vector<8x128xf32>
    %cst_5 = arith.constant 2.000000e+01 : f32
    %9 = vector.broadcast %cst_5 : f32 to vector<8x128xf32>
    %10 = arith.cmpf ogt, %8, %9 : vector<8x128xf32>
    %cst_6 = arith.constant 2.000000e+01 : f32
    %11 = vector.broadcast %cst_6 : f32 to vector<8x128xf32>
    %12 = arith.minimumf %8, %11 : vector<8x128xf32>
    %13 = math.exp %12 : vector<8x128xf32>
    %14 = math.log1p %13 : vector<8x128xf32>
    %15 = arith.select %10, %8, %14 : vector<8x128xi1>, vector<8x128xf32>
    %16 = math.log1p %15 : vector<8x128xf32>
    %c0_7 = arith.constant 0 : index
    %c0_8 = arith.constant 0 : index
    %17 = vector.load %arg4[%c0_7, %c0_8] : memref<8x128xf32, #tpu.memory_space<vmem>>, vector<8x128xf32>
    tpu.vector_store %arg4[%c0_7, %c0_8], %16 {strides = array<i32>} : memref<8x128xf32, #tpu.memory_space<vmem>>, vector<8x128xf32>,
    return
  }
  func.func @transform_0(%arg0: i32) -> (i32, i32) {
    %c0_i32 = arith.constant 0 : i32
    %c0_i32_0 = arith.constant 0 : i32
    return %arg0, %c0_i32 : i32, i32
  }
  func.func @transform_1(%arg0: i32) -> (i32, i32) {
    %c0_i32 = arith.constant 0 : i32
    %c0_i32_0 = arith.constant 0 : i32
    %c0_i32_1 = arith.constant 0 : i32
    return %c0_i32, %c0_i32_0 : i32, i32
  }
  func.func @transform_2(%arg0: i32) -> (i32, i32) {
    %c0_i32 = arith.constant 0 : i32
    %c0_i32_0 = arith.constant 0 : i32
    %c0_i32_1 = arith.constant 0 : i32
    return %c0_i32, %c0_i32_0 : i32, i32
  }
  func.func @transform_3(%arg0: i32) -> (i32, i32) {
    %c0_i32 = arith.constant 0 : i32
    %c0_i32_0 = arith.constant 0 : i32
    return %arg0, %c0_i32 : i32, i32
  }
}

</mosaic_0001>

<bundles_post_ra>
// kernel: _epic_forward.1
= control target key start
LH: loop header
LB: loop body
LE: loop exit
PB: predicated region body
PF: predicated region fallthrough
CT: control target
= control target key end

     0   :  { %9 = vsyncpa [#allocation4], 0  ;;  %s10504_s0 = inlined_call_operand.hbm [shape: f32[16,32], index: 0, kind: input, shape index: {}]   ;;  %s10505_s1 = inlined_call_operand.vmem [shape: f32[1,32], index: 1, kind: input, shape index: {}]   ;;  %s10506_s2 = inlined_call_operand.<no memory space> [shape: f32[1,1], index: 2, kind: input, shape index: {}]   ;;  %s10507_s3 = inlined_call_operand.vmem [shape: f32[8,128], index: 3, kind: output, shape index: {}]  }
   0x1   :  { %14 = vsyncadd [#allocation4], 16128  ;;  %s5363_s12 = smov [#allocation3]   ;;  %s5339_s16 = scalar_lea.hbm %s10504_s0, 256 }
   0x2   :  { %s15_s13 = sshll.u32 %s5363_s12, 4  ;;  %p5340_p0 = scmp.ne.s32.totalorder %s10504_s0, %s5339_s16  ;;  %s16_s13 = int_to_ptr.vmem [resolvable:$true] %s15_s13 }
   0x3   :  { %p5343_p1 = scmp.lt.u32.totalorder %s5339_s16, %s10504_s0 }
   0x5   :  { %p5345_p2 = pnand %p5343_p1, %p5340_p0 }
   0x7   :  { %5348 = shalt.err (!%p5345_p2)
}
   0x8   :  { %s5349_s21 = scalar_lea.vmem %s16_s13, 256  ;;  %s5353_s22 = scalar_lea.vmem %s16_s13, 16384 }
   0x9   :  { %p5350_p3 = scmp.ne.s32.totalorder %s16_s13, %s5349_s21  ;;  %p5354_p4 = scmp.lt.s32.totalorder %s16_s13, %s16_s13 }
   0xa   :  { %p5355_p5 = scmp.lt.s32.totalorder %s5353_s22, %s5349_s21 }
   0xc   :  { %p5356_p6 = por %p5355_p5, %p5354_p4 }
   0xe   :  { %p5357_p7 = pnand %p5356_p6, %p5350_p3 }
  0x10   :  { %5360 = shalt.err (!%p5357_p7)
}
  0x11   :  { %s5364_s23 = smov 128   ;;  %s5365_s24 = smov 8  }
  0x12   :  { %21 = dma.hbm_to_vmem [thread:$0]  %s10504_s0, 256, %s16_s13, [#allocation4], %s5364_s23, %s5364_s23, %s5365_s24  }
  0x13   :  { %5361 = dma.done.wait [#allocation4], 16384  }
  0x14   :  { %5362 = vsyncadd [#allocation4], 4294950912  ;;  %v31_v0 = vld [vmem:[#allocation3 + $0x10] sm:$0xff]  ;;  %v5401_v1 = vld [vmem:[%s10505_s1] ss:$0 sm:$0xff]  ;;  %vm293_vm0 = vcmask 261120  }
  0x15   :  { %v29_v2 = vld [vmem:[#allocation3] sm:$0xff]  ;;  %v167_v3 = vmul.f32 %v5401_v1, %v31_v0  ;;  %v32_v5 = vld [vmem:[#allocation3 + $0x18] sm:$0xff]  ;;  %v30_v6 = vld [vmem:[#allocation3 + $0x8] sm:$0xff] }
  0x16   :  { %v165_v4 = vmul.f32 %v5401_v1, %v29_v2  ;;  %v168_v7 = vmul.f32 %v5401_v1, %v32_v5  ;;  %v166_v8 = vmul.f32 %v5401_v1, %v30_v6  ;;  %v34_v9 = vld [vmem:[#allocation3 + $0x28] sm:$0xff]  ;;  %v33_v10 = vld [vmem:[#allocation3 + $0x20] sm:$0xff]  ;;  %v36_v17 = vld [vmem:[#allocation3 + $0x38] sm:$0xff] }
  0x17   :  { %v300_v11 = vsel %vm293_vm0, %v167_v3, 0.0  ;;  %v170_v15 = vmul.f32 %v5401_v1, %v34_v9  ;;  %v169_v16 = vmul.f32 %v5401_v1, %v33_v10  ;;  %v35_v18 = vld [vmem:[#allocation3 + $0x30] sm:$0xff]  ;;  %v172_v21 = vmul.f32 %v5401_v1, %v36_v17  ;;  %v38_v23 = vld [vmem:[#allocation3 + $0x48] sm:$0xff]  ;;  %v37_v24 = vld [vmem:[#allocation3 + $0x40] sm:$0xff] }
  0x18   :  { %v294_v12 = vsel %vm293_vm0, %v165_v4, 0.0  ;;  %301 = vadd.xlane.f32.xlu1 %v300_v11  ;;  %v303_v13 = vsel %vm293_vm0, %v168_v7, 0.0  ;;  %v297_v14 = vsel %vm293_vm0, %v166_v8, 0.0  ;;  %v171_v22 = vmul.f32 %v5401_v1, %v35_v18  ;;  %v40_v29 = vld [vmem:[#allocation3 + $0x58] sm:$0xff]  ;;  %v39_v30 = vld [vmem:[#allocation3 + $0x50] sm:$0xff]  ;;  %v42_v35 = vld [vmem:[#allocation3 + $0x68] sm:$0xff] }
  0x19   :  { %295 = vadd.xlane.f32.xlu0 %v294_v12  ;;  %v309_v19 = vsel %vm293_vm0, %v170_v15, 0.0  ;;  %v306_v20 = vsel %vm293_vm0, %v169_v16, 0.0  ;;  %v315_v25 = vsel %vm293_vm0, %v172_v21, 0.0  ;;  %v174_v27 = vmul.f32 %v5401_v1, %v38_v23  ;;  %v41_v36 = vld [vmem:[#allocation3 + $0x60] sm:$0xff]  ;;  %v44_v41 = vld [vmem:[#allocation3 + $0x78] sm:$0xff]  ;;  %v43_v42 = vld [vmem:[#allocation3 + $0x70] sm:$0xff] }
  0x1a   :  { %v312_v26 = vsel %vm293_vm0, %v171_v22, 0.0  ;;  %v173_v28 = vmul.f32 %v5401_v1, %v37_v24  ;;  %v176_v33 = vmul.f32 %v5401_v1, %v40_v29  ;;  %v175_v34 = vmul.f32 %v5401_v1, %v39_v30  ;;  %v46_v47 = vld [vmem:[#allocation3 + $0x88] sm:$0xff]  ;;  %v45_v48 = vld [vmem:[#allocation3 + $0x80] sm:$0xff]  ;;  %v48_v53 = vld [vmem:[#allocation3 + $0x98] sm:$0xff] }
  0x1b   :  { %v321_v31 = vsel %vm293_vm0, %v174_v27, 0.0  ;;  %v178_v39 = vmul.f32 %v5401_v1, %v42_v35  ;;  %v177_v40 = vmul.f32 %v5401_v1, %v41_v36  ;;  %v180_v45 = vmul.f32 %v5401_v1, %v44_v41  ;;  %v47_v54 = vld [vmem:[#allocation3 + $0x90] sm:$0xff]  ;;  %v50_v59 = vld [vmem:[#allocation3 + $0xa8] sm:$0xff]  ;;  %v49_v60 = vld [vmem:[#allocation3 + $0xa0] sm:$0xff] }
  0x1c   :  { %304 = vadd.xlane.f32.xlu1 %v303_v13  ;;  %v318_v32 = vsel %vm293_vm0, %v173_v28, 0.0  ;;  %v327_v37 = vsel %vm293_vm0, %v176_v33, 0.0  ;;  %v324_v38 = vsel %vm293_vm0, %v175_v34, 0.0  ;;  %v179_v46 = vmul.f32 %v5401_v1, %v43_v42  ;;  %v52_v2 = vld [vmem:[#allocation3 + $0xb8] sm:$0xff]  ;;  %v51_v3 = vld [vmem:[#allocation3 + $0xb0] sm:$0xff]  ;;  %v54_v8 = vld [vmem:[#allocation3 + $0xc8] sm:$0xff] }
  0x1d   :  { %298 = vadd.xlane.f32.xlu0 %v297_v14  ;;  %v333_v43 = vsel %vm293_vm0, %v178_v39, 0.0  ;;  %v330_v44 = vsel %vm293_vm0, %v177_v40, 0.0  ;;  %v339_v49 = vsel %vm293_vm0, %v180_v45, 0.0  ;;  %v182_v51 = vmul.f32 %v5401_v1, %v46_v47  ;;  %v53_v9 = vld [vmem:[#allocation3 + $0xc0] sm:$0xff]  ;;  %v56_v14 = vld [vmem:[#allocation3 + $0xd8] sm:$0xff]  ;;  %v55_v15 = vld [vmem:[#allocation3 + $0xd0] sm:$0xff] }
  0x1e   :  { %v336_v50 = vsel %vm293_vm0, %v179_v46, 0.0  ;;  %v181_v52 = vmul.f32 %v5401_v1, %v45_v48  ;;  %v184_v57 = vmul.f32 %v5401_v1, %v48_v53  ;;  %v183_v58 = vmul.f32 %v5401_v1, %v47_v54  ;;  %v57_v21 = vld [vmem:[#allocation3 + $0xe0] sm:$0xff]  ;;  %v59_v27 = vld [vmem:[#allocation3 + $0xf0] sm:$0xff] }
  0x1f   :  { %v345_v55 = vsel %vm293_vm0, %v182_v51, 0.0  ;;  %v186_v63 = vmul.f32 %v5401_v1, %v50_v59  ;;  %v185_v0 = vmul.f32 %v5401_v1, %v49_v60  ;;  %v188_v6 = vmul.f32 %v5401_v1, %v52_v2  ;;  %v61_v33 = vld [vmem:[#allocation3 + $0x100] sm:$0xff]  ;;  %v63_v39 = vld [vmem:[#allocation3 + $0x110] sm:$0xff] }
  0x20   :  { %310 = vadd.xlane.f32.xlu1 %v309_v19  ;;  %v342_v56 = vsel %vm293_vm0, %v181_v52, 0.0  ;;  %v351_v61 = vsel %vm293_vm0, %v184_v57, 0.0  ;;  %v348_v62 = vsel %vm293_vm0, %v183_v58, 0.0  ;;  %v187_v7 = vmul.f32 %v5401_v1, %v51_v3  ;;  %v65_v45 = vld [vmem:[#allocation3 + $0x120] sm:$0xff]  ;;  %v67_v51 = vld [vmem:[#allocation3 + $0x130] sm:$0xff] }
  0x21   :  { %307 = vadd.xlane.f32.xlu0 %v306_v20  ;;  %v357_v4 = vsel %vm293_vm0, %v186_v63, 0.0  ;;  %v354_v5 = vsel %vm293_vm0, %v185_v0, 0.0  ;;  %v363_v10 = vsel %vm293_vm0, %v188_v6, 0.0  ;;  %v190_v12 = vmul.f32 %v5401_v1, %v54_v8  ;;  %v58_v20 = vld [vmem:[#allocation3 + $0xe8] sm:$0xff]  ;;  %v69_v57 = vld [vmem:[#allocation3 + $0x140] sm:$0xff]  ;;  %v71_v63 = vld [vmem:[#allocation3 + $0x150] sm:$0xff] }
  0x22   :  { %v360_v11 = vsel %vm293_vm0, %v187_v7, 0.0  ;;  %v189_v13 = vmul.f32 %v5401_v1, %v53_v9  ;;  %v192_v18 = vmul.f32 %v5401_v1, %v56_v14  ;;  %v191_v19 = vmul.f32 %v5401_v1, %v55_v15  ;;  %v73_v6 = vld [vmem:[#allocation3 + $0x160] sm:$0xff] }
  0x23   :  { %v369_v16 = vsel %vm293_vm0, %v190_v12, 0.0  ;;  %v194_v24 = vmul.f32 %v5401_v1, %v58_v20  ;;  %v75_v12 = vld [vmem:[#allocation3 + $0x170] sm:$0xff] }
  0x24   :  { %316 = vadd.xlane.f32.xlu1 %v315_v25  ;;  %v366_v17 = vsel %vm293_vm0, %v189_v13, 0.0  ;;  %v375_v22 = vsel %vm293_vm0, %v192_v18, 0.0  ;;  %v372_v23 = vsel %vm293_vm0, %v191_v19, 0.0  ;;  %v193_v25 = vmul.f32 %v5401_v1, %v57_v21  ;;  %v77_v18 = vld [vmem:[#allocation3 + $0x180] sm:$0xff] }
  0x25   :  { %313 = vadd.xlane.f32.xlu0 %v312_v26  ;;  %v60_v26 = vld [vmem:[#allocation3 + $0xf8] sm:$0xff]  ;;  %v381_v28 = vsel %vm293_vm0, %v194_v24, 0.0  ;;  %v79_v24 = vld [vmem:[#allocation3 + $0x190] sm:$0xff] }
  0x26   :  { %v378_v29 = vsel %vm293_vm0, %v193_v25, 0.0  ;;  %v196_v30 = vmul.f32 %v5401_v1, %v60_v26 }
  0x28   :  { %322 = vadd.xlane.f32.xlu1 %v321_v31  ;;  %v195_v31 = vmul.f32 %v5401_v1, %v59_v27  ;;  %v387_v34 = vsel %vm293_vm0, %v196_v30, 0.0  ;;  %v81_v30 = vld [vmem:[#allocation3 + $0x1a0] sm:$0xff] }
  0x29   :  { %319 = vadd.xlane.f32.xlu0 %v318_v32  ;;  %v62_v32 = vld [vmem:[#allocation3 + $0x108] sm:$0xff] }
  0x2a   :  { %v384_v35 = vsel %vm293_vm0, %v195_v31, 0.0  ;;  %v198_v36 = vmul.f32 %v5401_v1, %v62_v32 }
  0x2c   :  { %328 = vadd.xlane.f32.xlu1 %v327_v37  ;;  %v197_v37 = vmul.f32 %v5401_v1, %v61_v33  ;;  %v393_v40 = vsel %vm293_vm0, %v198_v36, 0.0  ;;  %v83_v36 = vld [vmem:[#allocation3 + $0x1b0] sm:$0xff] }
  0x2d   :  { %325 = vadd.xlane.f32.xlu0 %v324_v38  ;;  %v64_v38 = vld [vmem:[#allocation3 + $0x118] sm:$0xff] }
  0x2e   :  { %v390_v41 = vsel %vm293_vm0, %v197_v37, 0.0  ;;  %v200_v42 = vmul.f32 %v5401_v1, %v64_v38 }
  0x30   :  { %334 = vadd.xlane.f32.xlu1 %v333_v43  ;;  %v199_v43 = vmul.f32 %v5401_v1, %v63_v39  ;;  %v399_v46 = vsel %vm293_vm0, %v200_v42, 0.0  ;;  %v85_v42 = vld [vmem:[#allocation3 + $0x1c0] sm:$0xff] }
  0x31   :  { %331 = vadd.xlane.f32.xlu0 %v330_v44  ;;  %v66_v44 = vld [vmem:[#allocation3 + $0x128] sm:$0xff] }
  0x32   :  { %v396_v47 = vsel %vm293_vm0, %v199_v43, 0.0  ;;  %v202_v48 = vmul.f32 %v5401_v1, %v66_v44 }
  0x34   :  { %340 = vadd.xlane.f32.xlu1 %v339_v49  ;;  %v201_v49 = vmul.f32 %v5401_v1, %v65_v45  ;;  %v405_v52 = vsel %vm293_vm0, %v202_v48, 0.0  ;;  %v94_v48 = vld [vmem:[#allocation3 + $0x208] sm:$0xff] }
  0x35   :  { %337 = vadd.xlane.f32.xlu0 %v336_v50  ;;  %v68_v50 = vld [vmem:[#allocation3 + $0x138] sm:$0xff] }
  0x36   :  { %v402_v53 = vsel %vm293_vm0, %v201_v49, 0.0  ;;  %v204_v54 = vmul.f32 %v5401_v1, %v68_v50 }
  0x38   :  { %346 = vadd.xlane.f32.xlu1 %v345_v55  ;;  %v203_v55 = vmul.f32 %v5401_v1, %v67_v51  ;;  %v411_v58 = vsel %vm293_vm0, %v204_v54, 0.0  ;;  %v109_v54 = vld [vmem:[#allocation3 + $0x280] sm:$0xff] }
  0x39   :  { %343 = vadd.xlane.f32.xlu0 %v342_v56  ;;  %v70_v56 = vld [vmem:[#allocation3 + $0x148] sm:$0xff] }
  0x3a   :  { %v408_v59 = vsel %vm293_vm0, %v203_v55, 0.0  ;;  %v206_v60 = vmul.f32 %v5401_v1, %v70_v56 }
  0x3c   :  { %352 = vadd.xlane.f32.xlu1 %v351_v61  ;;  %v205_v61 = vmul.f32 %v5401_v1, %v69_v57  ;;  %v417_v0 = vsel %vm293_vm0, %v206_v60, 0.0  ;;  %v96_v60 = vld [vmem:[#allocation3 + $0x218] sm:$0xff] }
  0x3d   :  { %349 = vadd.xlane.f32.xlu0 %v348_v62  ;;  %v72_v62 = vld [vmem:[#allocation3 + $0x158] sm:$0xff] }
  0x3e   :  { %v414_v2 = vsel %vm293_vm0, %v205_v61, 0.0  ;;  %v208_v3 = vmul.f32 %v5401_v1, %v72_v62 }
  0x40   :  { %358 = vadd.xlane.f32.xlu1 %v357_v4  ;;  %v207_v4 = vmul.f32 %v5401_v1, %v71_v63  ;;  %v423_v7 = vsel %vm293_vm0, %v208_v3, 0.0  ;;  %v125_v3 = vld [vmem:[#allocation3 + $0x300] sm:$0xff] }
  0x41   :  { %355 = vadd.xlane.f32.xlu0 %v354_v5  ;;  %v74_v5 = vld [vmem:[#allocation3 + $0x168] sm:$0xff] }
  0x42   :  { %v420_v8 = vsel %vm293_vm0, %v207_v4, 0.0  ;;  %v210_v9 = vmul.f32 %v5401_v1, %v74_v5 }
  0x44   :  { %364 = vadd.xlane.f32.xlu1 %v363_v10  ;;  %v209_v10 = vmul.f32 %v5401_v1, %v73_v6  ;;  %v429_v13 = vsel %vm293_vm0, %v210_v9, 0.0  ;;  %v97_v9 = vld [vmem:[#allocation3 + $0x220] sm:$0xff] }
  0x45   :  { %361 = vadd.xlane.f32.xlu0 %v360_v11  ;;  %v76_v11 = vld [vmem:[#allocation3 + $0x178] sm:$0xff] }
  0x46   :  { %v426_v14 = vsel %vm293_vm0, %v209_v10, 0.0  ;;  %v212_v15 = vmul.f32 %v5401_v1, %v76_v11 }
  0x48   :  { %370 = vadd.xlane.f32.xlu1 %v369_v16  ;;  %v211_v16 = vmul.f32 %v5401_v1, %v75_v12  ;;  %v435_v19 = vsel %vm293_vm0, %v212_v15, 0.0  ;;  %v127_v15 = vld [vmem:[#allocation3 + $0x310] sm:$0xff] }
  0x49   :  { %367 = vadd.xlane.f32.xlu0 %v366_v17  ;;  %v78_v17 = vld [vmem:[#allocation3 + $0x188] sm:$0xff] }
  0x4a   :  { %v432_v20 = vsel %vm293_vm0, %v211_v16, 0.0  ;;  %v214_v21 = vmul.f32 %v5401_v1, %v78_v17 }
  0x4c   :  { %376 = vadd.xlane.f32.xlu1 %v375_v22  ;;  %v213_v22 = vmul.f32 %v5401_v1, %v77_v18  ;;  %v441_v25 = vsel %vm293_vm0, %v214_v21, 0.0  ;;  %v142_v21 = vld [vmem:[#allocation3 + $0x388] sm:$0xff] }
  0x4d   :  { %373 = vadd.xlane.f32.xlu0 %v372_v23  ;;  %v80_v23 = vld [vmem:[#allocation3 + $0x198] sm:$0xff] }
  0x4e   :  { %v438_v26 = vsel %vm293_vm0, %v213_v22, 0.0  ;;  %v216_v27 = vmul.f32 %v5401_v1, %v80_v23 }
  0x50   :  { %382 = vadd.xlane.f32.xlu1 %v381_v28  ;;  %v215_v28 = vmul.f32 %v5401_v1, %v79_v24  ;;  %v447_v31 = vsel %vm293_vm0, %v216_v27, 0.0  ;;  %v113_v27 = vld [vmem:[#allocation3 + $0x2a0] sm:$0xff] }
  0x51   :  { %379 = vadd.xlane.f32.xlu0 %v378_v29  ;;  %v82_v29 = vld [vmem:[#allocation3 + $0x1a8] sm:$0xff] }
  0x52   :  { %v444_v32 = vsel %vm293_vm0, %v215_v28, 0.0  ;;  %v218_v33 = vmul.f32 %v5401_v1, %v82_v29 }
  0x54   :  { %388 = vadd.xlane.f32.xlu1 %v387_v34  ;;  %v217_v34 = vmul.f32 %v5401_v1, %v81_v30  ;;  %v453_v37 = vsel %vm293_vm0, %v218_v33, 0.0  ;;  %v143_v33 = vld [vmem:[#allocation3 + $0x390] sm:$0xff] }
  0x55   :  { %385 = vadd.xlane.f32.xlu0 %v384_v35  ;;  %v84_v35 = vld [vmem:[#allocation3 + $0x1b8] sm:$0xff] }
  0x56   :  { %v450_v38 = vsel %vm293_vm0, %v217_v34, 0.0  ;;  %v220_v39 = vmul.f32 %v5401_v1, %v84_v35 }
  0x58   :  { %394 = vadd.xlane.f32.xlu1 %v393_v40  ;;  %v219_v40 = vmul.f32 %v5401_v1, %v83_v36  ;;  %v459_v43 = vsel %vm293_vm0, %v220_v39, 0.0  ;;  %v114_v39 = vld [vmem:[#allocation3 + $0x2a8] sm:$0xff] }
  0x59   :  { %391 = vadd.xlane.f32.xlu0 %v390_v41  ;;  %v93_v41 = vld [vmem:[#allocation3 + $0x200] sm:$0xff] }
  0x5a   :  { %v456_v44 = vsel %vm293_vm0, %v219_v40, 0.0  ;;  %v229_v45 = vmul.f32 %v5401_v1, %v93_v41 }
  0x5c   :  { %400 = vadd.xlane.f32.xlu1 %v399_v46  ;;  %v221_v46 = vmul.f32 %v5401_v1, %v85_v42  ;;  %v486_v49 = vsel %vm293_vm0, %v229_v45, 0.0  ;;  %v144_v45 = vld [vmem:[#allocation3 + $0x398] sm:$0xff] }
  0x5d   :  { %397 = vadd.xlane.f32.xlu0 %v396_v47  ;;  %v95_v47 = vld [vmem:[#allocation3 + $0x210] sm:$0xff] }
  0x5e   :  { %v462_v50 = vsel %vm293_vm0, %v221_v46, 0.0  ;;  %v231_v51 = vmul.f32 %v5401_v1, %v95_v47 }
  0x60   :  { %406 = vadd.xlane.f32.xlu1 %v405_v52  ;;  %v230_v52 = vmul.f32 %v5401_v1, %v94_v48  ;;  %v492_v55 = vsel %vm293_vm0, %v231_v51, 0.0  ;;  %v115_v51 = vld [vmem:[#allocation3 + $0x2b0] sm:$0xff] }
  0x61   :  { %403 = vadd.xlane.f32.xlu0 %v402_v53  ;;  %v110_v53 = vld [vmem:[#allocation3 + $0x288] sm:$0xff] }
  0x62   :  { %v489_v56 = vsel %vm293_vm0, %v230_v52, 0.0  ;;  %v246_v57 = vmul.f32 %v5401_v1, %v110_v53 }
  0x64   :  { %412 = vadd.xlane.f32.xlu1 %v411_v58  ;;  %v245_v58 = vmul.f32 %v5401_v1, %v109_v54  ;;  %v537_v61 = vsel %vm293_vm0, %v246_v57, 0.0  ;;  %v145_v57 = vld [vmem:[#allocation3 + $0x3a0] sm:$0xff] }
  0x65   :  { %409 = vadd.xlane.f32.xlu0 %v408_v59  ;;  %v111_v59 = vld [vmem:[#allocation3 + $0x290] sm:$0xff] }
  0x66   :  { %v534_v62 = vsel %vm293_vm0, %v245_v58, 0.0  ;;  %v247_v63 = vmul.f32 %v5401_v1, %v111_v59 }
  0x68   :  { %418 = vadd.xlane.f32.xlu1 %v417_v0  ;;  %v232_v0 = vmul.f32 %v5401_v1, %v96_v60  ;;  %v540_v4 = vsel %vm293_vm0, %v247_v63, 0.0  ;;  %v101_v63 = vld [vmem:[#allocation3 + $0x240] sm:$0xff] }
  0x69   :  { %415 = vadd.xlane.f32.xlu0 %v414_v2  ;;  %v126_v2 = vld [vmem:[#allocation3 + $0x308] sm:$0xff] }
  0x6a   :  { %v495_v5 = vsel %vm293_vm0, %v232_v0, 0.0  ;;  %v262_v6 = vmul.f32 %v5401_v1, %v126_v2 }
  0x6c   :  { %424 = vadd.xlane.f32.xlu1 %v423_v7  ;;  %v261_v7 = vmul.f32 %v5401_v1, %v125_v3  ;;  %v585_v10 = vsel %vm293_vm0, %v262_v6, 0.0  ;;  %v131_v6 = vld [vmem:[#allocation3 + $0x330] sm:$0xff] }
  0x6d   :  { %421 = vadd.xlane.f32.xlu0 %v420_v8  ;;  %v112_v8 = vld [vmem:[#allocation3 + $0x298] sm:$0xff] }
  0x6e   :  { %v582_v11 = vsel %vm293_vm0, %v261_v7, 0.0  ;;  %v248_v12 = vmul.f32 %v5401_v1, %v112_v8 }
  0x70   :  { %430 = vadd.xlane.f32.xlu1 %v429_v13  ;;  %v233_v13 = vmul.f32 %v5401_v1, %v97_v9  ;;  %v543_v16 = vsel %vm293_vm0, %v248_v12, 0.0  ;;  %v87_v12 = vld [vmem:[#allocation3 + $0x1d0] sm:$0xff] }
  0x71   :  { %427 = vadd.xlane.f32.xlu0 %v426_v14  ;;  %v141_v14 = vld [vmem:[#allocation3 + $0x380] sm:$0xff] }
  0x72   :  { %v498_v17 = vsel %vm293_vm0, %v233_v13, 0.0  ;;  %v277_v18 = vmul.f32 %v5401_v1, %v141_v14 }
  0x74   :  { %436 = vadd.xlane.f32.xlu1 %v435_v19  ;;  %v263_v19 = vmul.f32 %v5401_v1, %v127_v15  ;;  %v630_v22 = vsel %vm293_vm0, %v277_v18, 0.0  ;;  %v117_v18 = vld [vmem:[#allocation3 + $0x2c0] sm:$0xff] }
  0x75   :  { %433 = vadd.xlane.f32.xlu0 %v432_v20  ;;  %v98_v20 = vld [vmem:[#allocation3 + $0x228] sm:$0xff] }
  0x76   :  { %v588_v23 = vsel %vm293_vm0, %v263_v19, 0.0  ;;  %v234_v24 = vmul.f32 %v5401_v1, %v98_v20 }
  0x78   :  { %442 = vadd.xlane.f32.xlu1 %v441_v25  ;;  %v278_v25 = vmul.f32 %v5401_v1, %v142_v21  ;;  %v501_v28 = vsel %vm293_vm0, %v234_v24, 0.0  ;;  %v88_v24 = vld [vmem:[#allocation3 + $0x1d8] sm:$0xff] }
  0x79   :  { %439 = vadd.xlane.f32.xlu0 %v438_v26  ;;  %v128_v26 = vld [vmem:[#allocation3 + $0x318] sm:$0xff] }
  0x7a   :  { %v633_v29 = vsel %vm293_vm0, %v278_v25, 0.0  ;;  %v264_v30 = vmul.f32 %v5401_v1, %v128_v26  ;;  %v147_v25 = vld [vmem:[#allocation3 + $0x3b0] sm:$0xff]  ;;  %v5588_v26 = vstv %s10506_s2 }
  0x7c   :  { %448 = vadd.xlane.f32.xlu1 %v447_v31  ;;  %v249_v31 = vmul.f32 %v5401_v1, %v113_v27  ;;  %v591_v34 = vsel %vm293_vm0, %v264_v30, 0.0  ;;  %v224_v30 = vmul.f32 %v5401_v1, %v88_v24 }
  0x7d   :  { %445 = vadd.xlane.f32.xlu0 %v444_v32  ;;  %v99_v32 = vld [vmem:[#allocation3 + $0x230] sm:$0xff] }
  0x7e   :  { %v546_v35 = vsel %vm293_vm0, %v249_v31, 0.0  ;;  %v235_v36 = vmul.f32 %v5401_v1, %v99_v32  ;;  %v283_v31 = vmul.f32 %v5401_v1, %v147_v25  ;;  %v118_v32 = vld [vmem:[#allocation3 + $0x2c8] sm:$0xff] }
  0x80   :  { %454 = vadd.xlane.f32.xlu1 %v453_v37  ;;  %v279_v37 = vmul.f32 %v5401_v1, %v143_v33  ;;  %v504_v40 = vsel %vm293_vm0, %v235_v36, 0.0  ;;  %v103_v33 = vld [vmem:[#allocation3 + $0x250] sm:$0xff] }
  0x81   :  { %451 = vadd.xlane.f32.xlu0 %v450_v38  ;;  %v129_v38 = vld [vmem:[#allocation3 + $0x320] sm:$0xff] }
  0x82   :  { %v636_v41 = vsel %vm293_vm0, %v279_v37, 0.0  ;;  %v265_v42 = vmul.f32 %v5401_v1, %v129_v38  ;;  %v471_v37 = vsel %vm293_vm0, %v224_v30, 0.0  ;;  %v648_v38 = vsel %vm293_vm0, %v283_v31, 0.0 }
  0x84   :  { %460 = vadd.xlane.f32.xlu1 %v459_v43  ;;  %v250_v43 = vmul.f32 %v5401_v1, %v114_v39  ;;  %v594_v46 = vsel %vm293_vm0, %v265_v42, 0.0  ;;  %v254_v39 = vmul.f32 %v5401_v1, %v118_v32 }
  0x85   :  { %457 = vadd.xlane.f32.xlu0 %v456_v44  ;;  %v100_v44 = vld [vmem:[#allocation3 + $0x238] sm:$0xff] }
  0x86   :  { %v549_v47 = vsel %vm293_vm0, %v250_v43, 0.0  ;;  %v236_v48 = vmul.f32 %v5401_v1, %v100_v44 }
  0x88   :  { %487 = vadd.xlane.f32.xlu1 %v486_v49  ;;  %v280_v49 = vmul.f32 %v5401_v1, %v144_v45  ;;  %v507_v52 = vsel %vm293_vm0, %v236_v48, 0.0  ;;  %v561_v45 = vsel %vm293_vm0, %v254_v39, 0.0 }
  0x89   :  { %463 = vadd.xlane.f32.xlu0 %v462_v50  ;;  %v130_v50 = vld [vmem:[#allocation3 + $0x328] sm:$0xff] }
  0x8a   :  { %v639_v53 = vsel %vm293_vm0, %v280_v49, 0.0  ;;  %v266_v54 = vmul.f32 %v5401_v1, %v130_v50 }
  0x8c   :  { %493 = vadd.xlane.f32.xlu1 %v492_v55  ;;  %v251_v55 = vmul.f32 %v5401_v1, %v115_v51  ;;  %v597_v58 = vsel %vm293_vm0, %v266_v54, 0.0 }
  0x8d   :  { %490 = vadd.xlane.f32.xlu0 %v489_v56  ;;  %v86_v56 = vld [vmem:[#allocation3 + $0x1c8] sm:$0xff] }
  0x8e   :  { %v552_v59 = vsel %vm293_vm0, %v251_v55, 0.0  ;;  %v222_v60 = vmul.f32 %v5401_v1, %v86_v56 }
  0x90   :  { %538 = vadd.xlane.f32.xlu1 %v537_v61  ;;  %v281_v61 = vmul.f32 %v5401_v1, %v145_v57  ;;  %v465_v0 = vsel %vm293_vm0, %v222_v60, 0.0 }
  0x91   :  { %535 = vadd.xlane.f32.xlu0 %v534_v62  ;;  %v116_v62 = vld [vmem:[#allocation3 + $0x2b8] sm:$0xff] }
  0x92   :  { %v642_v2 = vsel %vm293_vm0, %v281_v61, 0.0  ;;  %v252_v3 = vmul.f32 %v5401_v1, %v116_v62  ;;  %v3879_v62 = vlaneseq }
  0x94   :  { %541 = vadd.xlane.f32.xlu1 %v540_v4  ;;  %v237_v4 = vmul.f32 %v5401_v1, %v101_v63  ;;  %v555_v7 = vsel %vm293_vm0, %v252_v3, 0.0 }
  0x95   :  { %496 = vadd.xlane.f32.xlu0 %v495_v5  ;;  %v146_v5 = vld [vmem:[#allocation3 + $0x3a8] sm:$0xff] }
  0x96   :  { %v510_v8 = vsel %vm293_vm0, %v237_v4, 0.0  ;;  %v282_v9 = vmul.f32 %v5401_v1, %v146_v5  ;;  %v5632_v4 = vand.u32 127, %v3879_v62 }
  0x98   :  { %586 = vadd.xlane.f32.xlu1 %v585_v10  ;;  %v267_v10 = vmul.f32 %v5401_v1, %v131_v6  ;;  %v645_v13 = vsel %vm293_vm0, %v282_v9, 0.0  ;;  %v3927_v25 = vadd.s32 4294967240, %v5632_v4  ;;  %v3941_v30 = vadd.s32 4294967224, %v5632_v4 }
  0x99   :  { %583 = vadd.xlane.f32.xlu0 %v582_v11  ;;  %v102_v11 = vld [vmem:[#allocation3 + $0x248] sm:$0xff] }
  0x9a   :  { %v600_v14 = vsel %vm293_vm0, %v267_v10, 0.0  ;;  %v238_v15 = vmul.f32 %v5401_v1, %v102_v11  ;;  %v5638_v10 = vshrl.u32 %v3879_v62, 7  ;;  %v3892_v11 = vadd.s32 4294967280, %v5632_v4 }
  0x9b   :  { %v3969_v62 = vadd.s32 4294967192, %v5632_v4 }
  0x9c   :  { %544 = vadd.xlane.f32.xlu1 %v543_v16  ;;  %v223_v16 = vmul.f32 %v5401_v1, %v87_v12  ;;  %v513_v20 = vsel %vm293_vm0, %v238_v15, 0.0  ;;  %v3899_v15 = vadd.s32 4294967272, %v5632_v4 }
  0x9d   :  { %499 = vadd.xlane.f32.xlu0 %v498_v17  ;;  %v132_v17 = vld [vmem:[#allocation3 + $0x338] sm:$0xff] }
  0x9e   :  { %v468_v21 = vsel %vm293_vm0, %v223_v16, 0.0  ;;  %v3885_v16 = vadd.s32 4294967288, %v5632_v4 }
  0xa0   :  { %631 = vadd.xlane.f32.xlu1 %v630_v22  ;;  %v268_v22 = vmul.f32 %v5401_v1, %v132_v17  ;;  %v3913_v17 = vadd.s32 4294967256, %v5632_v4  ;;  %v5672_v32 = vsub.s32 %v3885_v16, %v5638_v10 }
  0xa1   :  { %589 = vadd.xlane.f32.xlu0 %v588_v23  ;;  %v253_v23 = vmul.f32 %v5401_v1, %v117_v18 }
  0xa2   :  { %10539 = vst [vmem:[#allocation8_spill] sm:$0xff] %v5672_v32 }
  0xa4   :  { %502 = vadd.xlane.f32.xlu1 %v501_v28  ;;  %v603_v28 = vsel %vm293_vm0, %v268_v22, 0.0 }
  0xa5   :  { %634 = vadd.xlane.f32.xlu0 %v633_v29  ;;  %v302_v27 = vpop.xlane.xlu1 %301  ;;  %v558_v29 = vsel %vm293_vm0, %v253_v23, 0.0  ;;  %v5658_v23 = vsub.s32 %v5632_v4, %v5638_v10 }
  0xa6   :  { %v296_v19 = vpop.xlane.xlu0 %295 }
  0xa7   :  { %v5598_v36 = vadd.f32 %v5588_v26, %v296_v19  ;;  %v5651_v19 = vsub.s32 %v3892_v11, %v5638_v10 }
  0xa8   :  { %592 = vadd.xlane.f32.xlu1 %v591_v34  ;;  %v5595_v34 = vadd.f32 %v5588_v26, %v302_v27 }
  0xa9   :  { %547 = vadd.xlane.f32.xlu0 %v546_v35  ;;  %v305_v43 = vpop.xlane.xlu1 %304  ;;  %v935_v44 = vmin.f32 %v5598_v36, 20.0  ;;  %10537 = vst [vmem:[#allocation6_spill] sm:$0xff] %v5651_v19  ;;  %vm807_vm4 = vcmp.gt.f32.partialorder %v5598_v36, 20.0 }
  0xaa   :  { %v299_v35 = vpop.xlane.xlu0 %298  ;;  %v937_v42 = vmin.f32 %v5595_v34, 20.0  ;;  %v5613_v49 = vadd.f32 %v5588_v26, %v305_v43  ;;  %v3955_v43 = vadd.s32 4294967208, %v5632_v4  ;;  %vm809_vm3 = vcmp.gt.f32.partialorder %v5595_v34, 20.0 }
  0xab   :  { %v1063_v50 = vmul.f32 1.442695, %v935_v44 }
  0xac   :  { %505 = vadd.xlane.f32.xlu1 %v504_v40  ;;  %v239_v40 = vmul.f32 %v5401_v1, %v103_v33  ;;  %v1067_v48 = vmul.f32 1.442695, %v937_v42  ;;  %v938_v54 = vmin.f32 %v5613_v49, 20.0  ;;  %v5675_v33 = vsub.s32 %v3913_v17, %v5638_v10 }
  0xad   :  { %637 = vadd.xlane.f32.xlu0 %v636_v41  ;;  %v5605_v41 = vadd.f32 %v5588_v26, %v299_v35  ;;  %v311_v51 = vpop.xlane.xlu1 %310  ;;  %vm810_vm7 = vcmp.gt.f32.partialorder %v5613_v49, 20.0 }
  0xae   :  { %v308_v1 = vpop.xlane.xlu0 %307  ;;  %4568 = vpow2.f32 %v1067_v48  ;;  %v5620_v55 = vadd.f32 %v5588_v26, %v311_v51  ;;  %v1069_v57 = vmul.f32 1.442695, %v938_v54  ;;  %v5697_v48 = vsub.s32 %v3941_v30, %v5638_v10 }
  0xaf   :  { %4570 = vpow2.f32 %v1063_v50  ;;  %v3948_v50 = vadd.s32 4294967216, %v5632_v4  ;;  %vm808_vm6 = vcmp.gt.f32.partialorder %v5605_v41, 20.0 }
  0xb0   :  { %595 = vadd.xlane.f32.xlu1 %v594_v46  ;;  %v516_v46 = vsel %vm293_vm0, %v239_v40, 0.0  ;;  %vm812_vm9 = vcmp.gt.f32.partialorder %v5620_v55, 20.0 }
  0xb1   :  { %550 = vadd.xlane.f32.xlu0 %v549_v47  ;;  %v936_v47 = vmin.f32 %v5605_v41, 20.0 }
  0xb4   :  { %508 = vadd.xlane.f32.xlu1 %v507_v52  ;;  %v1065_v52 = vmul.f32 1.442695, %v936_v47 }
  0xb5   :  { %640 = vadd.xlane.f32.xlu0 %v639_v53  ;;  %v5616_v53 = vadd.f32 %v5588_v26, %v308_v1 }
  0xb6   :  { %4572 = vpow2.f32 %v1065_v52 }
  0xb7   :  { %v939_v56 = vmin.f32 %v5616_v53, 20.0  ;;  %4574 = vpow2.f32 %v1069_v57  ;;  %vm811_vm12 = vcmp.gt.f32.partialorder %v5616_v53, 20.0 }
  0xb8   :  { %598 = vadd.xlane.f32.xlu1 %v597_v58  ;;  %v317_v58 = vpop.xlane.xlu1 %316  ;;  %v5627_v63 = vpop.eup %4568 }
  0xb9   :  { %553 = vadd.xlane.f32.xlu0 %v552_v59  ;;  %v940_v59 = vmin.f32 %v5620_v55, 20.0  ;;  %v1071_v60 = vmul.f32 1.442695, %v939_v56  ;;  %v5625_v61 = vadd.f32 %v5588_v26, %v317_v58  ;;  %v1337_v6 = vadd.f32 1.0, %v5627_v63 }
  0xba   :  { %v1340_v39 = vmul.f32 -0.5, %v5627_v63 }
  0xbb   :  { %4576 = vpow2.f32 %v1071_v60  ;;  %v942_v3 = vmin.f32 %v5625_v61, 20.0  ;;  %v5708_v60 = vsub.s32 %v3955_v43, %v5638_v10  ;;  %vm814_vm14 = vcmp.gt.f32.partialorder %v5625_v61, 20.0 }
  0xbc   :  { %466 = vadd.xlane.f32.xlu1 %v465_v0  ;;  %v1073_v0 = vmul.f32 1.442695, %v940_v59  ;;  %v1341_v59 = vadd.f32 1.0, %v1340_v39 }
  0xbd   :  { %643 = vadd.xlane.f32.xlu0 %v642_v2  ;;  %v5629_v2 = vpop.eup %4570  ;;  %v1077_v9 = vmul.f32 1.442695, %v942_v3  ;;  %10540 = vst [vmem:[#allocation9_spill] sm:$0xff] %v5708_v60  ;;  %v1343_v3 = vand.u32 2147483647, %v5627_v63 }
  0xbe   :  { %4578 = vpow2.f32 %v1073_v0  ;;  %v1322_v44 = vmul.f32 -0.5, %v5629_v2 }
  0xbf   :  { %4580 = vlog2.f32 %v1337_v6  ;;  %vm5725_vm1 = vcmp.lt.f32.partialorder %v1343_v3, 0.0004427343  ;;  %v5761_v3 = vadd.s32 4294967176, %v5632_v4 }
  0xc0   :  { %556 = vadd.xlane.f32.xlu1 %v555_v7  ;;  %v5634_v5 = vpop.eup %4572  ;;  %v314_v7 = vpop.xlane.xlu0 %313  ;;  %v1323_v6 = vadd.f32 1.0, %v1322_v44 }
  0xc1   :  { %511 = vadd.xlane.f32.xlu0 %v510_v8  ;;  %v1319_v8 = vadd.f32 1.0, %v5629_v2  ;;  %v1328_v12 = vadd.f32 1.0, %v5634_v5  ;;  %v1331_v52 = vmul.f32 -0.5, %v5634_v5 }
  0xc3   :  { %4582 = vlog2.f32 %v1319_v8  ;;  %v1332_v17 = vadd.f32 1.0, %v1331_v52 }
  0xc4   :  { %646 = vadd.xlane.f32.xlu1 %v645_v13  ;;  %v5643_v13 = vadd.f32 %v5588_v26, %v314_v7  ;;  %4584 = vpow2.f32 %v1077_v9  ;;  %v320_v18 = vpop.xlane.xlu0 %319  ;;  %v1325_v7 = vand.u32 2147483647, %v5629_v2 }
  0xc5   :  { %601 = vadd.xlane.f32.xlu0 %v600_v14  ;;  %v5645_v14 = vpop.eup %4574  ;;  %4586 = vlog2.f32 %v1328_v12  ;;  %v5669_v31 = vadd.f32 %v5588_v26, %v320_v18 }
  0xc6   :  { %v5654_v22 = vpop.eup %4576  ;;  %v1346_v24 = vadd.f32 1.0, %v5645_v14  ;;  %v941_v27 = vmin.f32 %v5643_v13, 20.0  ;;  %v1349_v11 = vmul.f32 -0.5, %v5645_v14  ;;  %vm5733_vm2 = vcmp.lt.f32.partialorder %v1325_v7, 0.0004427343 }
  0xc7   :  { %v1355_v42 = vadd.f32 1.0, %v5654_v22  ;;  %v943_v1 = vmin.f32 %v5669_v31, 20.0  ;;  %v1352_v52 = vand.u32 2147483647, %v5645_v14 }
  0xc8   :  { %514 = vadd.xlane.f32.xlu1 %v513_v20  ;;  %v3906_v20 = vadd.s32 4294967264, %v5632_v4  ;;  %4588 = vlog2.f32 %v1346_v24  ;;  %v5722_v24 = vsub.s32 %v3969_v62, %v5638_v10 }
  0xc9   :  { %469 = vadd.xlane.f32.xlu0 %v468_v21  ;;  %v323_v21 = vpop.xlane.xlu1 %322  ;;  %4590 = vlog2.f32 %v1355_v42  ;;  %v1079_v12 = vmul.f32 1.442695, %v943_v1  ;;  %v1350_v42 = vadd.f32 1.0, %v1349_v11  ;;  %vm5778_vm8 = vcmp.lt.f32.partialorder %v1352_v52, 0.0004427343 }
  0xca   :  { %v5678_v35 = vadd.f32 %v5588_v26, %v323_v21  ;;  %v5685_v40 = vsub.s32 %v3906_v20, %v5638_v10  ;;  %v1342_v20 = vmul.f32 %v5627_v63, %v1341_v59  ;;  %v1334_v21 = vand.u32 2147483647, %v5634_v5  ;;  %10542 = vst [vmem:[#allocation11_spill] sm:$0xff] %v5722_v24 }
  0xcc   :  { %604 = vadd.xlane.f32.xlu1 %v603_v28  ;;  %v5664_v28 = vsub.s32 %v3899_v15, %v5638_v10  ;;  %v944_v56 = vmin.f32 %v5678_v35, 20.0  ;;  %v5717_v15 = vsub.s32 %v3948_v50, %v5638_v10  ;;  %vm5743_vm5 = vcmp.lt.f32.partialorder %v1334_v21, 0.0004427343 }
  0xcd   :  { %559 = vadd.xlane.f32.xlu0 %v558_v29  ;;  %v3920_v29 = vadd.s32 4294967248, %v5632_v4 }
  0xce   :  { %10538 = vst [vmem:[#allocation7_spill] sm:$0xff] %v5664_v28  ;;  %10541 = vst [vmem:[#allocation10_spill] sm:$0xff] %v5717_v15  ;;  %v1081_v18 = vmul.f32 1.442695, %v944_v56 }
  0xcf   :  { %v5694_v47 = vsub.s32 %v3920_v29, %v5638_v10  ;;  %v1324_v29 = vmul.f32 %v5629_v2, %v1323_v6  ;;  %v1358_v2 = vmul.f32 -0.5, %v5654_v22 }
  0xd0   :  { %472 = vadd.xlane.f32.xlu1 %v471_v37  ;;  %v3934_v37 = vadd.s32 4294967232, %v5632_v4 }
  0xd1   :  { %649 = vadd.xlane.f32.xlu0 %v648_v38  ;;  %v5681_v38 = vpop.eup %4578  ;;  %v1359_v7 = vadd.f32 1.0, %v1358_v2 }
  0xd2   :  { %v4581_v51 = vpop.eup %4580  ;;  %v1364_v54 = vadd.f32 1.0, %v5681_v38  ;;  %v5705_v57 = vsub.s32 %v3934_v37, %v5638_v10  ;;  %v1367_v62 = vmul.f32 -0.5, %v5681_v38  ;;  %v1370_v21 = vand.u32 2147483647, %v5681_v38 }
  0xd3   :  { %v4583_v58 = vpop.eup %4582  ;;  %v1339_v9 = vmul.f32 0.6931472, %v4581_v51 }
  0xd4   :  { %562 = vadd.xlane.f32.xlu1 %v561_v45  ;;  %v5691_v45 = vsub.s32 %v3927_v25, %v5638_v10  ;;  %v5711_v0 = vpop.eup %4584  ;;  %v1321_v16 = vmul.f32 0.6931472, %v4583_v58  ;;  %v3962_v25 = vadd.s32 4294967200, %v5632_v4  ;;  %vm5808_vm11 = vcmp.lt.f32.partialorder %v1370_v21, 0.0004427343 }
  0xd5   :  { %517 = vadd.xlane.f32.xlu0 %v516_v46  ;;  %v1075_v46 = vmul.f32 1.442695, %v941_v27  ;;  %v4587_v8 = vpop.eup %4586  ;;  %v1382_v37 = vadd.f32 1.0, %v5711_v0  ;;  %v1345_v39 = vsel %vm5725_vm1, %v1342_v20, %v1339_v9  ;;  %v1385_v11 = vmul.f32 -0.5, %v5711_v0 }
  0xd6   :  { %v1330_v30 = vmul.f32 0.6931472, %v4587_v8  ;;  %v4589_v43 = vpop.eup %4588  ;;  %v1327_v44 = vsel %vm5733_vm2, %v1324_v29, %v1321_v16  ;;  %v5748_v50 = vsub.s32 %v3962_v25, %v5638_v10  ;;  %v5751_v51 = vsel %vm809_vm3, %v5595_v34, %v1345_v39 }
  0xd7   :  { %4592 = vpow2.f32 %v1075_v46  ;;  %v1333_v46 = vmul.f32 %v5634_v5, %v1332_v17  ;;  %v4591_v56 = vpop.eup %4590  ;;  %v5757_v58 = vsel %vm807_vm4, %v5598_v36, %v1327_v44  ;;  %v1348_v59 = vmul.f32 0.6931472, %v4589_v43 }
  0xd8   :  { %4594 = vlog2.f32 %v1364_v54  ;;  %10549 = vst [vmem:[#allocation12_spill] sm:$0xff] %v5748_v50  ;;  %v329_v54 = vpop.xlane.xlu1 %328  ;;  %v1351_v34 = vmul.f32 %v5645_v14, %v1350_v42  ;;  %v1361_v8 = vand.u32 2147483647, %v5654_v22  ;;  %v2617_v9 = vadd.f32 1.0, %v5751_v51 }
  0xd9   :  { %4596 = vpow2.f32 %v1079_v12  ;;  %v1336_v5 = vsel %vm5743_vm5, %v1333_v46, %v1330_v30  ;;  %v5774_v12 = vadd.f32 %v5588_v26, %v329_v54  ;;  %v2599_v17 = vadd.f32 1.0, %v5757_v58 }
  0xda   :  { %4598 = vpow2.f32 %v1081_v18  ;;  %v5770_v36 = vsel %vm808_vm6, %v5605_v41, %v1336_v5  ;;  %v1357_v18 = vmul.f32 0.6931472, %v4591_v56  ;;  %v1354_v20 = vsel %vm5778_vm8, %v1351_v34, %v1348_v59  ;;  %v326_v59 = vpop.xlane.xlu0 %325 }
  0xdb   :  { %4600 = vlog2.f32 %v1382_v37  ;;  %v1368_v41 = vadd.f32 1.0, %v1367_v62  ;;  %v2608_v27 = vadd.f32 1.0, %v5770_v36  ;;  %v1360_v29 = vmul.f32 %v5654_v22, %v1359_v7 }
  0xdc   :  { %vm5789_vm10 = vcmp.lt.f32.partialorder %v1361_v8, 0.0004427343  ;;  %v1388_v37 = vand.u32 2147483647, %v5711_v0  ;;  %4602 = vlog2.f32 %v2617_v9  ;;  %v1386_v42 = vadd.f32 1.0, %v1385_v11 }
  0xdd   :  { %v946_v43 = vmin.f32 %v5774_v12, 20.0  ;;  %v2620_v46 = vmul.f32 -0.5, %v5751_v51  ;;  %4604 = vlog2.f32 %v2599_v17  ;;  %v5803_v22 = vsel %vm810_vm7, %v5613_v49, %v1354_v20 }
  0xde   :  { %v1363_v2 = vsel %vm5789_vm10, %v1360_v29, %v1357_v18  ;;  %v1369_v1 = vmul.f32 %v5681_v38, %v1368_v41  ;;  %v2602_v54 = vmul.f32 -0.5, %v5757_v58  ;;  %vm5814_vm13 = vcmp.lt.f32.partialorder %v1388_v37, 0.0004427343 }
  0xdf   :  { %v2629_v38 = vmul.f32 -0.5, %v5803_v22  ;;  %v5823_v34 = vsel %vm811_vm12, %v5616_v53, %v1363_v2  ;;  %v2621_v8 = vadd.f32 1.0, %v2620_v46  ;;  %v2623_v9 = vand.u32 2147483647, %v5751_v51  ;;  %v335_v53 = vpop.xlane.xlu1 %334 }
  0xe0   :  { %v1387_v11 = vmul.f32 %v5711_v0, %v1386_v42  ;;  %v2605_v17 = vand.u32 2147483647, %v5757_v58  ;;  %v2626_v14 = vadd.f32 1.0, %v5803_v22  ;;  %v5832_v20 = vadd.f32 %v5588_v26, %v326_v59 }
  0xe1   :  { %v5763_v6 = vpop.eup %4592  ;;  %v2603_v41 = vadd.f32 1.0, %v2602_v54  ;;  %v2630_v0 = vadd.f32 1.0, %v2629_v38  ;;  %v2614_v29 = vand.u32 2147483647, %v5770_v36  ;;  %v5843_v30 = vmul.f32 %v2621_v8, %v5751_v51 }
  0xe2   :  { %v4595_v16 = vpop.eup %4594  ;;  %v1373_v25 = vadd.f32 1.0, %v5763_v6  ;;  %v1376_v37 = vmul.f32 -0.5, %v5763_v6  ;;  %vm5849_vm15 = vcmp.lt.f32.partialorder %v2605_v17, 0.0004427343  ;;  %v945_v51 = vmin.f32 %v5832_v20, 20.0 }
  0xe3   :  { %v5794_v39 = vpop.eup %4596  ;;  %v1366_v63 = vmul.f32 0.6931472, %v4595_v16  ;;  %v1085_v16 = vmul.f32 1.442695, %v946_v43  ;;  %v2632_v52 = vand.u32 2147483647, %v5803_v22 }
  0xe4   :  { %v5797_v44 = vpop.eup %4598  ;;  %4606 = vlog2.f32 %v1373_v25  ;;  %v1391_v49 = vadd.f32 1.0, %v5794_v39  ;;  %v2635_v25 = vadd.f32 1.0, %v5823_v34  ;;  %vm5865_vm1 = vcmp.lt.f32.partialorder %v2614_v29, 0.0004427343 }
  0xe5   :  { %v4601_v5 = vpop.eup %4600  ;;  %4608 = vlog2.f32 %v2608_v27  ;;  %v1372_v62 = vsel %vm5808_vm11, %v1369_v1, %v1366_v63  ;;  %v1400_v7 = vadd.f32 1.0, %v5797_v44  ;;  %v2611_v27 = vmul.f32 -0.5, %v5770_v36 }
  0xe6   :  { %v1384_v18 = vmul.f32 0.6931472, %v4601_v5  ;;  %v5837_v21 = vsel %vm812_vm9, %v5620_v55, %v1372_v62  ;;  %4610 = vlog2.f32 %v1391_v49  ;;  %v5847_v63 = vadd.f32 %v5588_v26, %v335_v53  ;;  %v4603_v55 = vpop.eup %4602 }
  0xe7   :  { %4612 = vlog2.f32 %v1400_v7  ;;  %v2647_v43 = vmul.f32 -0.5, %v5837_v21  ;;  %v4605_v2 = vpop.eup %4604  ;;  %v5858_v1 = vmul.f32 %v2603_v41, %v5757_v58  ;;  %v2644_v5 = vadd.f32 1.0, %v5837_v21 }
  0xe8   :  { %4614 = vpow2.f32 %v1085_v16  ;;  %v1390_v46 = vsel %vm5814_vm13, %v1387_v11, %v1384_v18  ;;  %v5863_v49 = vmul.f32 %v2630_v0, %v5803_v22  ;;  %v2612_v59 = vadd.f32 1.0, %v2611_v27 }
  0xe9   :  { %4616 = vlog2.f32 %v2626_v14  ;;  %v5873_v58 = vsel %vm814_vm14, %v5625_v61, %v1390_v46  ;;  %vm813_vm2 = vcmp.gt.f32.partialorder %v5643_v13, 20.0  ;;  %v1377_v7 = vadd.f32 1.0, %v1376_v37 }
  0xea   :  { %4618 = vlog2.f32 %v2635_v25  ;;  %v1394_v8 = vmul.f32 -0.5, %v5794_v39  ;;  %v948_v22 = vmin.f32 %v5847_v63, 20.0  ;;  %vm5878_vm3 = vcmp.lt.f32.partialorder %v2623_v9, 0.0004427343  ;;  %v332_v25 = vpop.xlane.xlu0 %331 }
  0xeb   :  { %v5882_v16 = vadd.f32 1.0, %v2647_v43  ;;  %v2638_v17 = vmul.f32 -0.5, %v5823_v34  ;;  %v1379_v14 = vand.u32 2147483647, %v5763_v6  ;;  %v1083_v18 = vmul.f32 1.442695, %v945_v51 }
  0xec   :  { %v2601_v61 = vmul.f32 0.6931472, %v4605_v2  ;;  %4620 = vlog2.f32 %v2644_v5  ;;  %v2641_v53 = vand.u32 2147483647, %v5823_v34  ;;  %vm10516_vm4 = vcmask 130112  }
  0xed   :  { %v2613_v9 = vmul.f32 %v2612_v59, %v5770_v36  ;;  %v2662_v27 = vadd.f32 1.0, %v5873_v58  ;;  %v1403_v29 = vmul.f32 -0.5, %v5797_v44  ;;  %v2619_v43 = vmul.f32 0.6931472, %v4603_v55 }
  0xee   :  { %v4607_v54 = vpop.eup %4606  ;;  %v1378_v46 = vmul.f32 %v5763_v6, %v1377_v7  ;;  %v1395_v56 = vadd.f32 1.0, %v1394_v8  ;;  %v1089_v51 = vmul.f32 1.442695, %v948_v22  ;;  %v2639_v5 = vadd.f32 1.0, %v2638_v17 }
  0xef   :  { %v4609_v62 = vpop.eup %4608  ;;  %v1375_v41 = vmul.f32 0.6931472, %v4607_v54  ;;  %vm5891_vm5 = vcmp.lt.f32.partialorder %v1379_v14, 0.0004427343  ;;  %vm815_vm6 = vcmp.gt.f32.partialorder %v5669_v31, 20.0  ;;  %4622 = vpow2.f32 %v1083_v18  ;;  %v341_v54 = vpop.xlane.xlu1 %340 }
  0xf0   :  { %v2610_v0 = vmul.f32 0.6931472, %v4609_v62  ;;  %v4611_v37 = vpop.eup %4610  ;;  %v5897_v36 = vadd.f32 %v5588_v26, %v332_v25  ;;  %v2607_v6 = vsel %vm5849_vm15, %v5858_v1, %v2601_v61  ;;  %vm5904_vm7 = vcmp.lt.f32.partialorder %v2632_v52, 0.0004427343  ;;  %v338_v25 = vpop.xlane.xlu0 %337 }
  0xf1   :  { %v4613_v2 = vpop.eup %4612  ;;  %vm10521_vm8 = vcmask 195712   ;;  %vm5908_vm9 = vcmp.lt.f32.partialorder %v2641_v53, 0.0004427343  ;;  %v1381_v7 = vsel %vm5891_vm5, %v1378_v46, %v1375_v41  ;;  %v1397_v8 = vand.u32 2147483647, %v5794_v39 }
  0xf2   :  { %v5899_v59 = vpop.eup %4614  ;;  %v2616_v17 = vsel %vm5865_vm1, %v2613_v9, %v2610_v0  ;;  %4624 = vlog2.f32 %v2662_v27  ;;  %vm816_vm10 = vcmp.gt.f32.partialorder %v5678_v35, 20.0  ;;  %v1404_v42 = vadd.f32 1.0, %v1403_v29 }
  0xf3   :  { %v4617_v22 = vpop.eup %4616  ;;  %v1393_v1 = vmul.f32 0.6931472, %v4611_v37  ;;  %v1406_v14 = vand.u32 2147483647, %v5797_v44  ;;  %v1396_v18 = vmul.f32 %v5794_v39, %v1395_v56  ;;  %4626 = vpow2.f32 %v1089_v51 }
  0xf4   :  { %v4619_v52 = vpop.eup %4618  ;;  %v5921_v50 = vadd.f32 %v5588_v26, %v341_v54  ;;  %vm3904_vm11 = vcmask 261312   ;;  %v5926_v38 = vsel %vm813_vm2, %v5643_v13, %v1381_v7  ;;  %v1402_v61 = vmul.f32 0.6931472, %v4613_v2  ;;  %v347_v2 = vpop.xlane.xlu1 %346 }
  0xf5   :  { %v1418_v53 = vadd.f32 1.0, %v5899_v59  ;;  %v947_v41 = vmin.f32 %v5897_v36, 20.0  ;;  %v2625_v39 = vsel %vm5878_vm3, %v5843_v30, %v2619_v43  ;;  %v3884_v56 = vrot.slane %v2607_v6, %v5658_v23  ;;  %v344_v30 = vpop.xlane.xlu0 %343 }
  0xf6   :  { %v3889_v0 = vrot.slane %v2616_v17, %v5672_v32  ;;  %vm5935_vm12 = vcmp.lt.f32.partialorder %v1397_v8, 0.0004427343  ;;  %v2628_v13 = vmul.f32 0.6931472, %v4617_v22  ;;  %v2637_v27 = vmul.f32 0.6931472, %v4619_v52  ;;  %v4621_v46 = vpop.eup %4620 }
  0xf7   :  { %v1405_v29 = vmul.f32 %v5797_v44, %v1404_v42  ;;  %v1399_v37 = vsel %vm5935_vm12, %v1396_v18, %v1393_v1  ;;  %vm3911_vm13 = vcmask 326912   ;;  %v2653_v11 = vadd.f32 1.0, %v5926_v38 }
  0xf8   :  { %vm5943_vm14 = vcmp.lt.f32.partialorder %v1406_v14, 0.0004427343  ;;  %v950_v43 = vmin.f32 %v5921_v50, 20.0  ;;  %v5949_v51 = vadd.f32 %v5588_v26, %v338_v25  ;;  %v2640_v54 = vmul.f32 %v2639_v5, %v5823_v34 }
  0xf9   :  { %v1408_v44 = vsel %vm5943_vm14, %v1405_v29, %v1402_v61  ;;  %4628 = vlog2.f32 %v1418_v53  ;;  %v1087_v6 = vmul.f32 1.442695, %v947_v41  ;;  %v3896_v7 = vrot.slane %v2625_v39, %v5651_v19  ;;  %v5962_v42 = vpop.eup %4622 }
  0xfa   :  { %v3891_v8 = vsel %vm10516_vm4, %v3889_v0, %v3884_v56  ;;  %v2665_v22 = vmul.f32 -0.5, %v5873_v58  ;;  %v5960_v17 = vsel %vm815_vm6, %v5669_v31, %v1399_v37  ;;  %v2634_v34 = vsel %vm5904_vm7, %v5863_v49, %v2628_v13 }
  0xfb   :  { %v2646_v5 = vmul.f32 0.6931472, %v4621_v46  ;;  %v2643_v1 = vsel %vm5908_vm9, %v2640_v54, %v2637_v27  ;;  %vm3918_vm15 = vcmask 392512   ;;  %v5970_v52 = vadd.f32 %v5588_v26, %v347_v2 }
  0xfc   :  { %4630 = vlog2.f32 %v2653_v11  ;;  %v5975_v31 = vsel %vm816_vm10, %v5678_v35, %v1408_v44  ;;  %v1093_v14 = vmul.f32 1.442695, %v950_v43  ;;  %v949_v18 = vmin.f32 %v5949_v51, 20.0  ;;  %v4625_v61 = vpop.eup %4624 }
  0xfd   :  { %v3898_v49 = vsel %vm10521_vm8, %v3896_v7, %v3891_v8  ;;  %v2649_v55 = vmul.f32 %v5882_v16, %v5837_v21  ;;  %v2671_v62 = vadd.f32 1.0, %v5960_v17  ;;  %4632 = vpow2.f32 %v1087_v6  ;;  %v5982_v53 = vpop.eup %4626 }
  0xfe   :  { %v3903_v41 = vrot.slane %v2634_v34, %v5664_v28  ;;  %v10574_v25 = vand.u32 2147483647, %v5837_v21  ;;  %v2666_v39 = vadd.f32 1.0, %v2665_v22  ;;  %v1409_v56 = vadd.f32 1.0, %v5962_v42 }
  0xff   :  { %v3910_v16 = vrot.slane %v2643_v1, %v5685_v40  ;;  %v2680_v9 = vadd.f32 1.0, %v5975_v31  ;;  %v952_v13 = vmin.f32 %v5970_v52, 20.0  ;;  %v1421_v21 = vmul.f32 -0.5, %v5899_v59 }
 0x100   :  { %vm5987_vm1 = vcmp.lt.f32.partialorder %v10574_v25, 0.0004427343  ;;  %v3905_v27 = vsel %vm3904_vm11, %v3903_v41, %v3898_v49  ;;  %4634 = vpow2.f32 %v1093_v14  ;;  %v1091_v29 = vmul.f32 1.442695, %v949_v18 }
 0x101   :  { %v2652_v0 = vsel %vm5987_vm1, %v2649_v55, %v2646_v5  ;;  %v2668_v37 = vand.u32 2147483647, %v5873_v58  ;;  %4636 = vlog2.f32 %v2671_v62  ;;  %v1436_v46 = vadd.f32 1.0, %v5982_v53 }
 0x102   :  { %v3976_v11 = vadd.s32 4294967184, %v5632_v4  ;;  %v3917_v43 = vrot.slane %v2652_v0, %v5675_v33  ;;  %v2664_v2 = vmul.f32 0.6931472, %v4625_v61  ;;  %4638 = vlog2.f32 %v1409_v56 }
 0x103   :  { %v6005_v54 = vsub.s32 %v5761_v3, %v5638_v10  ;;  %v4629_v44 = vpop.eup %4628  ;;  %v3912_v6 = vsel %vm3911_vm13, %v3910_v16, %v3905_v27  ;;  %v2656_v7 = vmul.f32 -0.5, %v5926_v38  ;;  %4640 = vlog2.f32 %v2680_v9 }
 0x104   :  { %v1097_v8 = vmul.f32 1.442695, %v952_v13  ;;  %v2667_v22 = vmul.f32 %v2666_v39, %v5873_v58  ;;  %v1422_v34 = vadd.f32 1.0, %v1421_v21  ;;  %4642 = vpow2.f32 %v1091_v29 }
 0x105   :  { %10577 = vst [vmem:[#allocation13_spill] sm:$0xff] %v6005_v54  ;;  %v6011_v4 = vadd.f32 %v5588_v26, %v344_v30  ;;  %vm6013_vm2 = vcmp.lt.f32.partialorder %v2668_v37, 0.0004427343  ;;  %v1424_v3 = vand.u32 2147483647, %v5899_v59  ;;  %4644 = vlog2.f32 %v1436_v46  ;;  %v148_v46 = vld [vmem:[#allocation3 + $0x3b8] sm:$0xff] }
 0x106   :  { %v6019_v1 = vsub.s32 %v3976_v11, %v5638_v10  ;;  %v4631_v14 = vpop.eup %4630  ;;  %v2670_v18 = vsel %vm6013_vm2, %v2667_v22, %v2664_v2  ;;  %v6024_v58 = vsel %vm3918_vm15, %v3917_v43, %v3912_v6  ;;  %vm818_vm3 = vcmp.gt.f32.partialorder %v5774_v12, 20.0  ;;  %v353_v10 = vpop.xlane.xlu1 %352 }
 0x107   :  { %v1420_v61 = vmul.f32 0.6931472, %v4629_v44  ;;  %v6027_v49 = vpop.eup %4632  ;;  %v2657_v55 = vadd.f32 1.0, %v2656_v7  ;;  %v2659_v62 = vand.u32 2147483647, %v5926_v38  ;;  %v2674_v41 = vmul.f32 -0.5, %v5960_v17 }
 0x108   :  { %10580 = vst [vmem:[#allocation14_spill] sm:$0xff] %v6019_v1  ;;  %4646 = vpow2.f32 %v1097_v8  ;;  %v2683_v25 = vmul.f32 -0.5, %v5975_v31  ;;  %v1423_v35 = vmul.f32 %v5899_v59, %v1422_v34  ;;  %v1412_v39 = vmul.f32 -0.5, %v5962_v42 }
 0x109   :  { %v951_v56 = vmin.f32 %v6011_v4, 20.0  ;;  %v6036_v0 = vrot.slane %v2670_v18, %v5691_v45  ;;  %v2655_v16 = vmul.f32 0.6931472, %v4631_v14  ;;  %v2677_v9 = vand.u32 2147483647, %v5960_v17 }
 0x10a   :  { %vm6039_vm5 = vcmp.lt.f32.partialorder %v1424_v3, 0.0004427343  ;;  %v6043_v27 = vpop.eup %4634  ;;  %v1415_v59 = vand.u32 2147483647, %v5962_v42  ;;  %v1427_v29 = vadd.f32 1.0, %v6027_v49  ;;  %v6050_v37 = vadd.f32 %v5588_v26, %v353_v10 }
 0x10b   :  { %v1426_v21 = vsel %vm6039_vm5, %v1423_v35, %v1420_v61  ;;  %v4637_v11 = vpop.eup %4636  ;;  %vm3925_vm6 = vcmask 458112   ;;  %v2658_v30 = vmul.f32 %v2657_v55, %v5926_v38  ;;  %vm6053_vm7 = vcmp.lt.f32.partialorder %v2659_v62, 0.0004427343  ;;  %v6071_v18 = vld [vmem:[%s10505_s1] ss:$0 sm:$0xff] }
 0x10c   :  { %v2675_v2 = vadd.f32 1.0, %v2674_v41  ;;  %v1439_v44 = vmul.f32 -0.5, %v5982_v53  ;;  %v4639_v6 = vpop.eup %4638  ;;  %v2684_v7 = vadd.f32 1.0, %v2683_v25  ;;  %v2686_v8 = vand.u32 2147483647, %v5975_v31 }
 0x10d   :  { %v1413_v22 = vadd.f32 1.0, %v1412_v39  ;;  %v1095_v34 = vmul.f32 1.442695, %v951_v56  ;;  %v4641_v5 = vpop.eup %4640  ;;  %v2661_v3 = vsel %vm6053_vm7, %v2658_v30, %v2655_v16  ;;  %v6064_v38 = vsel %vm818_vm3, %v5774_v12, %v1426_v21  ;;  %v133_v16 = vld [vmem:[#allocation3 + $0x340] sm:$0xff] }
 0x10e   :  { %vm817_vm9 = vcmp.gt.f32.partialorder %v5832_v20, 20.0  ;;  %v1454_v14 = vadd.f32 1.0, %v6043_v27  ;;  %v284_v61 = vmul.f32 %v6071_v18, %v148_v46  ;;  %v6074_v55 = vpop.eup %4642  ;;  %vm6076_vm10 = vcmp.lt.f32.partialorder %v2677_v9, 0.0004427343 }
 0x10f   :  { %vm6080_vm12 = vcmp.lt.f32.partialorder %v1415_v59, 0.0004427343  ;;  %4648 = vlog2.f32 %v1427_v29  ;;  %v954_v41 = vmin.f32 %v6050_v37, 20.0  ;;  %v4645_v10 = vpop.eup %4644  ;;  %vm3932_vm14 = vcmask 523712  }
 0x110   :  { %v2673_v25 = vmul.f32 0.6931472, %v4637_v11  ;;  %v2676_v35 = vmul.f32 %v2675_v2, %v5960_v17  ;;  %v1411_v39 = vmul.f32 0.6931472, %v4639_v6  ;;  %v1440_v56 = vadd.f32 1.0, %v1439_v44 }
 0x111   :  { %v3924_v9 = vrot.slane %v2661_v3, %v5694_v47  ;;  %vm10523_vm1 = vcmask 589312   ;;  %v2698_v13 = vadd.f32 1.0, %v6064_v38  ;;  %vm820_vm2 = vcmp.gt.f32.partialorder %v5847_v63, 20.0 }
 0x112   :  { %v1442_v21 = vand.u32 2147483647, %v5982_v53  ;;  %4650 = vpow2.f32 %v1095_v34  ;;  %v6090_v59 = vpop.eup %4646  ;;  %v1414_v29 = vmul.f32 %v5962_v42, %v1413_v22  ;;  %v1445_v17 = vadd.f32 1.0, %v6074_v55 }
 0x113   :  { %4652 = vlog2.f32 %v1454_v14  ;;  %v651_v46 = vsel %vm293_vm0, %v284_v61, 0.0  ;;  %v2682_v11 = vmul.f32 0.6931472, %v4641_v5  ;;  %v1438_v30 = vmul.f32 0.6931472, %v4645_v10 }
 0x114   :  { %v1101_v43 = vmul.f32 1.442695, %v954_v41  ;;  %652 = vadd.xlane.f32.xlu1 %v651_v46  ;;  %v269_v2 = vmul.f32 %v6071_v18, %v133_v16  ;;  %v2679_v44 = vsel %vm6076_vm10, %v2676_v35, %v2673_v25  ;;  %v2701_v6 = vmul.f32 -0.5, %v6064_v38 }
 0x115   :  { %vm10509_vm3 = vcmask 654912   ;;  %v1417_v42 = vsel %vm6080_vm12, %v1414_v29, %v1411_v39  ;;  %v1441_v22 = vmul.f32 %v5982_v53, %v1440_v56  ;;  %4654 = vlog2.f32 %v2698_v13 }
 0x116   :  { %v1430_v34 = vmul.f32 -0.5, %v6027_v49  ;;  %v1472_v5 = vadd.f32 1.0, %v6090_v59  ;;  %v606_v3 = vsel %vm293_vm0, %v269_v2, 0.0  ;;  %v2685_v14 = vmul.f32 %v2684_v7, %v5975_v31  ;;  %v350_v7 = vpop.xlane.xlu0 %349 }
 0x117   :  { %vm6106_vm5 = vcmp.lt.f32.partialorder %v2686_v8, 0.0004427343  ;;  %vm6110_vm7 = vcmp.lt.f32.partialorder %v1442_v21, 0.0004427343  ;;  %4656 = vlog2.f32 %v1445_v17  ;;  %607 = vadd.xlane.f32.xlu0 %v606_v3  ;;  %v3926_v53 = vsel %vm3925_vm6, %v3924_v9, %v6024_v58 }
 0x118   :  { %v6119_v12 = vsel %vm817_vm9, %v5832_v20, %v1417_v42  ;;  %v1444_v31 = vsel %vm6110_vm7, %v1441_v22, %v1438_v30  ;;  %4658 = vpow2.f32 %v1101_v43  ;;  %v2688_v8 = vsel %vm6106_vm5, %v2685_v14, %v2682_v11  ;;  %v89_v43 = vld [vmem:[#allocation3 + $0x1e0] sm:$0xff] }
 0x119   :  { %v3938_v41 = vrot.slane %v2679_v44, %v5705_v57  ;;  %v1433_v10 = vand.u32 2147483647, %v6027_v49  ;;  %v1457_v25 = vmul.f32 -0.5, %v6043_v27  ;;  %v4649_v58 = vpop.eup %4648  ;;  %v2702_v35 = vadd.f32 1.0, %v2701_v6 }
 0x11a   :  { %v2704_v39 = vand.u32 2147483647, %v6064_v38  ;;  %v1431_v20 = vadd.f32 1.0, %v1430_v34  ;;  %4660 = vlog2.f32 %v1472_v5  ;;  %v2689_v56 = vadd.f32 1.0, %v6119_v12 }
 0x11b   :  { %v6133_v16 = vsel %vm820_vm2, %v5847_v63, %v1444_v31  ;;  %v1448_v9 = vmul.f32 -0.5, %v6074_v55  ;;  %v6137_v13 = vadd.f32 %v5588_v26, %v350_v7  ;;  %v3945_v29 = vrot.slane %v2688_v8, %v5697_v48 }
 0x11c   :  { %v6139_v21 = vpop.eup %4650  ;;  %v3933_v17 = vsel %vm3932_vm14, %v6036_v0, %v3926_v53  ;;  %vm819_vm9 = vcmp.gt.f32.partialorder %v5897_v36, 20.0  ;;  %v1460_v46 = vand.u32 2147483647, %v6043_v27  ;;  %v1429_v30 = vmul.f32 0.6931472, %v4649_v58 }
 0x11d   :  { %v4653_v11 = vpop.eup %4652  ;;  %v3940_v63 = vsel %vm10523_vm1, %v3938_v41, %v3933_v17  ;;  %vm6147_vm10 = vcmp.lt.f32.partialorder %v1433_v10, 0.0004427343  ;;  %v1458_v2 = vadd.f32 1.0, %v1457_v25  ;;  %v6152_v44 = vmul.f32 %v2702_v35, %v6064_v38  ;;  %v359_v38 = vpop.xlane.xlu1 %358 }
 0x11e   :  { %v2692_v6 = vmul.f32 -0.5, %v6119_v12  ;;  %v2716_v0 = vadd.f32 1.0, %v6133_v16  ;;  %v1432_v42 = vmul.f32 %v6027_v49, %v1431_v20  ;;  %vm6157_vm12 = vcmp.lt.f32.partialorder %v2704_v39, 0.0004427343  ;;  %v356_v20 = vpop.xlane.xlu0 %355 }
 0x11f   :  { %4662 = vlog2.f32 %v2689_v56  ;;  %vm822_vm2 = vcmp.gt.f32.partialorder %v5921_v50, 20.0  ;;  %v1449_v34 = vadd.f32 1.0, %v1448_v9  ;;  %v1463_v5 = vadd.f32 1.0, %v6139_v21  ;;  %v4655_v14 = vpop.eup %4654  ;;  %v104_v56 = vld [vmem:[#allocation3 + $0x258] sm:$0xff] }
 0x120   :  { %v953_v3 = vmin.f32 %v6137_v13, 20.0  ;;  %v6165_v61 = vsel %vm10509_vm3, %v3945_v29, %v3940_v63  ;;  %v1456_v62 = vmul.f32 0.6931472, %v4653_v11  ;;  %vm6167_vm5 = vcmp.lt.f32.partialorder %v1460_v46, 0.0004427343 }
 0x121   :  { %v1475_v53 = vmul.f32 -0.5, %v6090_v59  ;;  %v4657_v31 = vpop.eup %4656  ;;  %v2695_v7 = vand.u32 2147483647, %v6119_v12  ;;  %v1435_v8 = vsel %vm6147_vm10, %v1432_v42, %v1429_v30  ;;  %v1459_v41 = vmul.f32 %v6043_v27, %v1458_v2 }
 0x122   :  { %v1451_v10 = vand.u32 2147483647, %v6074_v55  ;;  %v6177_v25 = vpop.eup %4658  ;;  %v2693_v58 = vadd.f32 1.0, %v2692_v6  ;;  %4664 = vlog2.f32 %v2716_v0  ;;  %v2719_v35 = vmul.f32 -0.5, %v6133_v16 }
 0x123   :  { %v6181_v39 = vadd.f32 %v5588_v26, %v359_v38  ;;  %v2722_v9 = vand.u32 2147483647, %v6133_v16  ;;  %vm821_vm7 = vcmp.gt.f32.partialorder %v5949_v51, 20.0  ;;  %v1450_v29 = vmul.f32 %v6074_v55, %v1449_v34 }
 0x124   :  { %4666 = vlog2.f32 %v1463_v5  ;;  %v1099_v27 = vmul.f32 1.442695, %v953_v3  ;;  %v4661_v17 = vpop.eup %4660  ;;  %v2700_v46 = vmul.f32 0.6931472, %v4655_v14  ;;  %v6189_v11 = vsel %vm819_vm9, %v5897_v36, %v1435_v8 }
 0x125   :  { %v1462_v63 = vsel %vm6167_vm5, %v1459_v41, %v1456_v62  ;;  %v1476_v30 = vadd.f32 1.0, %v1475_v53  ;;  %v1447_v2 = vmul.f32 0.6931472, %v4657_v31  ;;  %vm824_vm10 = vcmp.gt.f32.partialorder %v5970_v52, 20.0  ;;  %v365_v62 = vpop.xlane.xlu1 %364 }
 0x126   :  { %v1490_v6 = vadd.f32 1.0, %v6177_v25  ;;  %v6196_v55 = vadd.f32 %v5588_v26, %v356_v20  ;;  %v240_v0 = vmul.f32 %v6071_v18, %v104_v56  ;;  %v6200_v42 = vmul.f32 %v2693_v58, %v6119_v12 }
 0x127   :  { %vm6202_vm9 = vcmp.lt.f32.partialorder %v1451_v10, 0.0004427343  ;;  %v1478_v34 = vand.u32 2147483647, %v6090_v59  ;;  %v956_v5 = vmin.f32 %v6181_v39, 20.0  ;;  %v2720_v38 = vadd.f32 1.0, %v2719_v35 }
 0x128   :  { %vm6208_vm5 = vcmp.lt.f32.partialorder %v2695_v7, 0.0004427343  ;;  %v1474_v14 = vmul.f32 0.6931472, %v4661_v17  ;;  %4668 = vpow2.f32 %v1099_v27  ;;  %v225_v49 = vmul.f32 %v6071_v18, %v89_v43 }
 0x129   :  { %v2706_v12 = vsel %vm6157_vm12, %v6152_v44, %v2700_v46  ;;  %v2707_v53 = vadd.f32 1.0, %v6189_v11  ;;  %v6220_v31 = vsel %vm822_vm2, %v5921_v50, %v1462_v63  ;;  %v1477_v7 = vmul.f32 %v6090_v59, %v1476_v30  ;;  %v4663_v8 = vpop.eup %4662  ;;  %v362_v59 = vpop.xlane.xlu0 %361 }
 0x12a   :  { %v1453_v41 = vsel %vm6202_vm9, %v1450_v29, %v1447_v2  ;;  %4670 = vlog2.f32 %v1490_v6  ;;  %v955_v10 = vmin.f32 %v6196_v55, 20.0  ;;  %v519_v58 = vsel %vm293_vm0, %v240_v0, 0.0 }
 0x12b   :  { %vm6227_vm3 = vcmp.lt.f32.partialorder %v1478_v34, 0.0004427343  ;;  %v1466_v22 = vmul.f32 -0.5, %v6139_v21  ;;  %v1105_v35 = vmul.f32 1.442695, %v956_v5  ;;  %v6233_v50 = vadd.f32 %v5588_v26, %v365_v62  ;;  %520 = vadd.xlane.f32.xlu1 %v519_v58 }
 0x12c   :  { %v6236_v20 = vmul.f32 %v2720_v38, %v6133_v16  ;;  %v2710_v56 = vmul.f32 -0.5, %v6189_v11  ;;  %v1480_v29 = vsel %vm6227_vm3, %v1477_v7, %v1474_v14  ;;  %v474_v27 = vsel %vm293_vm0, %v225_v49, 0.0  ;;  %v4665_v17 = vpop.eup %4664 }
 0x12d   :  { %vm10510_vm12 = vcmask 720512   ;;  %v2691_v46 = vmul.f32 0.6931472, %v4663_v8  ;;  %vm6242_vm2 = vcmp.lt.f32.partialorder %v2722_v9, 0.0004427343  ;;  %4672 = vlog2.f32 %v2707_v53  ;;  %475 = vadd.xlane.f32.xlu0 %v474_v27 }
 0x12e   :  { %v2734_v30 = vadd.f32 1.0, %v6220_v31  ;;  %v6250_v16 = vsel %vm821_vm7, %v5949_v51, %v1453_v41  ;;  %v4667_v43 = vpop.eup %4666  ;;  %v6253_v2 = vrot.slane %v2706_v12, %v5708_v60  ;;  %v2737_v6 = vmul.f32 -0.5, %v6220_v31 }
 0x12f   :  { %v1103_v0 = vmul.f32 1.442695, %v955_v10  ;;  %v6257_v9 = vadd.f32 %v5588_v26, %v362_v59  ;;  %v6262_v36 = vsel %vm824_vm10, %v5970_v52, %v1480_v29  ;;  %vm823_vm3 = vcmp.gt.f32.partialorder %v6011_v4, 20.0  ;;  %v368_v10 = vpop.xlane.xlu0 %367 }
 0x130   :  { %v1467_v51 = vadd.f32 1.0, %v1466_v22  ;;  %4674 = vpow2.f32 %v1105_v35  ;;  %v958_v34 = vmin.f32 %v6233_v50, 20.0  ;;  %v2711_v5 = vadd.f32 1.0, %v2710_v56 }
 0x131   :  { %v2713_v38 = vand.u32 2147483647, %v6189_v11  ;;  %v2725_v14 = vadd.f32 1.0, %v6250_v16  ;;  %v1469_v62 = vand.u32 2147483647, %v6139_v21  ;;  %v2697_v49 = vsel %vm6208_vm5, %v6200_v42, %v2691_v46  ;;  %v371_v46 = vpop.xlane.xlu1 %370 }
 0x132   :  { %4676 = vlog2.f32 %v2734_v30  ;;  %v1465_v52 = vmul.f32 0.6931472, %v4667_v43  ;;  %v1493_v12 = vmul.f32 -0.5, %v6177_v25  ;;  %v6273_v53 = vpop.eup %4668  ;;  %v2718_v7 = vmul.f32 0.6931472, %v4665_v17 }
 0x133   :  { %vm10522_vm7 = vcmask 786112   ;;  %v2752_v8 = vadd.f32 1.0, %v6262_v36  ;;  %4678 = vpow2.f32 %v1103_v0  ;;  %v957_v41 = vmin.f32 %v6257_v9, 20.0 }
 0x134   :  { %v2738_v58 = vadd.f32 1.0, %v2737_v6  ;;  %v2740_v44 = vand.u32 2147483647, %v6220_v31  ;;  %v1468_v3 = vmul.f32 %v6139_v21, %v1467_v51  ;;  %v1109_v42 = vmul.f32 1.442695, %v958_v34  ;;  %v4671_v22 = vpop.eup %4670 }
 0x135   :  { %v3952_v35 = vrot.slane %v2697_v49, %v5717_v15  ;;  %v6281_v59 = vmul.f32 %v2711_v5, %v6189_v11  ;;  %4680 = vlog2.f32 %v2725_v14  ;;  %vm6283_vm10 = vcmp.lt.f32.partialorder %v1469_v62, 0.0004427343  ;;  %v134_v11 = vld [vmem:[#allocation3 + $0x348] sm:$0xff] }
 0x136   :  { %vm6287_vm9 = vcmp.lt.f32.partialorder %v2713_v38, 0.0004427343  ;;  %v1471_v27 = vsel %vm6283_vm10, %v1468_v3, %v1465_v52  ;;  %v1494_v21 = vadd.f32 1.0, %v1493_v12  ;;  %v1481_v17 = vadd.f32 1.0, %v6273_v53 }
 0x137   :  { %v6295_v30 = vadd.f32 %v5588_v26, %v368_v10  ;;  %v2724_v43 = vsel %vm6242_vm2, %v6236_v20, %v2718_v7  ;;  %4682 = vlog2.f32 %v2752_v8  ;;  %vm826_vm5 = vcmp.gt.f32.partialorder %v6050_v37, 20.0  ;;  %v4673_v51 = vpop.eup %4672 }
 0x138   :  { %v1496_v6 = vand.u32 2147483647, %v6177_v25  ;;  %v1107_v0 = vmul.f32 1.442695, %v957_v41  ;;  %v6303_v34 = vmul.f32 %v2738_v58, %v6220_v31  ;;  %v2728_v5 = vmul.f32 -0.5, %v6250_v16 }
 0x139   :  { %v1492_v38 = vmul.f32 0.6931472, %v4671_v22  ;;  %4684 = vpow2.f32 %v1109_v42  ;;  %v3954_v14 = vsel %vm10510_vm12, %v3952_v35, %v6165_v61  ;;  %v6311_v20 = vsel %vm823_vm3, %v6011_v4, %v1471_v27  ;;  %v119_v4 = vld [vmem:[#allocation3 + $0x2d0] sm:$0xff] }
 0x13a   :  { %v6314_v63 = vadd.f32 %v5588_v26, %v371_v46  ;;  %v270_v62 = vmul.f32 %v6071_v18, %v134_v11  ;;  %v6317_v49 = vpop.eup %4674  ;;  %vm6319_vm2 = vcmp.lt.f32.partialorder %v2740_v44, 0.0004427343  ;;  %v2731_v52 = vand.u32 2147483647, %v6250_v16 }
 0x13b   :  { %v1495_v61 = vmul.f32 %v6177_v25, %v1494_v21  ;;  %4686 = vlog2.f32 %v1481_v17  ;;  %v959_v12 = vmin.f32 %v6295_v30, 20.0  ;;  %vm10515_vm3 = vcmask 851712   ;;  %v90_v21 = vld [vmem:[#allocation3 + $0x1e8] sm:$0xff] }
 0x13c   :  { %v2709_v7 = vmul.f32 0.6931472, %v4673_v51  ;;  %v2755_v8 = vmul.f32 -0.5, %v6262_v36  ;;  %vm6327_vm10 = vcmp.lt.f32.partialorder %v1496_v6, 0.0004427343  ;;  %4688 = vpow2.f32 %v1107_v0  ;;  %v4677_v10 = vpop.eup %4676 }
 0x13d   :  { %v6332_v58 = vrot.slane %v2724_v43, %v5722_v24  ;;  %v2729_v44 = vadd.f32 1.0, %v2728_v5  ;;  %v2743_v25 = vadd.f32 1.0, %v6311_v20  ;;  %v1498_v3 = vsel %vm6327_vm10, %v1495_v61, %v1492_v38  ;;  %v6337_v42 = vpop.eup %4678  ;;  %v377_v38 = vpop.xlane.xlu1 %376  ;;  %v149_v61 = vld [vmem:[#allocation3 + $0x3c0] sm:$0xff] }
 0x13e   :  { %v1508_v22 = vadd.f32 1.0, %v6317_v49  ;;  %v960_v35 = vmin.f32 %v6314_v63, 20.0  ;;  %v609_v56 = vsel %vm293_vm0, %v270_v62, 0.0  ;;  %v255_v27 = vmul.f32 %v6071_v18, %v119_v4 }
 0x13f   :  { %v3961_v17 = vsel %vm10522_vm7, %v6253_v2, %v3954_v14  ;;  %vm6345_vm12 = vcmp.lt.f32.partialorder %v2731_v52, 0.0004427343  ;;  %v2758_v11 = vand.u32 2147483647, %v6262_v36  ;;  %v1111_v43 = vmul.f32 1.442695, %v959_v12  ;;  %610 = vadd.xlane.f32.xlu1 %v609_v56  ;;  %v4681_v6 = vpop.eup %4680 }
 0x140   :  { %v2715_v0 = vsel %vm6287_vm9, %v6281_v59, %v2709_v7  ;;  %v6353_v51 = vmul.f32 0.6931472, %v4677_v10  ;;  %v2756_v5 = vadd.f32 1.0, %v2755_v8  ;;  %v564_v62 = vsel %vm293_vm0, %v255_v27, 0.0 }
 0x141   :  { %v2730_v2 = vmul.f32 %v2729_v44, %v6250_v16  ;;  %4690 = vlog2.f32 %v2743_v25  ;;  %v6360_v14 = vsel %vm826_vm5, %v6050_v37, %v1498_v3  ;;  %v1499_v52 = vadd.f32 1.0, %v6337_v42  ;;  %565 = vadd.xlane.f32.xlu0 %v564_v62  ;;  %v4683_v29 = vpop.eup %4682  ;;  %v10617_v16 = vld [vmem:[#allocation12_spill] sm:$0xff]  ;;  %v374_v3 = vpop.xlane.xlu0 %373 }
 0x142   :  { %v1484_v59 = vmul.f32 -0.5, %v6273_v53  ;;  %4692 = vlog2.f32 %v1508_v22  ;;  %v1113_v12 = vmul.f32 1.442695, %v960_v35  ;;  %v226_v4 = vmul.f32 %v6071_v18, %v90_v21 }
 0x143   :  { %v6365_v7 = vpop.eup %4684  ;;  %v3966_v8 = vrot.slane %v2715_v0, %v10617_v16  ;;  %vm6368_vm9 = vcmp.lt.f32.partialorder %v2758_v11, 0.0004427343  ;;  %4694 = vpow2.f32 %v1111_v43  ;;  %v6373_v37 = vadd.f32 %v5588_v26, %v377_v38 }
 0x144   :  { %v2727_v44 = vmul.f32 0.6931472, %v4681_v6  ;;  %v2757_v25 = vmul.f32 %v2756_v5, %v6262_v36  ;;  %v285_v22 = vmul.f32 %v6071_v18, %v149_v61  ;;  %v2754_v56 = vmul.f32 0.6931472, %v4683_v29 }
 0x145   :  { %v4687_v35 = vpop.eup %4686  ;;  %v2746_v27 = vmul.f32 -0.5, %v6311_v20  ;;  %v2770_v21 = vadd.f32 1.0, %v6360_v14  ;;  %4696 = vlog2.f32 %v1499_v52  ;;  %vm825_vm5 = vcmp.gt.f32.partialorder %v6137_v13, 20.0 }
 0x146   :  { %v6383_v11 = vpop.eup %4688  ;;  %v1485_v43 = vadd.f32 1.0, %v1484_v59  ;;  %v1526_v0 = vadd.f32 1.0, %v6365_v7  ;;  %4698 = vpow2.f32 %v1113_v12  ;;  %v477_v36 = vsel %vm293_vm0, %v226_v4, 0.0 }
 0x147   :  { %v6389_v6 = vsel %vm10515_vm3, %v3966_v8, %v3961_v17  ;;  %v1487_v5 = vand.u32 2147483647, %v6273_v53  ;;  %v962_v38 = vmin.f32 %v6373_v37, 20.0  ;;  %v6394_v62 = vadd.f32 %v5588_v26, %v374_v3  ;;  %478 = vadd.xlane.f32.xlu1 %v477_v36  ;;  %v120_v8 = vld [vmem:[#allocation3 + $0x2d8] sm:$0xff] }
 0x148   :  { %v2733_v52 = vsel %vm6345_vm12, %v2730_v2, %v2727_v44  ;;  %v2749_v61 = vand.u32 2147483647, %v6311_v20  ;;  %v1483_v29 = vmul.f32 0.6931472, %v4687_v35  ;;  %v654_v59 = vsel %vm293_vm0, %v285_v22, 0.0 }
 0x149   :  { %v2760_v17 = vsel %vm6368_vm9, %v2757_v25, %v2754_v56  ;;  %4700 = vlog2.f32 %v2770_v21  ;;  %v1511_v12 = vmul.f32 -0.5, %v6317_v49  ;;  %v1517_v4 = vadd.f32 1.0, %v6383_v11  ;;  %655 = vadd.xlane.f32.xlu0 %v654_v59 }
 0x14a   :  { %v2747_v3 = vadd.f32 1.0, %v2746_v27  ;;  %v2773_v36 = vmul.f32 -0.5, %v6360_v14  ;;  %v1486_v46 = vmul.f32 %v6273_v53, %v1485_v43  ;;  %4702 = vlog2.f32 %v1526_v0 }
 0x14b   :  { %v4691_v2 = vpop.eup %4690  ;;  %v6407_v44 = vrot.slane %v2733_v52, %v6019_v1  ;;  %vm6409_vm12 = vcmp.lt.f32.partialorder %v1487_v5, 0.0004427343  ;;  %v1117_v25 = vmul.f32 1.442695, %v962_v38  ;;  %v961_v22 = vmin.f32 %v6394_v62, 20.0  ;;  %v105_v52 = vld [vmem:[#allocation3 + $0x260] sm:$0xff] }
 0x14c   :  { %v4693_v35 = vpop.eup %4692  ;;  %v6415_v56 = vrot.slane %v2760_v17, %v5672_v32  ;;  %v1489_v27 = vsel %vm6409_vm12, %v1486_v46, %v1483_v29  ;;  %v1514_v53 = vand.u32 2147483647, %v6317_v49  ;;  %v256_v21 = vmul.f32 %v6071_v18, %v120_v8 }
 0x14d   :  { %v6421_v43 = vpop.eup %4694  ;;  %vm6423_vm10 = vcmp.lt.f32.partialorder %v2749_v61, 0.0004427343  ;;  %vm828_vm9 = vcmp.gt.f32.partialorder %v6181_v39, 20.0  ;;  %v1512_v5 = vadd.f32 1.0, %v1511_v12  ;;  %v1502_v38 = vmul.f32 -0.5, %v6337_v42 }
 0x14e   :  { %4704 = vlog2.f32 %v1517_v4  ;;  %v2745_v59 = vmul.f32 0.6931472, %v4691_v2  ;;  %v2748_v29 = vmul.f32 %v2747_v3, %v6311_v20  ;;  %v2774_v17 = vadd.f32 1.0, %v2773_v36  ;;  %v383_v3 = vpop.xlane.xlu1 %382 }
 0x14f   :  { %v2776_v46 = vand.u32 2147483647, %v6360_v14  ;;  %v4697_v8 = vpop.eup %4696  ;;  %v6434_v61 = vsel %vm825_vm5, %v6137_v13, %v1489_v27  ;;  %v1510_v41 = vmul.f32 0.6931472, %v4693_v35  ;;  %4706 = vpow2.f32 %v1117_v25 }
 0x150   :  { %v1115_v10 = vmul.f32 1.442695, %v961_v22  ;;  %v6436_v12 = vpop.eup %4698  ;;  %vm6438_vm12 = vcmp.lt.f32.partialorder %v1514_v53, 0.0004427343  ;;  %v1535_v20 = vadd.f32 1.0, %v6421_v43  ;;  %v567_v36 = vsel %vm293_vm0, %v256_v21, 0.0 }
 0x151   :  { %v241_v2 = vmul.f32 %v6071_v18, %v105_v52  ;;  %v1513_v1 = vmul.f32 %v6317_v49, %v1512_v5  ;;  %vm827_vm5 = vcmp.gt.f32.partialorder %v6196_v55, 20.0  ;;  %v1503_v13 = vadd.f32 1.0, %v1502_v38  ;;  %568 = vadd.xlane.f32.xlu1 %v567_v36 }
 0x152   :  { %v1505_v25 = vand.u32 2147483647, %v6337_v42  ;;  %v1529_v22 = vmul.f32 -0.5, %v6365_v7  ;;  %v2751_v35 = vsel %vm6423_vm10, %v2748_v29, %v2745_v59  ;;  %v2761_v27 = vadd.f32 1.0, %v6434_v61 }
 0x153   :  { %v1501_v53 = vmul.f32 0.6931472, %v4697_v8  ;;  %v522_v21 = vsel %vm293_vm0, %v241_v2, 0.0  ;;  %v4701_v32 = vpop.eup %4700  ;;  %v1516_v49 = vsel %vm6438_vm12, %v1513_v1, %v1510_v41  ;;  %v1544_v5 = vadd.f32 1.0, %v6436_v12 }
 0x154   :  { %4708 = vpow2.f32 %v1115_v10  ;;  %v6457_v38 = vadd.f32 %v5588_v26, %v383_v3  ;;  %523 = vadd.xlane.f32.xlu0 %v522_v21  ;;  %v4703_v52 = vpop.eup %4702  ;;  %vm6459_vm3 = vcmp.lt.f32.partialorder %v2776_v46, 0.0004427343  ;;  %v2764_v59 = vmul.f32 -0.5, %v6434_v61  ;;  %v380_v3 = vpop.xlane.xlu0 %379 }
 0x155   :  { %v1520_v29 = vmul.f32 -0.5, %v6383_v11  ;;  %4710 = vlog2.f32 %v1535_v20  ;;  %v3993_v8 = vrot.slane %v2751_v35, %v5658_v23  ;;  %v1504_v1 = vmul.f32 %v6337_v42, %v1503_v13  ;;  %v150_v35 = vld [vmem:[#allocation3 + $0x3c8] sm:$0xff] }
 0x156   :  { %vm830_vm10 = vcmp.gt.f32.partialorder %v6233_v50, 20.0  ;;  %v1530_v10 = vadd.f32 1.0, %v1529_v22  ;;  %v1532_v41 = vand.u32 2147483647, %v6365_v7  ;;  %v6469_v4 = vmul.f32 0.6931472, %v4701_v32 }
 0x157   :  { %4712 = vlog2.f32 %v2761_v27  ;;  %v6474_v46 = vsel %vm828_vm9, %v6181_v39, %v1516_v49  ;;  %vm6476_vm12 = vcmp.lt.f32.partialorder %v1505_v25, 0.0004427343  ;;  %v1528_v36 = vmul.f32 0.6931472, %v4703_v52  ;;  %v135_v52 = vld [vmem:[#allocation3 + $0x350] sm:$0xff] }
 0x158   :  { %v4705_v20 = vpop.eup %4704  ;;  %v1507_v42 = vsel %vm6476_vm12, %v1504_v1, %v1501_v53  ;;  %4714 = vlog2.f32 %v1544_v5  ;;  %v964_v2 = vmin.f32 %v6457_v38, 20.0  ;;  %v6484_v32 = vmul.f32 %v2774_v17, %v6360_v14 }
 0x159   :  { %v2765_v13 = vadd.f32 1.0, %v2764_v59  ;;  %v1521_v22 = vadd.f32 1.0, %v1520_v29  ;;  %v1523_v39 = vand.u32 2147483647, %v6383_v11  ;;  %v6487_v25 = vpop.eup %4706  ;;  %v6491_v27 = vsel %vm10516_vm4, %v6415_v56, %v3993_v8 }
 0x15a   :  { %v2788_v53 = vadd.f32 1.0, %v6474_v46  ;;  %v1531_v21 = vmul.f32 %v6365_v7, %v1530_v10  ;;  %vm6495_vm9 = vcmp.lt.f32.partialorder %v1532_v41, 0.0004427343  ;;  %v2767_v14 = vand.u32 2147483647, %v6434_v61 }
 0x15b   :  { %v6503_v17 = vsel %vm827_vm5, %v6196_v55, %v1507_v42  ;;  %vm829_vm12 = vcmp.gt.f32.partialorder %v6257_v9, 20.0  ;;  %v1519_v5 = vmul.f32 0.6931472, %v4705_v20  ;;  %v1538_v56 = vmul.f32 -0.5, %v6421_v43 }
 0x15c   :  { %v1534_v59 = vsel %vm6495_vm9, %v1531_v21, %v1528_v36  ;;  %v1121_v29 = vmul.f32 1.442695, %v964_v2  ;;  %v286_v8 = vmul.f32 %v6071_v18, %v150_v35  ;;  %v6515_v55 = vmul.f32 %v2765_v13, %v6434_v61  ;;  %v106_v61 = vld [vmem:[#allocation3 + $0x268] sm:$0xff]  ;;  %v91_v13 = vld [vmem:[#allocation3 + $0x1f0] sm:$0xff] }
 0x15d   :  { %v1522_v1 = vmul.f32 %v6383_v11, %v1521_v22  ;;  %vm6518_vm5 = vcmp.lt.f32.partialorder %v1523_v39, 0.0004427343  ;;  %v1562_v41 = vadd.f32 1.0, %v6487_v25  ;;  %4716 = vlog2.f32 %v2788_v53 }
 0x15e   :  { %v6523_v20 = vpop.eup %4708  ;;  %v2779_v42 = vadd.f32 1.0, %v6503_v17  ;;  %v657_v36 = vsel %vm293_vm0, %v286_v8, 0.0  ;;  %v271_v2 = vmul.f32 %v6071_v18, %v135_v52  ;;  %vm6528_vm9 = vcmp.lt.f32.partialorder %v2767_v14, 0.0004427343 }
 0x15f   :  { %v4711_v35 = vpop.eup %4710  ;;  %v6535_v22 = vsel %vm830_vm10, %v6233_v50, %v1534_v59  ;;  %v1525_v39 = vsel %vm6518_vm5, %v1522_v1, %v1519_v5  ;;  %v1547_v53 = vmul.f32 -0.5, %v6436_v12  ;;  %v1539_v21 = vadd.f32 1.0, %v1538_v56  ;;  %658 = vadd.xlane.f32.xlu1 %v657_v36 }
 0x160   :  { %vm831_vm4 = vcmp.gt.f32.partialorder %v6295_v30, 20.0  ;;  %v1541_v49 = vand.u32 2147483647, %v6421_v43  ;;  %4718 = vpow2.f32 %v1121_v29  ;;  %v6543_v14 = vadd.f32 %v5588_v26, %v380_v3 }
 0x161   :  { %v612_v52 = vsel %vm293_vm0, %v271_v2, 0.0  ;;  %v4713_v8 = vpop.eup %4712  ;;  %4720 = vlog2.f32 %v1562_v41  ;;  %v1553_v50 = vadd.f32 1.0, %v6523_v20  ;;  %v242_v5 = vmul.f32 %v6071_v18, %v106_v61 }
 0x162   :  { %613 = vadd.xlane.f32.xlu0 %v612_v52  ;;  %v227_v56 = vmul.f32 %v6071_v18, %v91_v13  ;;  %v4715_v59 = vpop.eup %4714  ;;  %v2791_v1 = vmul.f32 -0.5, %v6474_v46  ;;  %4722 = vlog2.f32 %v2779_v42  ;;  %v2782_v29 = vmul.f32 -0.5, %v6503_v17 }
 0x163   :  { %v1537_v10 = vmul.f32 0.6931472, %v4711_v35  ;;  %v2806_v3 = vadd.f32 1.0, %v6535_v22  ;;  %vm832_vm10 = vcmp.gt.f32.partialorder %v6314_v63, 20.0  ;;  %v1548_v36 = vadd.f32 1.0, %v1547_v53 }
 0x164   :  { %v1550_v41 = vand.u32 2147483647, %v6436_v12  ;;  %v525_v2 = vsel %vm293_vm0, %v242_v5, 0.0  ;;  %v2763_v52 = vmul.f32 0.6931472, %v4713_v8  ;;  %v6558_v61 = vsel %vm829_vm12, %v6257_v9, %v1525_v39 }
 0x165   :  { %v1540_v42 = vmul.f32 %v6421_v43, %v1539_v21  ;;  %526 = vadd.xlane.f32.xlu1 %v525_v2  ;;  %v480_v13 = vsel %vm293_vm0, %v227_v56, 0.0  ;;  %v1546_v35 = vmul.f32 0.6931472, %v4715_v59  ;;  %vm6562_vm5 = vcmp.lt.f32.partialorder %v1541_v49, 0.0004427343  ;;  %v386_v59 = vpop.xlane.xlu0 %385 }
 0x166   :  { %4724 = vlog2.f32 %v1553_v50  ;;  %v963_v53 = vmin.f32 %v6543_v14, 20.0  ;;  %481 = vadd.xlane.f32.xlu0 %v480_v13  ;;  %v2792_v8 = vadd.f32 1.0, %v2791_v1  ;;  %v2794_v5 = vand.u32 2147483647, %v6474_v46 }
 0x167   :  { %v2809_v9 = vmul.f32 -0.5, %v6535_v22  ;;  %v1543_v43 = vsel %vm6562_vm5, %v1540_v42, %v1537_v10  ;;  %v2783_v39 = vadd.f32 1.0, %v2782_v29  ;;  %v2785_v21 = vand.u32 2147483647, %v6503_v17  ;;  %v4717_v50 = vpop.eup %4716 }
 0x168   :  { %v2797_v49 = vadd.f32 1.0, %v6558_v61  ;;  %v1549_v56 = vmul.f32 %v6436_v12, %v1548_v36  ;;  %v2769_v1 = vsel %vm6528_vm9, %v6515_v55, %v2763_v52  ;;  %4726 = vlog2.f32 %v2806_v3 }
 0x169   :  { %vm6577_vm12 = vcmp.lt.f32.partialorder %v1550_v41, 0.0004427343  ;;  %v1565_v7 = vmul.f32 -0.5, %v6487_v25  ;;  %v10640_v29 = vsel %vm6459_vm3, %v6484_v32, %v6469_v4  ;;  %v6593_v55 = vsel %vm831_vm4, %v6295_v30, %v1543_v43  ;;  %v389_v41 = vpop.xlane.xlu1 %388 }
 0x16a   :  { %v4007_v12 = vrot.slane %v10640_v29, %v5664_v28  ;;  %v1552_v10 = vsel %vm6577_vm12, %v1549_v56, %v1546_v35  ;;  %v1119_v11 = vmul.f32 1.442695, %v963_v53  ;;  %v6595_v3 = vpop.eup %4718  ;;  %v6598_v36 = vmul.f32 %v2792_v8, %v6474_v46  ;;  %v392_v28 = vpop.xlane.xlu0 %391 }
 0x16b   :  { %vm6600_vm9 = vcmp.lt.f32.partialorder %v2794_v5, 0.0004427343  ;;  %v2810_v4 = vadd.f32 1.0, %v2809_v9  ;;  %v2812_v32 = vand.u32 2147483647, %v6535_v22  ;;  %v6606_v52 = vadd.f32 %v5588_v26, %v386_v59  ;;  %v4721_v42 = vpop.eup %4720 }
 0x16c   :  { %v4002_v30 = vrot.slane %v2769_v1, %v5651_v19  ;;  %v6610_v13 = vmul.f32 %v2783_v39, %v6503_v17  ;;  %vm6612_vm4 = vcmp.lt.f32.partialorder %v2785_v21, 0.0004427343  ;;  %4728 = vlog2.f32 %v2797_v49  ;;  %v4723_v53 = vpop.eup %4722 }
 0x16d   :  { %v2800_v35 = vmul.f32 -0.5, %v6558_v61  ;;  %v6620_v8 = vsel %vm832_vm10, %v6314_v63, %v1552_v10  ;;  %v2815_v5 = vadd.f32 1.0, %v6593_v55  ;;  %vm834_vm3 = vcmp.gt.f32.partialorder %v6373_v37, 20.0 }
 0x16e   :  { %v1566_v9 = vadd.f32 1.0, %v1565_v7  ;;  %v1556_v17 = vmul.f32 -0.5, %v6523_v20  ;;  %v1568_v43 = vand.u32 2147483647, %v6487_v25  ;;  %v1580_v39 = vadd.f32 1.0, %v6595_v3 }
 0x16f   :  { %4730 = vpow2.f32 %v1119_v11  ;;  %v6628_v21 = vadd.f32 %v5588_v26, %v389_v41  ;;  %v6631_v49 = vmul.f32 %v2810_v4, %v6535_v22  ;;  %v2803_v63 = vand.u32 2147483647, %v6558_v61 }
 0x170   :  { %v1564_v56 = vmul.f32 0.6931472, %v4721_v42  ;;  %v965_v59 = vmin.f32 %v6606_v52, 20.0  ;;  %v4725_v1 = vpop.eup %4724  ;;  %v4003_v2 = vsel %vm10521_vm8, %v4002_v30, %v6491_v27  ;;  %v2790_v7 = vmul.f32 0.6931472, %v4717_v50  ;;  %v395_v42 = vpop.xlane.xlu1 %394 }
 0x171   :  { %v2801_v29 = vadd.f32 1.0, %v2800_v35  ;;  %v2824_v10 = vadd.f32 1.0, %v6620_v8  ;;  %v2781_v11 = vmul.f32 0.6931472, %v4723_v53  ;;  %vm6638_vm10 = vcmp.lt.f32.partialorder %v2812_v32, 0.0004427343 }
 0x172   :  { %4732 = vlog2.f32 %v2815_v5  ;;  %v1567_v22 = vmul.f32 %v6487_v25, %v1566_v9  ;;  %vm833_vm5 = vcmp.gt.f32.partialorder %v6394_v62, 20.0  ;;  %v1557_v4 = vadd.f32 1.0, %v1556_v17  ;;  %v136_v32 = vld [vmem:[#allocation3 + $0x358] sm:$0xff]  ;;  %v4727_v30 = vpop.eup %4726 }
 0x173   :  { %vm6644_vm12 = vcmp.lt.f32.partialorder %v1568_v43, 0.0004427343  ;;  %v1559_v27 = vand.u32 2147483647, %v6523_v20  ;;  %4734 = vlog2.f32 %v1580_v39  ;;  %v966_v50 = vmin.f32 %v6628_v21, 20.0  ;;  %v121_v39 = vld [vmem:[#allocation3 + $0x2e0] sm:$0xff] }
 0x174   :  { %v4008_v35 = vsel %vm3904_vm11, %v4007_v12, %v4003_v2  ;;  %v1570_v25 = vsel %vm6644_vm12, %v1567_v22, %v1564_v56  ;;  %v1555_v53 = vmul.f32 0.6931472, %v4725_v1  ;;  %v1123_v5 = vmul.f32 1.442695, %v965_v59 }
 0x175   :  { %v2796_v9 = vsel %vm6600_vm9, %v6598_v36, %v2790_v7  ;;  %vm6656_vm8 = vcmp.lt.f32.partialorder %v2803_v63, 0.0004427343  ;;  %4736 = vlog2.f32 %v2824_v10  ;;  %v6661_v43 = vadd.f32 %v5588_v26, %v395_v42 }
 0x176   :  { %v2787_v19 = vsel %vm6612_vm4, %v6610_v13, %v2781_v11  ;;  %v2802_v12 = vmul.f32 %v2801_v29, %v6558_v61  ;;  %v1558_v56 = vmul.f32 %v6523_v20, %v1557_v4  ;;  %v272_v0 = vmul.f32 %v6071_v18, %v136_v32  ;;  %v4729_v36 = vpop.eup %4728  ;;  %v398_v18 = vpop.xlane.xlu0 %397  ;;  %v6688_v13 = vld [vmem:[%s10505_s1] ss:$0 sm:$0xff] }
 0x177   :  { %v6669_v63 = vmul.f32 0.6931472, %v4727_v30  ;;  %v6674_v59 = vsel %vm834_vm3, %v6373_v37, %v1570_v25  ;;  %vm6676_vm9 = vcmp.lt.f32.partialorder %v1559_v27, 0.0004427343  ;;  %v1125_v46 = vmul.f32 1.442695, %v966_v50 }
 0x178   :  { %v1561_v61 = vsel %vm6676_vm9, %v1558_v56, %v1555_v53  ;;  %4738 = vpow2.f32 %v1123_v5  ;;  %v6683_v20 = vadd.f32 %v5588_v26, %v392_v28  ;;  %v257_v37 = vmul.f32 %v6688_v13, %v121_v39 }
 0x179   :  { %v6691_v2 = vpop.eup %4730  ;;  %v4017_v7 = vrot.slane %v2796_v9, %v5675_v33  ;;  %v4012_v29 = vrot.slane %v2787_v19, %v5685_v40  ;;  %v2818_v10 = vmul.f32 -0.5, %v6593_v55  ;;  %v968_v11 = vmin.f32 %v6661_v43, 20.0  ;;  %v401_v9 = vpop.xlane.xlu1 %400 }
 0x17a   :  { %v2799_v28 = vmul.f32 0.6931472, %v4729_v36  ;;  %v2842_v22 = vadd.f32 1.0, %v6674_v59  ;;  %v1583_v4 = vmul.f32 -0.5, %v6595_v3  ;;  %v615_v42 = vsel %vm293_vm0, %v272_v0, 0.0 }
 0x17b   :  { %v2814_v27 = vsel %vm6638_vm10, %v6631_v49, %v6669_v63  ;;  %v2827_v50 = vmul.f32 -0.5, %v6620_v8  ;;  %v6708_v32 = vsel %vm833_vm5, %v6394_v62, %v1561_v61  ;;  %v6711_v30 = vadd.f32 %v5588_v26, %v398_v18  ;;  %616 = vadd.xlane.f32.xlu1 %v615_v42 }
 0x17c   :  { %v4733_v25 = vpop.eup %4732  ;;  %v1571_v53 = vadd.f32 1.0, %v6691_v2  ;;  %4740 = vpow2.f32 %v1125_v46  ;;  %v967_v5 = vmin.f32 %v6683_v20, 20.0  ;;  %v570_v49 = vsel %vm293_vm0, %v257_v37, 0.0 }
 0x17d   :  { %v4735_v41 = vpop.eup %4734  ;;  %vm3974_vm4 = vcmask 917312   ;;  %v4013_v39 = vsel %vm3911_vm13, %v4012_v29, %v4008_v35  ;;  %v2819_v19 = vadd.f32 1.0, %v2818_v10  ;;  %v2821_v62 = vand.u32 2147483647, %v6593_v55  ;;  %571 = vadd.xlane.f32.xlu0 %v570_v49 }
 0x17e   :  { %v1129_v56 = vmul.f32 1.442695, %v968_v11  ;;  %vm10535_vm3 = vcmask 982912   ;;  %v2805_v0 = vsel %vm6656_vm8, %v2802_v12, %v2799_v28  ;;  %4742 = vlog2.f32 %v2842_v22 }
 0x17f   :  { %v2833_v36 = vadd.f32 1.0, %v6708_v32  ;;  %v1584_v63 = vadd.f32 1.0, %v1583_v4  ;;  %v4737_v1 = vpop.eup %4736  ;;  %v2817_v46 = vmul.f32 0.6931472, %v4733_v25  ;;  %v1586_v61 = vand.u32 2147483647, %v6595_v3 }
 0x180   :  { %v6723_v18 = vadd.f32 %v5588_v26, %v401_v9  ;;  %v969_v35 = vmin.f32 %v6711_v30, 20.0  ;;  %v2828_v37 = vadd.f32 1.0, %v2827_v50  ;;  %v1582_v29 = vmul.f32 0.6931472, %v4735_v41 }
 0x181   :  { %4744 = vlog2.f32 %v1571_v53  ;;  %v1127_v10 = vmul.f32 1.442695, %v967_v5  ;;  %v2830_v17 = vand.u32 2147483647, %v6620_v8  ;;  %v2820_v12 = vmul.f32 %v2819_v19, %v6593_v55 }
 0x182   :  { %vm6728_vm8 = vcmp.lt.f32.partialorder %v2821_v62, 0.0004427343  ;;  %4746 = vpow2.f32 %v1129_v56  ;;  %v6732_v28 = vpop.eup %4738  ;;  %v4022_v22 = vrot.slane %v2805_v0, %v5694_v47  ;;  %v2826_v4 = vmul.f32 0.6931472, %v4737_v1 }
 0x183   :  { %4748 = vlog2.f32 %v2833_v36  ;;  %v1585_v42 = vmul.f32 %v6595_v3, %v1584_v63  ;;  %v2823_v50 = vsel %vm6728_vm8, %v2820_v12, %v2817_v46  ;;  %vm6738_vm10 = vcmp.lt.f32.partialorder %v1586_v61, 0.0004427343 }
 0x184   :  { %v970_v55 = vmin.f32 %v6723_v18, 20.0  ;;  %v1131_v53 = vmul.f32 1.442695, %v969_v35  ;;  %v2829_v5 = vmul.f32 %v2828_v37, %v6620_v8  ;;  %vm836_vm5 = vcmp.gt.f32.partialorder %v6457_v38, 20.0 }
 0x185   :  { %v1588_v9 = vsel %vm6738_vm10, %v1585_v42, %v1582_v29  ;;  %4750 = vpow2.f32 %v1127_v10  ;;  %v4018_v3 = vsel %vm3918_vm15, %v4017_v7, %v4013_v39  ;;  %vm6748_vm12 = vcmp.lt.f32.partialorder %v2830_v17, 0.0004427343 }
 0x186   :  { %v2845_v41 = vmul.f32 -0.5, %v6674_v59  ;;  %v1589_v19 = vadd.f32 1.0, %v6732_v28  ;;  %v6754_v62 = vpop.eup %4740  ;;  %v4027_v8 = vrot.slane %v2814_v27, %v5691_v45  ;;  %v4023_v56 = vsel %vm3925_vm6, %v4022_v22, %v4018_v3 }
 0x187   :  { %v2832_v0 = vsel %vm6748_vm12, %v2829_v5, %v2826_v4  ;;  %v4032_v36 = vrot.slane %v2823_v50, %v5705_v57  ;;  %v6762_v7 = vsel %vm836_vm5, %v6457_v38, %v1588_v9  ;;  %v1574_v39 = vmul.f32 -0.5, %v6691_v2  ;;  %v404_v4 = vpop.xlane.xlu0 %403 }
 0x188   :  { %v1133_v63 = vmul.f32 1.442695, %v970_v55  ;;  %4752 = vpow2.f32 %v1131_v53  ;;  %v4743_v1 = vpop.eup %4742  ;;  %v10659_v27 = vsel %vm6319_vm2, %v6303_v34, %v6353_v51  ;;  %v3975_v61 = vsel %vm3974_vm4, %v6332_v58, %v6389_v6  ;;  %v407_v6 = vpop.xlane.xlu1 %406 }
 0x189   :  { %v6771_v46 = vrot.slane %v10659_v27, %v6005_v54  ;;  %v2848_v38 = vand.u32 2147483647, %v6674_v59  ;;  %v2836_v35 = vmul.f32 -0.5, %v6708_v32  ;;  %v6780_v37 = vsel %vm10535_vm3, %v6407_v44, %v3975_v61  ;;  %v151_v61 = vld [vmem:[#allocation3 + $0x3d0] sm:$0xff] }
 0x18a   :  { %10661 = vst [vmem:[#allocation16_spill] sm:$0xff] %v6780_v37  ;;  %v2846_v29 = vadd.f32 1.0, %v2845_v41  ;;  %v1598_v31 = vadd.f32 1.0, %v6754_v62  ;;  %4754 = vlog2.f32 %v1589_v19  ;;  %v4037_v34 = vrot.slane %v2832_v0, %v5697_v48 }
 0x18b   :  { %10660 = vst [vmem:[#allocation15_spill] sm:$0xff] %v6771_v46  ;;  %v4745_v10 = vpop.eup %4744  ;;  %v4028_v51 = vsel %vm3932_vm14, %v4027_v8, %v4023_v56  ;;  %v2860_v17 = vadd.f32 1.0, %v6762_v7  ;;  %v1577_v58 = vand.u32 2147483647, %v6691_v2  ;;  %v2844_v44 = vmul.f32 0.6931472, %v4743_v1  ;;  %v410_v50 = vpop.xlane.xlu0 %409 }
 0x18c   :  { %v6787_v12 = vpop.eup %4746  ;;  %v4033_v11 = vsel %vm10523_vm1, %v4032_v36, %v4028_v51  ;;  %v1575_v22 = vadd.f32 1.0, %v1574_v39  ;;  %4756 = vpow2.f32 %v1133_v63  ;;  %vm6790_vm2 = vcmp.lt.f32.partialorder %v2848_v38, 0.0004427343  ;;  %v92_v36 = vld [vmem:[#allocation3 + $0x1f8] sm:$0xff] }
 0x18d   :  { %v4749_v42 = vpop.eup %4748  ;;  %v2837_v25 = vadd.f32 1.0, %v2836_v35  ;;  %v2839_v55 = vand.u32 2147483647, %v6708_v32  ;;  %vm835_vm9 = vcmp.gt.f32.partialorder %v6543_v14, 20.0  ;;  %v2847_v53 = vmul.f32 %v2846_v29, %v6674_v59 }
 0x18e   :  { %v1573_v5 = vmul.f32 0.6931472, %v4745_v10  ;;  %4758 = vlog2.f32 %v1598_v31  ;;  %v6798_v9 = vadd.f32 %v5588_v26, %v407_v6  ;;  %vm10664_vm8 = vcmask 654912  }
 0x18f   :  { %v6800_v3 = vpop.eup %4750  ;;  %v4038_v49 = vsel %vm10664_vm8, %v4037_v34, %v4033_v11  ;;  %4760 = vlog2.f32 %v2860_v17  ;;  %v1616_v41 = vadd.f32 1.0, %v6787_v12  ;;  %v6805_v19 = vadd.f32 %v5588_v26, %v404_v4  ;;  %v413_v11 = vpop.xlane.xlu1 %412 }
 0x190   :  { %v2850_v8 = vsel %vm6790_vm2, %v2847_v53, %v2844_v44  ;;  %v2835_v56 = vmul.f32 0.6931472, %v4749_v42  ;;  %v1576_v59 = vmul.f32 %v6691_v2, %v1575_v22  ;;  %vm6810_vm10 = vcmp.lt.f32.partialorder %v1577_v58, 0.0004427343 }
 0x191   :  { %v2838_v39 = vmul.f32 %v2837_v25, %v6708_v32  ;;  %vm6815_vm5 = vcmp.lt.f32.partialorder %v2839_v55, 0.0004427343  ;;  %v1601_v1 = vmul.f32 -0.5, %v6754_v62  ;;  %v1592_v27 = vmul.f32 -0.5, %v6732_v28 }
 0x192   :  { %v6821_v38 = vpop.eup %4752  ;;  %v1579_v2 = vsel %vm6810_vm10, %v1576_v59, %v1573_v5  ;;  %v1604_v35 = vand.u32 2147483647, %v6754_v62  ;;  %v1607_v29 = vadd.f32 1.0, %v6800_v3  ;;  %v972_v32 = vmin.f32 %v6798_v9, 20.0 }
 0x193   :  { %v4047_v31 = vrot.slane %v2850_v8, %v5708_v60  ;;  %4762 = vlog2.f32 %v1616_v41  ;;  %v971_v10 = vmin.f32 %v6805_v19, 20.0  ;;  %v228_v34 = vmul.f32 %v6688_v13, %v92_v36 }
 0x194   :  { %v4755_v51 = vpop.eup %4754  ;;  %v2841_v17 = vsel %vm6815_vm5, %v2838_v39, %v2835_v56  ;;  %v2863_v58 = vmul.f32 -0.5, %v6762_v7  ;;  %v2866_v6 = vand.u32 2147483647, %v6762_v7  ;;  %v287_v44 = vmul.f32 %v6688_v13, %v151_v61 }
 0x195   :  { %v6839_v22 = vsel %vm835_vm9, %v6543_v14, %v1579_v2  ;;  %vm837_vm12 = vcmp.gt.f32.partialorder %v6606_v52, 20.0  ;;  %v1593_v4 = vadd.f32 1.0, %v1592_v27  ;;  %v1625_v42 = vadd.f32 1.0, %v6821_v38 }
 0x196   :  { %v483_v25 = vsel %vm293_vm0, %v228_v34, 0.0  ;;  %v6844_v55 = vpop.eup %4756  ;;  %v1595_v53 = vand.u32 2147483647, %v6732_v28  ;;  %4764 = vlog2.f32 %v1607_v29  ;;  %v1137_v5 = vmul.f32 1.442695, %v972_v32 }
 0x197   :  { %484 = vadd.xlane.f32.xlu1 %v483_v25  ;;  %v660_v41 = vsel %vm293_vm0, %v287_v44, 0.0  ;;  %v4042_v14 = vrot.slane %v2841_v17, %v5717_v15  ;;  %v1591_v8 = vmul.f32 0.6931472, %v4755_v51  ;;  %v1135_v56 = vmul.f32 1.442695, %v971_v10 }
 0x198   :  { %v6850_v59 = vadd.f32 %v5588_v26, %v413_v11  ;;  %661 = vadd.xlane.f32.xlu0 %v660_v41  ;;  %v4759_v0 = vpop.eup %4758  ;;  %v2851_v36 = vadd.f32 1.0, %v6839_v22  ;;  %v1602_v39 = vadd.f32 1.0, %v1601_v1  ;;  %vm6853_vm2 = vcmp.lt.f32.partialorder %v1604_v35, 0.0004427343 }
 0x199   :  { %v6858_v27 = vadd.f32 %v5588_v26, %v410_v50  ;;  %v4761_v61 = vpop.eup %4760  ;;  %v1594_v2 = vmul.f32 %v6732_v28, %v1593_v4  ;;  %v1619_v29 = vmul.f32 -0.5, %v6787_v12  ;;  %v1634_v32 = vadd.f32 1.0, %v6844_v55 }
 0x19a   :  { %4766 = vlog2.f32 %v1625_v42  ;;  %v2864_v10 = vadd.f32 1.0, %v2863_v58  ;;  %v2854_v34 = vmul.f32 -0.5, %v6839_v22  ;;  %vm6864_vm9 = vcmp.lt.f32.partialorder %v1595_v53, 0.0004427343 }
 0x19b   :  { %4768 = vpow2.f32 %v1137_v5  ;;  %vm10673_vm8 = vcmask 720512   ;;  %v1597_v51 = vsel %vm6864_vm9, %v1594_v2, %v1591_v8  ;;  %v974_v28 = vmin.f32 %v6850_v59, 20.0 }
 0x19c   :  { %v4043_v35 = vsel %vm10673_vm8, %v4042_v14, %v4038_v49  ;;  %4770 = vpow2.f32 %v1135_v56  ;;  %v2862_v17 = vmul.f32 0.6931472, %v4761_v61  ;;  %vm838_vm10 = vcmp.gt.f32.partialorder %v6628_v21, 20.0 }
 0x19d   :  { %4772 = vlog2.f32 %v2851_v36  ;;  %v1600_v58 = vmul.f32 0.6931472, %v4759_v0  ;;  %v973_v11 = vmin.f32 %v6858_v27, 20.0  ;;  %v4763_v44 = vpop.eup %4762  ;;  %vm6874_vm5 = vcmp.lt.f32.partialorder %v2866_v6, 0.0004427343  ;;  %v122_v6 = vld [vmem:[#allocation3 + $0x2e8] sm:$0xff] }
 0x19e   :  { %v1620_v42 = vadd.f32 1.0, %v1619_v29  ;;  %v1610_v49 = vmul.f32 -0.5, %v6800_v3  ;;  %4774 = vlog2.f32 %v1634_v32  ;;  %v2865_v50 = vmul.f32 %v2864_v10, %v6762_v7  ;;  %v107_v7 = vld [vmem:[#allocation3 + $0x270] sm:$0xff] }
 0x19f   :  { %v2857_v25 = vand.u32 2147483647, %v6839_v22  ;;  %v1603_v53 = vmul.f32 %v6754_v62, %v1602_v39  ;;  %v6885_v5 = vsel %vm837_vm12, %v6606_v52, %v1597_v51  ;;  %vm840_vm9 = vcmp.gt.f32.partialorder %v6661_v43, 20.0 }
 0x1a0   :  { %v6889_v41 = vsel %vm10522_vm7, %v4047_v31, %v4043_v35  ;;  %v2855_v14 = vadd.f32 1.0, %v2854_v34  ;;  %v1622_v8 = vand.u32 2147483647, %v6787_v12  ;;  %v1141_v56 = vmul.f32 1.442695, %v974_v28  ;;  %v4765_v0 = vpop.eup %4764 }
 0x1a1   :  { %v2868_v62 = vsel %vm6874_vm5, %v2865_v50, %v2862_v17  ;;  %v1606_v36 = vsel %vm6853_vm2, %v1603_v53, %v1600_v58  ;;  %v1618_v52 = vmul.f32 0.6931472, %v4763_v44  ;;  %v1139_v39 = vmul.f32 1.442695, %v973_v11  ;;  %v152_v50 = vld [vmem:[#allocation3 + $0x3d8] sm:$0xff]  ;;  %v137_v53 = vld [vmem:[#allocation3 + $0x360] sm:$0xff] }
 0x1a2   :  { %v2869_v61 = vadd.f32 1.0, %v6885_v5  ;;  %v1621_v2 = vmul.f32 %v6787_v12, %v1620_v42  ;;  %v1611_v31 = vadd.f32 1.0, %v1610_v49  ;;  %v258_v29 = vmul.f32 %v6688_v13, %v122_v6 }
 0x1a3   :  { %vm839_vm12 = vcmp.gt.f32.partialorder %v6683_v20, 20.0  ;;  %v1613_v32 = vand.u32 2147483647, %v6800_v3  ;;  %v1637_v10 = vmul.f32 -0.5, %v6844_v55  ;;  %v1628_v34 = vmul.f32 -0.5, %v6821_v38 }
 0x1a4   :  { %v243_v63 = vmul.f32 %v6688_v13, %v107_v7  ;;  %v4767_v1 = vpop.eup %4766  ;;  %v6905_v35 = vmul.f32 %v2855_v14, %v6839_v22  ;;  %vm6907_vm2 = vcmp.lt.f32.partialorder %v1622_v8, 0.0004427343  ;;  %v1609_v12 = vmul.f32 0.6931472, %v4765_v0 }
 0x1a5   :  { %4776 = vpow2.f32 %v1141_v56  ;;  %v6911_v28 = vpop.eup %4768  ;;  %v1624_v17 = vsel %vm6907_vm2, %v1621_v2, %v1618_v52  ;;  %v573_v58 = vsel %vm293_vm0, %v258_v29, 0.0  ;;  %v6920_v22 = vrot.slane %v2868_v62, %v5722_v24 }
 0x1a6   :  { %4778 = vpow2.f32 %v1139_v39  ;;  %v528_v11 = vsel %vm293_vm0, %v243_v63, 0.0  ;;  %v6917_v44 = vpop.eup %4770  ;;  %vm6922_vm8 = vcmp.lt.f32.partialorder %v2857_v25, 0.0004427343  ;;  %v6929_v42 = vsel %vm838_vm10, %v6628_v21, %v1606_v36  ;;  %574 = vadd.xlane.f32.xlu1 %v573_v58  ;;  %v419_v63 = vpop.xlane.xlu1 %418 }
 0x1a7   :  { %v1612_v49 = vmul.f32 %v6800_v3, %v1611_v31  ;;  %529 = vadd.xlane.f32.xlu0 %v528_v11  ;;  %v4773_v6 = vpop.eup %4772  ;;  %4780 = vlog2.f32 %v2869_v61  ;;  %vm6932_vm5 = vcmp.lt.f32.partialorder %v1613_v32, 0.0004427343  ;;  %v1638_v25 = vadd.f32 1.0, %v1637_v10 }
 0x1a8   :  { %vm841_vm2 = vcmp.gt.f32.partialorder %v6711_v30, 20.0  ;;  %v1629_v8 = vadd.f32 1.0, %v1628_v34  ;;  %v4775_v56 = vpop.eup %4774  ;;  %v6940_v21 = vsel %vm840_vm9, %v6661_v43, %v1624_v17  ;;  %v1631_v7 = vand.u32 2147483647, %v6821_v38  ;;  %v416_v17 = vpop.xlane.xlu0 %415 }
 0x1a9   :  { %v1615_v3 = vsel %vm6932_vm5, %v1612_v49, %v1609_v12  ;;  %v1652_v0 = vadd.f32 1.0, %v6911_v28  ;;  %vm842_vm10 = vcmp.gt.f32.partialorder %v6723_v18, 20.0  ;;  %v1627_v62 = vmul.f32 0.6931472, %v4767_v1 }
 0x1aa   :  { %v1643_v36 = vadd.f32 1.0, %v6917_v44  ;;  %v288_v52 = vmul.f32 %v6688_v13, %v152_v50  ;;  %v273_v39 = vmul.f32 %v6688_v13, %v137_v53  ;;  %v2853_v61 = vmul.f32 0.6931472, %v4773_v6 }
 0x1ab   :  { %v2878_v43 = vadd.f32 1.0, %v6929_v42  ;;  %v2881_v2 = vmul.f32 -0.5, %v6929_v42  ;;  %v1640_v31 = vand.u32 2147483647, %v6844_v55  ;;  %v2872_v29 = vmul.f32 -0.5, %v6885_v5 }
 0x1ac   :  { %v1636_v32 = vmul.f32 0.6931472, %v4775_v56  ;;  %v1639_v10 = vmul.f32 %v6844_v55, %v1638_v25  ;;  %v1630_v34 = vmul.f32 %v6821_v38, %v1629_v8  ;;  %v2896_v1 = vadd.f32 1.0, %v6940_v21 }
 0x1ad   :  { %v6960_v51 = vsel %vm839_vm12, %v6683_v20, %v1615_v3  ;;  %vm6962_vm9 = vcmp.lt.f32.partialorder %v1631_v7, 0.0004427343  ;;  %4782 = vlog2.f32 %v1652_v0  ;;  %v663_v38 = vsel %vm293_vm0, %v288_v52, 0.0 }
 0x1ae   :  { %v1633_v58 = vsel %vm6962_vm9, %v1630_v34, %v1627_v62  ;;  %4784 = vlog2.f32 %v1643_v36  ;;  %v618_v55 = vsel %vm293_vm0, %v273_v39, 0.0  ;;  %v2859_v20 = vsel %vm6922_vm8, %v6905_v35, %v2853_v61  ;;  %664 = vadd.xlane.f32.xlu1 %v663_v38  ;;  %v123_v34 = vld [vmem:[#allocation3 + $0x2f0] sm:$0xff] }
 0x1af   :  { %v6970_v11 = vpop.eup %4776  ;;  %v2899_v49 = vmul.f32 -0.5, %v6940_v21  ;;  %vm6976_vm12 = vcmp.lt.f32.partialorder %v1640_v31, 0.0004427343  ;;  %v6981_v53 = vadd.f32 %v5588_v26, %v419_v63  ;;  %619 = vadd.xlane.f32.xlu0 %v618_v55  ;;  %v2887_v25 = vadd.f32 1.0, %v6960_v51 }
 0x1b0   :  { %v6983_v6 = vpop.eup %4778  ;;  %v1642_v35 = vsel %vm6976_vm12, %v1639_v10, %v1636_v32  ;;  %v6990_v4 = vadd.f32 %v5588_v26, %v416_v17  ;;  %4786 = vlog2.f32 %v2878_v43  ;;  %v2873_v8 = vadd.f32 1.0, %v2872_v29 }
 0x1b1   :  { %v2890_v56 = vmul.f32 -0.5, %v6960_v51  ;;  %v6996_v3 = vsel %vm841_vm2, %v6711_v30, %v1633_v58  ;;  %v4781_v7 = vpop.eup %4780  ;;  %v4052_v0 = vrot.slane %v2859_v20, %v10617_v16  ;;  %v6999_v62 = vadd.f32 1.0, %v2881_v2 }
 0x1b2   :  { %4788 = vlog2.f32 %v2896_v1  ;;  %v1670_v36 = vadd.f32 1.0, %v6970_v11  ;;  %v2900_v52 = vadd.f32 1.0, %v2899_v49  ;;  %v7005_v39 = vsel %vm842_vm10, %v6723_v18, %v1642_v35 }
 0x1b3   :  { %v1661_v61 = vadd.f32 1.0, %v6983_v6  ;;  %v976_v43 = vmin.f32 %v6981_v53, 20.0  ;;  %4790 = vlog2.f32 %v2887_v25  ;;  %v2905_v30 = vadd.f32 1.0, %v6996_v3 }
 0x1b4   :  { %v1655_v31 = vmul.f32 -0.5, %v6911_v28  ;;  %v975_v2 = vmin.f32 %v6990_v4, 20.0  ;;  %v7013_v29 = vmul.f32 %v2873_v8, %v6885_v5  ;;  %v2891_v10 = vadd.f32 1.0, %v2890_v56 }
 0x1b5   :  { %v1646_v18 = vmul.f32 -0.5, %v6917_v44  ;;  %vm10686_vm8 = vcmask 851712   ;;  %v2902_v1 = vand.u32 2147483647, %v6940_v21  ;;  %v2914_v12 = vadd.f32 1.0, %v7005_v39 }
 0x1b6   :  { %v7019_v63 = vsel %vm10686_vm8, %v4052_v0, %v6889_v41  ;;  %4792 = vlog2.f32 %v1670_v36  ;;  %v7023_v58 = vmul.f32 0.6931472, %v4781_v7  ;;  %v7026_v38 = vmul.f32 %v2900_v52, %v6940_v21  ;;  %v425_v52 = vpop.xlane.xlu1 %424 }
 0x1b7   :  { %v4783_v17 = vpop.eup %4782  ;;  %4794 = vlog2.f32 %v1661_v61  ;;  %v1145_v55 = vmul.f32 1.442695, %v976_v43  ;;  %vm844_vm5 = vcmp.gt.f32.partialorder %v6798_v9, 20.0  ;;  %v1656_v49 = vadd.f32 1.0, %v1655_v31  ;;  %v108_v61 = vld [vmem:[#allocation3 + $0x278] sm:$0xff] }
 0x1b8   :  { %v4785_v20 = vpop.eup %4784  ;;  %4796 = vlog2.f32 %v2905_v30  ;;  %v1143_v41 = vmul.f32 1.442695, %v975_v2  ;;  %v259_v50 = vmul.f32 %v6688_v13, %v123_v34  ;;  %v7031_v25 = vmul.f32 %v2891_v10, %v6960_v51  ;;  %v422_v34 = vpop.xlane.xlu0 %421 }
 0x1b9   :  { %v2893_v35 = vand.u32 2147483647, %v6960_v51  ;;  %v1658_v8 = vand.u32 2147483647, %v6911_v28  ;;  %vm843_vm2 = vcmp.gt.f32.partialorder %v6805_v19, 20.0  ;;  %v1647_v21 = vadd.f32 1.0, %v1646_v18 }
 0x1ba   :  { %vm7036_vm10 = vcmp.lt.f32.partialorder %v2902_v1, 0.0004427343  ;;  %4798 = vlog2.f32 %v2914_v12  ;;  %v2917_v7 = vmul.f32 -0.5, %v7005_v39  ;;  %v1654_v0 = vmul.f32 0.6931472, %v4783_v17  ;;  %v7042_v43 = vpop.eup %4786  ;;  %v431_v32 = vpop.xlane.xlu1 %430 }
 0x1bb   :  { %v1649_v36 = vand.u32 2147483647, %v6917_v44  ;;  %v2920_v51 = vand.u32 2147483647, %v7005_v39  ;;  %v2908_v30 = vmul.f32 -0.5, %v6996_v3  ;;  %4800 = vpow2.f32 %v1145_v55 }
 0x1bc   :  { %v1645_v31 = vmul.f32 0.6931472, %v4785_v20  ;;  %v4789_v2 = vpop.eup %4788  ;;  %v2911_v10 = vand.u32 2147483647, %v6996_v3  ;;  %v1657_v18 = vmul.f32 %v6911_v28, %v1656_v49  ;;  %4802 = vpow2.f32 %v1143_v41 }
 0x1bd   :  { %v576_v1 = vsel %vm293_vm0, %v259_v50, 0.0  ;;  %vm7049_vm9 = vcmp.lt.f32.partialorder %v2893_v35, 0.0004427343  ;;  %vm7053_vm12 = vcmp.lt.f32.partialorder %v1658_v8, 0.0004427343  ;;  %v1648_v20 = vmul.f32 %v6917_v44, %v1647_v21  ;;  %v4791_v28 = vpop.eup %4790 }
 0x1be   :  { %v1673_v55 = vmul.f32 -0.5, %v6970_v11  ;;  %577 = vadd.xlane.f32.xlu1 %v576_v1  ;;  %v244_v14 = vmul.f32 %v6688_v13, %v108_v61  ;;  %v1660_v49 = vsel %vm7053_vm12, %v1657_v18, %v1654_v0  ;;  %vm7062_vm8 = vcmp.lt.f32.partialorder %v1649_v36, 0.0004427343  ;;  %v153_v1 = vld [vmem:[#allocation3 + $0x3e0] sm:$0xff] }
 0x1bf   :  { %v1664_v50 = vmul.f32 -0.5, %v6983_v6  ;;  %v7068_v35 = vadd.f32 %v5588_v26, %v425_v52  ;;  %v2898_v8 = vmul.f32 0.6931472, %v4789_v2  ;;  %v1651_v44 = vsel %vm7062_vm8, %v1648_v20, %v1645_v31 }
 0x1c0   :  { %v7073_v21 = vadd.f32 %v5588_v26, %v422_v34  ;;  %v531_v61 = vsel %vm293_vm0, %v244_v14, 0.0  ;;  %v4793_v0 = vpop.eup %4792  ;;  %v2918_v36 = vadd.f32 1.0, %v2917_v7  ;;  %v2909_v18 = vadd.f32 1.0, %v2908_v30 }
 0x1c1   :  { %vm7076_vm12 = vcmp.lt.f32.partialorder %v2911_v10, 0.0004427343  ;;  %v1676_v52 = vand.u32 2147483647, %v6970_v11  ;;  %532 = vadd.xlane.f32.xlu0 %v531_v61  ;;  %v4795_v2 = vpop.eup %4794  ;;  %v2889_v41 = vmul.f32 0.6931472, %v4791_v28  ;;  %v7084_v31 = vsel %vm844_vm5, %v6798_v9, %v1660_v49 }
 0x1c2   :  { %vm846_vm8 = vcmp.gt.f32.partialorder %v6850_v59, 20.0  ;;  %v1674_v14 = vadd.f32 1.0, %v1673_v55  ;;  %v1667_v7 = vand.u32 2147483647, %v6983_v6  ;;  %v4797_v30 = vpop.eup %4796  ;;  %v7091_v10 = vsel %vm843_vm2, %v6805_v19, %v1651_v44 }
 0x1c3   :  { %vm845_vm7 = vcmp.gt.f32.partialorder %v6858_v27, 20.0  ;;  %v1665_v34 = vadd.f32 1.0, %v1664_v50  ;;  %v978_v20 = vmin.f32 %v7068_v35, 20.0  ;;  %v289_v28 = vmul.f32 %v6688_v13, %v153_v1 }
 0x1c4   :  { %v2904_v9 = vsel %vm7036_vm10, %v7026_v38, %v2898_v8  ;;  %vm7099_vm5 = vcmp.lt.f32.partialorder %v2920_v51, 0.0004427343  ;;  %v1672_v49 = vmul.f32 0.6931472, %v4793_v0  ;;  %v977_v61 = vmin.f32 %v7073_v21, 20.0  ;;  %v4799_v44 = vpop.eup %4798 }
 0x1c5   :  { %v7105_v19 = vadd.f32 %v5588_v26, %v431_v32  ;;  %v2910_v50 = vmul.f32 %v2909_v18, %v6996_v3  ;;  %v2932_v46 = vadd.f32 1.0, %v7084_v31  ;;  %v1663_v1 = vmul.f32 0.6931472, %v4795_v2  ;;  %v7110_v56 = vpop.eup %4800  ;;  %v428_v18 = vpop.xlane.xlu0 %427 }
 0x1c6   :  { %v666_v37 = vsel %vm293_vm0, %v289_v28, 0.0  ;;  %v10699_v38 = vand.u32 2147483647, %v6885_v5  ;;  %v2907_v8 = vmul.f32 0.6931472, %v4797_v30  ;;  %v2923_v32 = vadd.f32 1.0, %v7091_v10  ;;  %v7124_v2 = vpop.eup %4802 }
 0x1c7   :  { %v1675_v0 = vmul.f32 %v6970_v11, %v1674_v14  ;;  %vm7120_vm10 = vcmp.lt.f32.partialorder %v1676_v52, 0.0004427343  ;;  %667 = vadd.xlane.f32.xlu1 %v666_v37  ;;  %v2895_v5 = vsel %vm7049_vm9, %v7031_v25, %v2889_v41  ;;  %v1666_v28 = vmul.f32 %v6983_v6, %v1665_v34  ;;  %v5338_v41 = vld [vmem:[%s10505_s1] ss:$0 sm:$0xff] }
 0x1c8   :  { %vm7114_vm2 = vcmp.lt.f32.partialorder %v10699_v38, 0.0004427343  ;;  %vm7130_vm1 = vcmp.lt.f32.partialorder %v1667_v7, 0.0004427343  ;;  %v1149_v38 = vmul.f32 1.442695, %v978_v20  ;;  %4804 = vlog2.f32 %v2932_v46 }
 0x1c9   :  { %v2916_v11 = vmul.f32 0.6931472, %v4799_v44  ;;  %v1678_v52 = vsel %vm7120_vm10, %v1675_v0, %v1672_v49  ;;  %v1147_v14 = vmul.f32 1.442695, %v977_v61  ;;  %v980_v37 = vmin.f32 %v7105_v19, 20.0  ;;  %v10709_v20 = vld [vmem:[#allocation8_spill] sm:$0xff] }
 0x1ca   :  { %v1669_v16 = vsel %vm7130_vm1, %v1666_v28, %v1663_v1  ;;  %v1688_v25 = vadd.f32 1.0, %v7110_v56  ;;  %v7141_v6 = vadd.f32 %v5588_v26, %v428_v18  ;;  %v10706_v12 = vand.u32 2147483647, %v6929_v42  ;;  %v138_v1 = vld [vmem:[#allocation3 + $0x368] sm:$0xff] }
 0x1cb   :  { %v2919_v7 = vmul.f32 %v2918_v36, %v7005_v39  ;;  %v2913_v34 = vsel %vm7076_vm12, %v2910_v50, %v2907_v8  ;;  %4806 = vlog2.f32 %v2923_v32  ;;  %v1679_v46 = vadd.f32 1.0, %v7124_v2 }
 0x1cc   :  { %vm7145_vm9 = vcmp.lt.f32.partialorder %v10706_v12, 0.0004427343  ;;  %v4076_v49 = vrot.slane %v2904_v9, %v10709_v20  ;;  %v4072_v61 = vrot.slane %v2895_v5, %v5658_v23  ;;  %v7158_v44 = vsel %vm846_vm8, %v6850_v59, %v1678_v52  ;;  %v10710_v9 = vld [vmem:[#allocation6_spill] sm:$0xff]  ;;  %v10712_v5 = vld [vmem:[#allocation7_spill] sm:$0xff] }
 0x1cd   :  { %4808 = vpow2.f32 %v1149_v38  ;;  %v2935_v0 = vmul.f32 -0.5, %v7084_v31  ;;  %v7164_v39 = vsel %vm845_vm7, %v6858_v27, %v1669_v16  ;;  %v1153_v36 = vmul.f32 1.442695, %v980_v37 }
 0x1ce   :  { %4810 = vpow2.f32 %v1147_v14  ;;  %v2922_v17 = vsel %vm7099_vm5, %v2919_v7, %v2916_v11  ;;  %v4081_v50 = vrot.slane %v2913_v34, %v10710_v9  ;;  %v979_v59 = vmin.f32 %v7141_v6, 20.0  ;;  %v437_v11 = vpop.xlane.xlu1 %436 }
 0x1cf   :  { %4812 = vlog2.f32 %v1688_v25  ;;  %v2926_v8 = vmul.f32 -0.5, %v7091_v10  ;;  %v2950_v32 = vadd.f32 1.0, %v7158_v44  ;;  %v274_v3 = vmul.f32 %v6688_v13, %v138_v1  ;;  %v139_v25 = vld [vmem:[#allocation3 + $0x370] sm:$0xff] }
 0x1d0   :  { %4814 = vlog2.f32 %v1679_v46  ;;  %v7174_v16 = vmul.f32 0.6931472, %v7042_v43  ;;  %v2877_v27 = vsel %vm7114_vm2, %v7013_v29, %v7023_v58  ;;  %vm10711_vm1 = vcmask 130112  }
 0x1d1   :  { %v4077_v55 = vsel %vm10711_vm1, %v4076_v49, %v4072_v61  ;;  %v2941_v18 = vadd.f32 1.0, %v7164_v39  ;;  %v4086_v28 = vrot.slane %v2922_v17, %v10712_v5  ;;  %v2936_v30 = vadd.f32 1.0, %v2935_v0 }
 0x1d2   :  { %v2938_v38 = vand.u32 2147483647, %v7084_v31  ;;  %4816 = vpow2.f32 %v1153_v36  ;;  %v7186_v43 = vmul.f32 %v6999_v62, %v6929_v42  ;;  %vm10713_vm7 = vcmask 195712   ;;  %v4805_v12 = vpop.eup %4804  ;;  %v10714_v62 = vld [vmem:[#allocation14_spill] sm:$0xff] }
 0x1d3   :  { %v4082_v52 = vsel %vm10713_vm7, %v4081_v50, %v4077_v55  ;;  %v2929_v51 = vand.u32 2147483647, %v7091_v10  ;;  %v1151_v29 = vmul.f32 1.442695, %v979_v59  ;;  %v2927_v58 = vadd.f32 1.0, %v2926_v8  ;;  %v443_v55 = vpop.xlane.xlu1 %442 }
 0x1d4   :  { %4818 = vlog2.f32 %v2950_v32  ;;  %v2953_v14 = vmul.f32 -0.5, %v7158_v44  ;;  %v621_v37 = vsel %vm293_vm0, %v274_v3, 0.0  ;;  %v7199_v42 = vsel %vm3974_vm4, %v6920_v22, %v7019_v63  ;;  %v124_v22 = vld [vmem:[#allocation3 + $0x2f8] sm:$0xff] }
 0x1d5   :  { %v7202_v34 = vrot.slane %v2877_v27, %v10714_v62  ;;  %4820 = vlog2.f32 %v2941_v18  ;;  %622 = vadd.xlane.f32.xlu0 %v621_v37  ;;  %v4807_v46 = vpop.eup %4806  ;;  %v7205_v49 = vmul.f32 %v2936_v30, %v7084_v31  ;;  %vm7207_vm12 = vcmp.lt.f32.partialorder %v2938_v38, 0.0004427343  ;;  %v434_v31 = vpop.xlane.xlu0 %433 }
 0x1d6   :  { %v7212_v1 = vsel %vm3904_vm11, %v4086_v28, %v4082_v52  ;;  %v1691_v0 = vmul.f32 -0.5, %v7110_v56  ;;  %vm7217_vm8 = vcmp.lt.f32.partialorder %v2929_v51, 0.0004427343  ;;  %v1682_v17 = vmul.f32 -0.5, %v7124_v2 }
 0x1d7   :  { %v7215_v63 = vpop.eup %4808  ;;  %4822 = vpow2.f32 %v1151_v29  ;;  %v275_v50 = vmul.f32 %v6688_v13, %v139_v25  ;;  %v2928_v8 = vmul.f32 %v2927_v58, %v7091_v10  ;;  %v2954_v32 = vadd.f32 1.0, %v2953_v14 }
 0x1d8   :  { %v7223_v59 = vpop.eup %4810  ;;  %v2956_v3 = vand.u32 2147483647, %v7158_v44  ;;  %v7228_v27 = vadd.f32 %v5588_v26, %v437_v11  ;;  %v2934_v28 = vmul.f32 0.6931472, %v4805_v12  ;;  %v1694_v30 = vand.u32 2147483647, %v7110_v56 }
 0x1d9   :  { %v4813_v18 = vpop.eup %4812  ;;  %v624_v38 = vsel %vm293_vm0, %v275_v50, 0.0  ;;  %v260_v52 = vmul.f32 %v6688_v13, %v124_v22  ;;  %v2925_v29 = vmul.f32 0.6931472, %v4807_v46  ;;  %vm848_vm5 = vcmp.gt.f32.partialorder %v6981_v53, 20.0 }
 0x1da   :  { %v4815_v51 = vpop.eup %4814  ;;  %v1692_v10 = vadd.f32 1.0, %v1691_v0  ;;  %v1706_v58 = vadd.f32 1.0, %v7215_v63  ;;  %v7236_v14 = vadd.f32 %v5588_v26, %v434_v31  ;;  %625 = vadd.xlane.f32.xlu1 %v624_v38  ;;  %v2944_v11 = vmul.f32 -0.5, %v7164_v39 }
 0x1db   :  { %vm847_vm2 = vcmp.gt.f32.partialorder %v6990_v4, 20.0  ;;  %v1683_v37 = vadd.f32 1.0, %v1682_v17  ;;  %v1697_v25 = vadd.f32 1.0, %v7223_v59  ;;  %v7242_v13 = vadd.f32 %v5588_v26, %v443_v55 }
 0x1dc   :  { %v7244_v12 = vpop.eup %4816  ;;  %v1690_v46 = vmul.f32 0.6931472, %v4813_v18  ;;  %v1685_v0 = vand.u32 2147483647, %v7124_v2  ;;  %v982_v22 = vmin.f32 %v7228_v27, 20.0  ;;  %v579_v31 = vsel %vm293_vm0, %v260_v52, 0.0 }
 0x1dd   :  { %v2940_v50 = vsel %vm7207_vm12, %v7205_v49, %v2934_v28  ;;  %v2947_v17 = vand.u32 2147483647, %v7164_v39  ;;  %vm7253_vm10 = vcmp.lt.f32.partialorder %v1694_v30, 0.0004427343  ;;  %v1681_v55 = vmul.f32 0.6931472, %v4815_v51  ;;  %580 = vadd.xlane.f32.xlu0 %v579_v31 }
 0x1de   :  { %v4819_v7 = vpop.eup %4818  ;;  %v2931_v18 = vsel %vm7217_vm8, %v2928_v8, %v2925_v29  ;;  %v1693_v9 = vmul.f32 %v7110_v56, %v1692_v10  ;;  %4824 = vlog2.f32 %v1706_v58  ;;  %v981_v52 = vmin.f32 %v7236_v14, 20.0 }
 0x1df   :  { %v4821_v5 = vpop.eup %4820  ;;  %v1684_v49 = vmul.f32 %v7124_v2, %v1683_v37  ;;  %4826 = vlog2.f32 %v1697_v25  ;;  %v1724_v61 = vadd.f32 1.0, %v7244_v12  ;;  %v984_v28 = vmin.f32 %v7242_v13, 20.0  ;;  %v449_v2 = vpop.xlane.xlu1 %448 }
 0x1e0   :  { %v2945_v30 = vadd.f32 1.0, %v2944_v11  ;;  %v1696_v51 = vsel %vm7253_vm10, %v1693_v9, %v1690_v46  ;;  %vm7266_vm1 = vcmp.lt.f32.partialorder %v1685_v0, 0.0004427343  ;;  %v1157_v56 = vmul.f32 1.442695, %v982_v22 }
 0x1e1   :  { %v7270_v8 = vpop.eup %4822  ;;  %v4091_v29 = vrot.slane %v2931_v18, %v5685_v40  ;;  %v2952_v10 = vmul.f32 0.6931472, %v4819_v7  ;;  %vm7273_vm7 = vcmp.lt.f32.partialorder %v2956_v3, 0.0004427343  ;;  %v1687_v58 = vsel %vm7266_vm1, %v1684_v49, %v1681_v55  ;;  %v154_v55 = vld [vmem:[#allocation3 + $0x3e8] sm:$0xff] }
 0x1e2   :  { %v2955_v11 = vmul.f32 %v2954_v32, %v7158_v44  ;;  %v2943_v9 = vmul.f32 0.6931472, %v4821_v5  ;;  %vm7280_vm12 = vcmp.lt.f32.partialorder %v2947_v17, 0.0004427343  ;;  %v1155_v25 = vmul.f32 1.442695, %v981_v52 }
 0x1e3   :  { %v4096_v46 = vrot.slane %v2940_v50, %v5675_v33  ;;  %v7288_v7 = vsel %vm848_vm5, %v6981_v53, %v1696_v51  ;;  %4828 = vlog2.f32 %v1724_v61  ;;  %v1161_v3 = vmul.f32 1.442695, %v984_v28  ;;  %v440_v50 = vpop.xlane.xlu0 %439 }
 0x1e4   :  { %v2946_v0 = vmul.f32 %v2945_v30, %v7164_v39  ;;  %v7294_v44 = vsel %vm847_vm2, %v6990_v4, %v1687_v58  ;;  %v1715_v5 = vadd.f32 1.0, %v7270_v8  ;;  %4830 = vpow2.f32 %v1157_v56  ;;  %v140_v39 = vld [vmem:[#allocation3 + $0x378] sm:$0xff] }
 0x1e5   :  { %v4092_v32 = vsel %vm3911_vm13, %v4091_v29, %v7212_v1  ;;  %v2958_v22 = vsel %vm7273_vm7, %v2955_v11, %v2952_v10  ;;  %v1709_v53 = vmul.f32 -0.5, %v7215_v63  ;;  %v1700_v31 = vmul.f32 -0.5, %v7223_v59  ;;  %v156_v58 = vld [vmem:[#allocation3 + $0x3f8] sm:$0xff] }
 0x1e6   :  { %v2949_v17 = vsel %vm7280_vm12, %v2946_v0, %v2943_v9  ;;  %v2968_v4 = vadd.f32 1.0, %v7288_v7  ;;  %v1712_v38 = vand.u32 2147483647, %v7215_v63  ;;  %4832 = vpow2.f32 %v1155_v25 }
 0x1e7   :  { %v10727_v1 = vsel %vm7145_vm9, %v7186_v43, %v7174_v16  ;;  %v7318_v52 = vsel %vm10535_vm3, %v7202_v34, %v7199_v42  ;;  %v2959_v49 = vadd.f32 1.0, %v7294_v44  ;;  %4834 = vpow2.f32 %v1161_v3  ;;  %v446_v25 = vpop.xlane.xlu0 %445 }
 0x1e8   :  { %v7313_v18 = vrot.slane %v10727_v1, %v6005_v54  ;;  %v4825_v61 = vpop.eup %4824  ;;  %v7322_v28 = vrot.slane %v2958_v22, %v5691_v45  ;;  %v7325_v30 = vsel %vm3918_vm15, %v4096_v46, %v4092_v32  ;;  %4836 = vlog2.f32 %v1715_v5  ;;  %v155_v46 = vld [vmem:[#allocation3 + $0x3f0] sm:$0xff] }
 0x1e9   :  { %v276_v16 = vmul.f32 %v5338_v41, %v140_v39  ;;  %v4827_v43 = vpop.eup %4826  ;;  %v7331_v42 = vrot.slane %v2949_v17, %v5694_v47  ;;  %v1710_v34 = vadd.f32 1.0, %v1709_v53  ;;  %v1701_v51 = vadd.f32 1.0, %v1700_v31 }
 0x1ea   :  { %v290_v36 = vmul.f32 %v5338_v41, %v154_v55  ;;  %4838 = vlog2.f32 %v2968_v4  ;;  %v2971_v56 = vmul.f32 -0.5, %v7288_v7  ;;  %vm7334_vm9 = vcmp.lt.f32.partialorder %v1712_v38, 0.0004427343 }
 0x1eb   :  { %v7339_v10 = vadd.f32 %v5588_v26, %v440_v50  ;;  %v2974_v11 = vand.u32 2147483647, %v7288_v7  ;;  %4840 = vlog2.f32 %v2959_v49  ;;  %vm850_vm8 = vcmp.gt.f32.partialorder %v7068_v35, 20.0 }
 0x1ec   :  { %vm849_vm5 = vcmp.gt.f32.partialorder %v7073_v21, 20.0  ;;  %v1703_v9 = vand.u32 2147483647, %v7223_v59  ;;  %v1727_v37 = vmul.f32 -0.5, %v7244_v12  ;;  %v1708_v3 = vmul.f32 0.6931472, %v4825_v61 }
 0x1ed   :  { %v1699_v0 = vmul.f32 0.6931472, %v4827_v43  ;;  %v627_v5 = vsel %vm293_vm0, %v276_v16, 0.0  ;;  %v669_v32 = vsel %vm293_vm0, %v290_v36, 0.0  ;;  %v4829_v22 = vpop.eup %4828  ;;  %v1711_v53 = vmul.f32 %v7215_v63, %v1710_v34 }
 0x1ee   :  { %v1702_v31 = vmul.f32 %v7223_v59, %v1701_v51  ;;  %v1718_v50 = vmul.f32 -0.5, %v7270_v8  ;;  %v7352_v39 = vadd.f32 %v5588_v26, %v449_v2  ;;  %628 = vadd.xlane.f32.xlu1 %v627_v5  ;;  %670 = vadd.xlane.f32.xlu0 %v669_v32  ;;  %v7354_v17 = vpop.eup %4830  ;;  %v983_v4 = vmin.f32 %v7339_v10, 20.0 }
 0x1ef   :  { %v7358_v38 = vadd.f32 %v5588_v26, %v446_v25  ;;  %v292_v55 = vmul.f32 %v5338_v41, %v156_v58  ;;  %v291_v1 = vmul.f32 %v5338_v41, %v155_v46  ;;  %v2972_v49 = vadd.f32 1.0, %v2971_v56 }
 0x1f0   :  { %v2962_v63 = vmul.f32 -0.5, %v7294_v44  ;;  %vm7361_vm2 = vcmp.lt.f32.partialorder %v1703_v9, 0.0004427343  ;;  %vm852_vm10 = vcmp.gt.f32.partialorder %v7105_v19, 20.0  ;;  %v1728_v61 = vadd.f32 1.0, %v1727_v37  ;;  %v7366_v16 = vpop.eup %4832 }
 0x1f1   :  { %v1714_v43 = vsel %vm7334_vm9, %v1711_v53, %v1708_v3  ;;  %v1705_v34 = vsel %vm7361_vm2, %v1702_v31, %v1699_v0  ;;  %v1726_v51 = vmul.f32 0.6931472, %v4829_v22  ;;  %v1730_v41 = vand.u32 2147483647, %v7244_v12  ;;  %v7373_v36 = vpop.eup %4834 }
 0x1f2   :  { %v1742_v56 = vadd.f32 1.0, %v7354_v17  ;;  %v986_v2 = vmin.f32 %v7352_v39, 20.0  ;;  %v675_v58 = vsel %vm293_vm0, %v292_v55, 0.0  ;;  %v672_v9 = vsel %vm293_vm0, %v291_v1, 0.0  ;;  %v4837_v37 = vpop.eup %4836 }
 0x1f3   :  { %v1719_v25 = vadd.f32 1.0, %v1718_v50  ;;  %v1721_v29 = vand.u32 2147483647, %v7270_v8  ;;  %v1159_v46 = vmul.f32 1.442695, %v983_v4  ;;  %v985_v3 = vmin.f32 %v7358_v38, 20.0  ;;  %676 = vadd.xlane.f32.xlu1 %v675_v58  ;;  %673 = vadd.xlane.f32.xlu0 %v672_v9 }
 0x1f4   :  { %v2963_v0 = vadd.f32 1.0, %v2962_v63  ;;  %v2965_v5 = vand.u32 2147483647, %v7294_v44  ;;  %v1729_v32 = vmul.f32 %v7244_v12, %v1728_v61  ;;  %vm851_vm1 = vcmp.gt.f32.partialorder %v7141_v6, 20.0  ;;  %v4839_v53 = vpop.eup %4838 }
 0x1f5   :  { %v1733_v22 = vadd.f32 1.0, %v7366_v16  ;;  %v7388_v31 = vsel %vm850_vm8, %v7068_v35, %v1714_v43  ;;  %v7393_v50 = vsel %vm849_vm5, %v7073_v21, %v1705_v34  ;;  %vm7395_vm0 = vcmp.lt.f32.partialorder %v1730_v41, 0.0004427343  ;;  %v4841_v55 = vpop.eup %4840  ;;  %v452_v43 = vpop.xlane.xlu0 %451 }
 0x1f6   :  { %v1760_v12 = vadd.f32 1.0, %v7373_v36  ;;  %vm10528_vm7 = vcmask 1048512   ;;  %v1732_v1 = vsel %vm7395_vm0, %v1729_v32, %v1726_v51  ;;  %v1717_v63 = vmul.f32 0.6931472, %v4837_v37 }
 0x1f7   :  { %4842 = vlog2.f32 %v1742_v56  ;;  %v1165_v35 = vmul.f32 1.442695, %v986_v2  ;;  %v1720_v59 = vmul.f32 %v7270_v8, %v1719_v25  ;;  %vm7403_vm12 = vcmp.lt.f32.partialorder %v1721_v29, 0.0004427343 }
 0x1f8   :  { %4844 = vpow2.f32 %v1159_v46  ;;  %v1163_v21 = vmul.f32 1.442695, %v985_v3  ;;  %v2970_v34 = vmul.f32 0.6931472, %v4839_v53  ;;  %v2986_v41 = vadd.f32 1.0, %v7388_v31 }
 0x1f9   :  { %v2977_v58 = vadd.f32 1.0, %v7393_v50  ;;  %4846 = vlog2.f32 %v1733_v22  ;;  %v2961_v9 = vmul.f32 0.6931472, %v4841_v55  ;;  %v2989_v51 = vmul.f32 -0.5, %v7388_v31 }
 0x1fa   :  { %v7413_v8 = vsel %vm852_vm10, %v7105_v19, %v1732_v1  ;;  %4848 = vlog2.f32 %v1760_v12  ;;  %v2973_v56 = vmul.f32 %v2972_v49, %v7288_v7  ;;  %v1723_v2 = vsel %vm7403_vm12, %v1720_v59, %v1717_v63  ;;  %v455_v49 = vpop.xlane.xlu1 %454 }
 0x1fb   :  { %4850 = vpow2.f32 %v1165_v35  ;;  %v7419_v37 = vadd.f32 %v5588_v26, %v452_v43  ;;  %v4102_v25 = vsel %vm3925_vm6, %v7331_v42, %v7325_v30  ;;  %vm7426_vm9 = vcmp.lt.f32.partialorder %v2974_v11, 0.0004427343 }
 0x1fc   :  { %v2964_v19 = vmul.f32 %v2963_v0, %v7294_v44  ;;  %4852 = vpow2.f32 %v1163_v21  ;;  %v2976_v46 = vsel %vm7426_vm9, %v2973_v56, %v2970_v34  ;;  %vm7433_vm8 = vcmp.lt.f32.partialorder %v2965_v5, 0.0004427343 }
 0x1fd   :  { %4854 = vlog2.f32 %v2977_v58  ;;  %v3004_v30 = vadd.f32 1.0, %v7413_v8  ;;  %v2990_v42 = vadd.f32 1.0, %v2989_v51  ;;  %v7443_v44 = vsel %vm851_vm1, %v7141_v6, %v1723_v2 }
 0x1fe   :  { %v2967_v7 = vsel %vm7433_vm8, %v2964_v19, %v2961_v9  ;;  %4856 = vlog2.f32 %v2986_v41  ;;  %v2980_v11 = vmul.f32 -0.5, %v7393_v50  ;;  %v1745_v0 = vmul.f32 -0.5, %v7354_v17  ;;  %v461_v61 = vpop.xlane.xlu1 %460 }
 0x1ff   :  { %v7448_v5 = vadd.f32 %v5588_v26, %v455_v49  ;;  %v987_v32 = vmin.f32 %v7419_v37, 20.0  ;;  %v7454_v22 = vsel %vm10528_vm7, %v7313_v18, %v7318_v52  ;;  %v4107_v53 = vsel %vm3932_vm14, %v7322_v28, %v4102_v25 }
 0x200   :  { %v1736_v6 = vmul.f32 -0.5, %v7366_v16  ;;  %v1763_v4 = vmul.f32 -0.5, %v7373_v36  ;;  %v2992_v55 = vand.u32 2147483647, %v7388_v31  ;;  %v2983_v1 = vand.u32 2147483647, %v7393_v50 }
 0x201   :  { %v4843_v12 = vpop.eup %4842  ;;  %4858 = vlog2.f32 %v3004_v30  ;;  %v2995_v63 = vadd.f32 1.0, %v7443_v44  ;;  %v7466_v18 = vrot.slane %v2976_v46, %v5697_v48  ;;  %v4111_v52 = vrot.slane %v2967_v7, %v5705_v57 }
 0x202   :  { %v7463_v35 = vpop.eup %4844  ;;  %v7470_v28 = vmul.f32 %v2990_v42, %v7388_v31  ;;  %v1748_v59 = vand.u32 2147483647, %v7354_v17  ;;  %v2981_v43 = vadd.f32 1.0, %v2980_v11  ;;  %vm854_vm5 = vcmp.gt.f32.partialorder %v7228_v27, 20.0 }
 0x203   :  { %v4847_v21 = vpop.eup %4846  ;;  %v1746_v34 = vadd.f32 1.0, %v1745_v0  ;;  %v988_v41 = vmin.f32 %v7448_v5, 20.0  ;;  %v1167_v58 = vmul.f32 1.442695, %v987_v32  ;;  %v3007_v51 = vmul.f32 -0.5, %v7413_v8 }
 0x204   :  { %v4849_v9 = vpop.eup %4848  ;;  %vm853_vm2 = vcmp.gt.f32.partialorder %v7236_v14, 20.0  ;;  %v1737_v56 = vadd.f32 1.0, %v1736_v6  ;;  %v1739_v31 = vand.u32 2147483647, %v7366_v16  ;;  %v1764_v2 = vadd.f32 1.0, %v1763_v4 }
 0x205   :  { %v7478_v25 = vpop.eup %4850  ;;  %vm7480_vm10 = vcmp.lt.f32.partialorder %v2983_v1, 0.0004427343  ;;  %4860 = vlog2.f32 %v2995_v63  ;;  %v1744_v19 = vmul.f32 0.6931472, %v4843_v12  ;;  %vm856_vm1 = vcmp.gt.f32.partialorder %v7242_v13, 20.0 }
 0x206   :  { %v1751_v49 = vadd.f32 1.0, %v7463_v35  ;;  %v7487_v46 = vadd.f32 %v5588_v26, %v461_v61  ;;  %v7489_v3 = vpop.eup %4852  ;;  %vm10742_vm0 = vcmask 589312   ;;  %vm7492_vm12 = vcmp.lt.f32.partialorder %v2992_v55, 0.0004427343 }
 0x207   :  { %v4112_v30 = vsel %vm10742_vm0, %v4111_v52, %v4107_v53  ;;  %vm7496_vm9 = vcmp.lt.f32.partialorder %v1748_v59, 0.0004427343  ;;  %v1735_v11 = vmul.f32 0.6931472, %v4847_v21  ;;  %v1766_v0 = vand.u32 2147483647, %v7373_v36  ;;  %v4855_v32 = vpop.eup %4854 }
 0x208   :  { %v1747_v6 = vmul.f32 %v7354_v17, %v1746_v34  ;;  %v1762_v4 = vmul.f32 0.6931472, %v4849_v9  ;;  %v1169_v12 = vmul.f32 1.442695, %v988_v41  ;;  %4862 = vpow2.f32 %v1167_v58  ;;  %v4857_v1 = vpop.eup %4856 }
 0x209   :  { %v1738_v53 = vmul.f32 %v7366_v16, %v1737_v56  ;;  %vm7503_vm8 = vcmp.lt.f32.partialorder %v1739_v31, 0.0004427343  ;;  %v1765_v63 = vmul.f32 %v7373_v36, %v1764_v2  ;;  %v1778_v52 = vadd.f32 1.0, %v7478_v25  ;;  %v458_v36 = vpop.xlane.xlu0 %457 }
 0x20a   :  { %v1750_v59 = vsel %vm7496_vm9, %v1747_v6, %v1744_v19  ;;  %4864 = vlog2.f32 %v1751_v49  ;;  %v1769_v17 = vadd.f32 1.0, %v7489_v3  ;;  %v990_v61 = vmin.f32 %v7487_v46, 20.0 }
 0x20b   :  { %v2979_v21 = vmul.f32 0.6931472, %v4855_v32  ;;  %v3010_v34 = vand.u32 2147483647, %v7413_v8  ;;  %v1741_v16 = vsel %vm7503_vm8, %v1738_v53, %v1735_v11  ;;  %vm7516_vm0 = vcmp.lt.f32.partialorder %v1766_v0, 0.0004427343  ;;  %v4859_v58 = vpop.eup %4858 }
 0x20c   :  { %v2988_v9 = vmul.f32 0.6931472, %v4857_v1  ;;  %v2982_v56 = vmul.f32 %v2981_v43, %v7393_v50  ;;  %v1768_v31 = vsel %vm7516_vm0, %v1765_v63, %v1762_v4  ;;  %4866 = vpow2.f32 %v1169_v12 }
 0x20d   :  { %v3008_v2 = vadd.f32 1.0, %v3007_v51  ;;  %v2998_v19 = vmul.f32 -0.5, %v7443_v44  ;;  %v7527_v49 = vsel %vm854_vm5, %v7228_v27, %v1750_v59  ;;  %4868 = vlog2.f32 %v1778_v52 }
 0x20e   :  { %v7532_v42 = vsel %vm853_vm2, %v7236_v14, %v1741_v16  ;;  %4870 = vlog2.f32 %v1769_v17  ;;  %v1173_v50 = vmul.f32 1.442695, %v990_v61  ;;  %v7535_v43 = vadd.f32 %v5588_v26, %v458_v36  ;;  %v488_v36 = vpop.xlane.xlu1 %487 }
 0x20f   :  { %v2985_v51 = vsel %vm7480_vm10, %v2982_v56, %v2979_v21  ;;  %v3006_v11 = vmul.f32 0.6931472, %v4859_v58  ;;  %v3001_v0 = vand.u32 2147483647, %v7443_v44  ;;  %v7543_v27 = vsel %vm856_vm1, %v7242_v13, %v1768_v31  ;;  %v4861_v32 = vpop.eup %4860 }
 0x210   :  { %v2994_v14 = vsel %vm7492_vm12, %v7470_v28, %v2988_v9  ;;  %vm10751_vm5 = vcmask 654912   ;;  %v3022_v4 = vadd.f32 1.0, %v7527_v49  ;;  %v1754_v29 = vmul.f32 -0.5, %v7463_v35 }
 0x211   :  { %v4117_v6 = vsel %vm10751_vm5, %v7466_v18, %v4112_v30  ;;  %v3009_v12 = vmul.f32 %v3008_v2, %v7413_v8  ;;  %vm7553_vm2 = vcmp.lt.f32.partialorder %v3010_v34, 0.0004427343  ;;  %v2999_v13 = vadd.f32 1.0, %v2998_v19 }
 0x212   :  { %v3013_v53 = vadd.f32 1.0, %v7532_v42  ;;  %v7558_v55 = vpop.eup %4862  ;;  %v4121_v28 = vrot.slane %v2985_v51, %v5717_v15  ;;  %v3040_v7 = vadd.f32 1.0, %v7543_v27  ;;  %4872 = vpow2.f32 %v1173_v50 }
 0x213   :  { %v989_v18 = vmin.f32 %v7535_v43, 20.0  ;;  %v4126_v30 = vrot.slane %v2994_v14, %v5708_v60  ;;  %v3012_v8 = vsel %vm7553_vm2, %v3009_v12, %v3006_v11  ;;  %v2997_v63 = vmul.f32 0.6931472, %v4861_v32  ;;  %v464_v11 = vpop.xlane.xlu0 %463 }
 0x214   :  { %vm7566_vm10 = vcmp.lt.f32.partialorder %v3001_v0, 0.0004427343  ;;  %v4865_v59 = vpop.eup %4864  ;;  %4874 = vlog2.f32 %v3022_v4  ;;  %v1755_v17 = vadd.f32 1.0, %v1754_v29  ;;  %v1757_v61 = vand.u32 2147483647, %v7463_v35 }
 0x215   :  { %v1781_v21 = vmul.f32 -0.5, %v7478_v25  ;;  %v3000_v34 = vmul.f32 %v2999_v13, %v7443_v44  ;;  %4876 = vlog2.f32 %v3013_v53  ;;  %vm855_vm1 = vcmp.gt.f32.partialorder %v7339_v10, 20.0 }
 0x216   :  { %v1772_v16 = vmul.f32 -0.5, %v7489_v3  ;;  %v1787_v41 = vadd.f32 1.0, %v7558_v55  ;;  %v7576_v58 = vpop.eup %4866  ;;  %vm10756_vm12 = vcmask 720512   ;;  %v7580_v56 = vrot.slane %v3012_v8, %v5722_v24 }
 0x217   :  { %v4122_v9 = vsel %vm10756_vm12, %v4121_v28, %v4117_v6  ;;  %4878 = vlog2.f32 %v3040_v7  ;;  %v1171_v31 = vmul.f32 1.442695, %v989_v18  ;;  %v4869_v2 = vpop.eup %4868  ;;  %v3003_v44 = vsel %vm7566_vm10, %v3000_v34, %v2997_v63  ;;  %v10759_v28 = vld [vmem:[#allocation12_spill] sm:$0xff] }
 0x218   :  { %v3025_v19 = vmul.f32 -0.5, %v7527_v49  ;;  %v3028_v50 = vand.u32 2147483647, %v7527_v49  ;;  %v1753_v51 = vmul.f32 0.6931472, %v4865_v59  ;;  %v4871_v0 = vpop.eup %4870  ;;  %v1756_v32 = vmul.f32 %v7463_v35, %v1755_v17 }
 0x219   :  { %vm7587_vm9 = vcmp.lt.f32.partialorder %v1757_v61, 0.0004427343  ;;  %vm858_vm8 = vcmp.gt.f32.partialorder %v7352_v39, 20.0  ;;  %v1782_v6 = vadd.f32 1.0, %v1781_v21  ;;  %v7593_v4 = vadd.f32 %v5588_v26, %v488_v36 }
 0x21a   :  { %v1784_v29 = vand.u32 2147483647, %v7478_v25  ;;  %vm857_vm0 = vcmp.gt.f32.partialorder %v7358_v38, 20.0  ;;  %v1773_v12 = vadd.f32 1.0, %v1772_v16  ;;  %v1796_v1 = vadd.f32 1.0, %v7576_v58 }
 0x21b   :  { %4880 = vlog2.f32 %v1787_v41  ;;  %v1780_v13 = vmul.f32 0.6931472, %v4869_v2  ;;  %v1775_v35 = vand.u32 2147483647, %v7489_v3  ;;  %v7600_v53 = vadd.f32 %v5588_v26, %v464_v11 }
 0x21c   :  { %4882 = vpow2.f32 %v1171_v31  ;;  %v4131_v7 = vrot.slane %v3003_v44, %v10759_v28  ;;  %v3026_v18 = vadd.f32 1.0, %v3025_v19  ;;  %v1759_v8 = vsel %vm7587_vm9, %v1756_v32, %v1753_v51  ;;  %v7605_v52 = vpop.eup %4872 }
 0x21d   :  { %v1771_v63 = vmul.f32 0.6931472, %v4871_v0  ;;  %v3016_v59 = vmul.f32 -0.5, %v7532_v42  ;;  %v3019_v17 = vand.u32 2147483647, %v7532_v42  ;;  %v1783_v61 = vmul.f32 %v7478_v25, %v1782_v6 }
 0x21e   :  { %v999_v21 = vmin.f32 %v7593_v4, 20.0  ;;  %v3043_v34 = vmul.f32 -0.5, %v7543_v27  ;;  %vm7612_vm5 = vcmp.lt.f32.partialorder %v1784_v29, 0.0004427343  ;;  %v1774_v41 = vmul.f32 %v7489_v3, %v1773_v12  ;;  %v4875_v36 = vpop.eup %4874 }
 0x21f   :  { %4884 = vlog2.f32 %v1796_v1  ;;  %v7620_v31 = vsel %vm855_vm1, %v7339_v10, %v1759_v8  ;;  %v1786_v25 = vsel %vm7612_vm5, %v1783_v61, %v1780_v13  ;;  %vm7624_vm2 = vcmp.lt.f32.partialorder %v1775_v35, 0.0004427343  ;;  %v4877_v19 = vpop.eup %4876 }
 0x220   :  { %v991_v44 = vmin.f32 %v7600_v53, 20.0  ;;  %vm10764_vm10 = vcmask 786112   ;;  %vm7630_vm12 = vcmp.lt.f32.partialorder %v3028_v50, 0.0004427343  ;;  %v1777_v10 = vsel %vm7624_vm2, %v1774_v41, %v1771_v63 }
 0x221   :  { %v4127_v51 = vsel %vm10764_vm10, %v4126_v30, %v4122_v9  ;;  %v1814_v11 = vadd.f32 1.0, %v7605_v52  ;;  %v4879_v0 = vpop.eup %4878  ;;  %vm10767_vm1 = vcmask 851712   ;;  %v3027_v14 = vmul.f32 %v3026_v18, %v7527_v49 }
 0x222   :  { %v4132_v32 = vsel %vm10767_vm1, %v4131_v7, %v4127_v51  ;;  %v1790_v6 = vmul.f32 -0.5, %v7558_v55  ;;  %v1191_v29 = vmul.f32 1.442695, %v999_v21  ;;  %v3017_v12 = vadd.f32 1.0, %v3016_v59  ;;  %v494_v51 = vpop.xlane.xlu1 %493 }
 0x223   :  { %vm7640_vm9 = vcmp.lt.f32.partialorder %v3019_v17, 0.0004427343  ;;  %v3031_v9 = vadd.f32 1.0, %v7620_v31  ;;  %v7648_v50 = vsel %vm858_vm8, %v7352_v39, %v1786_v25  ;;  %v3044_v1 = vadd.f32 1.0, %v3043_v34 }
 0x224   :  { %v3046_v13 = vand.u32 2147483647, %v7543_v27  ;;  %v7654_v49 = vsel %vm857_vm0, %v7358_v38, %v1777_v10  ;;  %v1175_v35 = vmul.f32 1.442695, %v991_v44  ;;  %v3024_v18 = vmul.f32 0.6931472, %v4875_v36 }
 0x225   :  { %v4881_v7 = vpop.eup %4880  ;;  %v3015_v8 = vmul.f32 0.6931472, %v4877_v19  ;;  %v3042_v63 = vmul.f32 0.6931472, %v4879_v0  ;;  %4886 = vlog2.f32 %v1814_v11  ;;  %v3058_v17 = vadd.f32 1.0, %v7648_v50  ;;  %v491_v0 = vpop.xlane.xlu0 %490 }
 0x226   :  { %v7656_v59 = vpop.eup %4882  ;;  %v1799_v39 = vmul.f32 -0.5, %v7576_v58  ;;  %v1791_v61 = vadd.f32 1.0, %v1790_v6  ;;  %4888 = vpow2.f32 %v1191_v29  ;;  %v3018_v21 = vmul.f32 %v3017_v12, %v7532_v42 }
 0x227   :  { %4890 = vlog2.f32 %v3031_v9  ;;  %v3049_v38 = vadd.f32 1.0, %v7654_v49  ;;  %v1793_v34 = vand.u32 2147483647, %v7558_v55  ;;  %v3045_v16 = vmul.f32 %v3044_v1, %v7543_v27 }
 0x228   :  { %vm7664_vm8 = vcmp.lt.f32.partialorder %v3046_v13, 0.0004427343  ;;  %v1789_v36 = vmul.f32 0.6931472, %v4881_v7  ;;  %4892 = vpow2.f32 %v1175_v35  ;;  %v3030_v2 = vsel %vm7630_vm12, %v3027_v14, %v3024_v18 }
 0x229   :  { %v4885_v25 = vpop.eup %4884  ;;  %v3021_v42 = vsel %vm7640_vm9, %v3018_v21, %v3015_v8  ;;  %v3034_v44 = vmul.f32 -0.5, %v7620_v31  ;;  %v1805_v19 = vadd.f32 1.0, %v7656_v59  ;;  %v3048_v27 = vsel %vm7664_vm8, %v3045_v16, %v3042_v63 }
 0x22a   :  { %4894 = vlog2.f32 %v3058_v17  ;;  %v1800_v10 = vadd.f32 1.0, %v1799_v39  ;;  %v1792_v11 = vmul.f32 %v7558_v55, %v1791_v61  ;;  %v3037_v6 = vand.u32 2147483647, %v7620_v31  ;;  %v539_v17 = vpop.xlane.xlu1 %538 }
 0x22b   :  { %4896 = vlog2.f32 %v3049_v38  ;;  %v1802_v3 = vand.u32 2147483647, %v7576_v58  ;;  %vm7679_vm0 = vcmp.lt.f32.partialorder %v1793_v34, 0.0004427343  ;;  %v1798_v29 = vmul.f32 0.6931472, %v4885_v25 }
 0x22c   :  { %v1795_v12 = vsel %vm7679_vm0, %v1792_v11, %v1789_v36  ;;  %v1817_v30 = vmul.f32 -0.5, %v7605_v52  ;;  %v7687_v9 = vadd.f32 %v5588_v26, %v494_v51  ;;  %v7691_v55 = vsel %vm3974_vm4, %v7580_v56, %v4132_v32 }
 0x22d   :  { %v3035_v1 = vadd.f32 1.0, %v3034_v44  ;;  %vm860_vm5 = vcmp.gt.f32.partialorder %v7448_v5, 20.0  ;;  %4898 = vlog2.f32 %v1805_v19  ;;  %v7695_v13 = vrot.slane %v3030_v2, %v6005_v54 }
 0x22e   :  { %v7698_v35 = vrot.slane %v3021_v42, %v10714_v62  ;;  %v1801_v7 = vmul.f32 %v7576_v58, %v1800_v10  ;;  %vm859_vm2 = vcmp.gt.f32.partialorder %v7419_v37, 20.0  ;;  %v7703_v8 = vrot.slane %v3048_v27, %v10709_v20 }
 0x22f   :  { %v4887_v18 = vpop.eup %4886  ;;  %vm7705_vm10 = vcmp.lt.f32.partialorder %v1802_v3, 0.0004427343  ;;  %v7710_v32 = vsel %vm859_vm2, %v7419_v37, %v1795_v12  ;;  %v7713_v63 = vadd.f32 %v5588_v26, %v491_v0  ;;  %vm7717_vm12 = vcmp.lt.f32.partialorder %v3037_v6, 0.0004427343  ;;  %v536_v37 = vpop.xlane.xlu0 %535 }
 0x230   :  { %v7715_v39 = vpop.eup %4888  ;;  %v1804_v61 = vsel %vm7705_vm10, %v1801_v7, %v1798_v29  ;;  %vm862_vm1 = vcmp.gt.f32.partialorder %v7487_v46, 20.0  ;;  %v1818_v21 = vadd.f32 1.0, %v1817_v30  ;;  %v1001_v38 = vmin.f32 %v7687_v9, 20.0 }
 0x231   :  { %v4891_v34 = vpop.eup %4890  ;;  %v3036_v16 = vmul.f32 %v3035_v1, %v7620_v31  ;;  %v3061_v41 = vmul.f32 -0.5, %v7648_v50  ;;  %v3064_v36 = vand.u32 2147483647, %v7648_v50  ;;  %v1820_v25 = vand.u32 2147483647, %v7605_v52 }
 0x232   :  { %v7729_v2 = vpop.eup %4892  ;;  %v3052_v42 = vmul.f32 -0.5, %v7654_v49  ;;  %v3067_v44 = vadd.f32 1.0, %v7710_v32  ;;  %v1816_v19 = vmul.f32 0.6931472, %v4887_v18  ;;  %v7734_v51 = vadd.f32 %v5588_v26, %v539_v17  ;;  %v542_v17 = vpop.xlane.xlu1 %541 }
 0x233   :  { %v7739_v31 = vsel %vm860_vm5, %v7448_v5, %v1804_v61  ;;  %v1895_v27 = vadd.f32 1.0, %v7715_v39  ;;  %v1000_v10 = vmin.f32 %v7713_v63, 20.0  ;;  %v7744_v11 = vadd.f32 %v5588_v26, %v536_v37 }
 0x234   :  { %v4895_v0 = vpop.eup %4894  ;;  %v3033_v6 = vmul.f32 0.6931472, %v4891_v34  ;;  %v1819_v3 = vmul.f32 %v7605_v52, %v1818_v21  ;;  %v1808_v14 = vmul.f32 -0.5, %v7656_v59  ;;  %v1195_v29 = vmul.f32 1.442695, %v1001_v38 }
 0x235   :  { %v4897_v12 = vpop.eup %4896  ;;  %v3062_v30 = vadd.f32 1.0, %v3061_v41  ;;  %v3055_v1 = vand.u32 2147483647, %v7654_v49  ;;  %vm7749_vm9 = vcmp.lt.f32.partialorder %v1820_v25, 0.0004427343  ;;  %v1823_v7 = vadd.f32 1.0, %v7729_v2 }
 0x236   :  { %v3076_v18 = vadd.f32 1.0, %v7739_v31  ;;  %4900 = vlog2.f32 %v3067_v44  ;;  %v1822_v56 = vsel %vm7749_vm9, %v1819_v3, %v1816_v19  ;;  %v1016_v52 = vmin.f32 %v7734_v51, 20.0 }
 0x237   :  { %v4899_v61 = vpop.eup %4898  ;;  %v3053_v21 = vadd.f32 1.0, %v3052_v42  ;;  %4902 = vlog2.f32 %v1895_v27  ;;  %v1193_v38 = vmul.f32 1.442695, %v1000_v10  ;;  %v1015_v37 = vmin.f32 %v7744_v11, 20.0 }
 0x238   :  { %v3039_v34 = vsel %vm7717_vm12, %v3036_v16, %v3033_v6  ;;  %v3060_v41 = vmul.f32 0.6931472, %v4895_v0  ;;  %v1809_v25 = vadd.f32 1.0, %v1808_v14  ;;  %4904 = vpow2.f32 %v1195_v29 }
 0x239   :  { %v7764_v44 = vsel %vm862_vm1, %v7487_v46, %v1822_v56  ;;  %v1811_v19 = vand.u32 2147483647, %v7656_v59  ;;  %4906 = vlog2.f32 %v1823_v7  ;;  %v7768_v42 = vadd.f32 %v5588_v26, %v542_v17  ;;  %v497_v56 = vpop.xlane.xlu0 %496 }
 0x23a   :  { %v3051_v27 = vmul.f32 0.6931472, %v4897_v12  ;;  %4908 = vlog2.f32 %v3076_v18  ;;  %v1807_v10 = vmul.f32 0.6931472, %v4899_v61  ;;  %v1225_v3 = vmul.f32 1.442695, %v1016_v52 }
 0x23b   :  { %vm7770_vm8 = vcmp.lt.f32.partialorder %v3064_v36, 0.0004427343  ;;  %v3079_v16 = vmul.f32 -0.5, %v7739_v31  ;;  %4910 = vpow2.f32 %v1193_v38  ;;  %v1223_v0 = vmul.f32 1.442695, %v1015_v37 }
 0x23c   :  { %v3063_v46 = vmul.f32 %v3062_v30, %v7648_v50  ;;  %v3054_v6 = vmul.f32 %v3053_v21, %v7654_v49  ;;  %v3094_v14 = vadd.f32 1.0, %v7764_v44  ;;  %v1810_v29 = vmul.f32 %v7656_v59, %v1809_v25 }
 0x23d   :  { %v4151_v12 = vrot.slane %v3039_v34, %v5658_v23  ;;  %vm7780_vm0 = vcmp.lt.f32.partialorder %v3055_v1, 0.0004427343  ;;  %vm7784_vm5 = vcmp.lt.f32.partialorder %v1811_v19, 0.0004427343  ;;  %v1017_v7 = vmin.f32 %v7768_v42, 20.0  ;;  %v10787_v19 = vld [vmem:[#allocation7_spill] sm:$0xff] }
 0x23e   :  { %v3066_v50 = vsel %vm7770_vm8, %v3063_v46, %v3060_v41  ;;  %v3057_v49 = vsel %vm7780_vm0, %v3054_v6, %v3051_v27  ;;  %v1813_v59 = vsel %vm7784_vm5, %v1810_v29, %v1807_v10  ;;  %4912 = vpow2.f32 %v1225_v3  ;;  %v10788_v10 = vld [vmem:[#allocation6_spill] sm:$0xff] }
 0x23f   :  { %v3080_v30 = vadd.f32 1.0, %v3079_v16  ;;  %v3070_v1 = vmul.f32 -0.5, %v7710_v32  ;;  %v1898_v18 = vmul.f32 -0.5, %v7715_v39  ;;  %4914 = vpow2.f32 %v1223_v0 }
 0x240   :  { %v4901_v52 = vpop.eup %4900  ;;  %v3073_v17 = vand.u32 2147483647, %v7710_v32  ;;  %4916 = vlog2.f32 %v3094_v14  ;;  %vm861_vm2 = vcmp.gt.f32.partialorder %v7535_v43, 20.0  ;;  %v1826_v61 = vmul.f32 -0.5, %v7729_v2 }
 0x241   :  { %v4903_v21 = vpop.eup %4902  ;;  %v7803_v38 = vsel %vm10535_vm3, %v7698_v35, %v7691_v55  ;;  %vm10786_vm10 = vcmask 130112   ;;  %v7808_v34 = vsel %vm861_vm2, %v7535_v43, %v1813_v59  ;;  %v1227_v41 = vmul.f32 1.442695, %v1017_v7  ;;  %v587_v55 = vpop.xlane.xlu1 %586 }
 0x242   :  { %v4156_v37 = vsel %vm10786_vm10, %v7703_v8, %v4151_v12  ;;  %v7810_v25 = vpop.eup %4904  ;;  %v4165_v27 = vrot.slane %v3066_v50, %v10787_v19  ;;  %v4160_v3 = vrot.slane %v3057_v49, %v10788_v10  ;;  %v3082_v58 = vand.u32 2147483647, %v7739_v31 }
 0x243   :  { %v7816_v16 = vadd.f32 %v5588_v26, %v497_v56  ;;  %v4907_v35 = vpop.eup %4906  ;;  %v7819_v0 = vmul.f32 %v3080_v30, %v7739_v31  ;;  %v3071_v8 = vadd.f32 1.0, %v3070_v1  ;;  %vm871_vm12 = vcmp.gt.f32.partialorder %v7593_v4, 20.0 }
 0x244   :  { %v1899_v43 = vadd.f32 1.0, %v1898_v18  ;;  %v1901_v46 = vand.u32 2147483647, %v7715_v39  ;;  %v4909_v6 = vpop.eup %4908  ;;  %vm7823_vm1 = vcmp.lt.f32.partialorder %v3073_v17, 0.0004427343  ;;  %v3085_v29 = vadd.f32 1.0, %v7808_v34 }
 0x245   :  { %vm863_vm9 = vcmp.gt.f32.partialorder %v7600_v53, 20.0  ;;  %v1827_v12 = vadd.f32 1.0, %v1826_v61  ;;  %v1829_v5 = vand.u32 2147483647, %v7729_v2  ;;  %v7830_v31 = vpop.eup %4910  ;;  %v1897_v36 = vmul.f32 0.6931472, %v4903_v21 }
 0x246   :  { %v1913_v7 = vadd.f32 1.0, %v7810_v25  ;;  %4918 = vpow2.f32 %v1227_v41  ;;  %v7834_v50 = vadd.f32 %v5588_v26, %v587_v55  ;;  %v3069_v49 = vmul.f32 0.6931472, %v4901_v52 }
 0x247   :  { %v3097_v59 = vmul.f32 -0.5, %v7764_v44  ;;  %v1825_v30 = vmul.f32 0.6931472, %v4907_v35  ;;  %v1002_v1 = vmin.f32 %v7816_v16, 20.0  ;;  %vm4543_vm8 = vcmask 1041409  }
 0x248   :  { %v3072_v18 = vmul.f32 %v3071_v8, %v7710_v32  ;;  %v3100_v56 = vand.u32 2147483647, %v7764_v44  ;;  %v1900_v17 = vmul.f32 %v7715_v39, %v1899_v43  ;;  %vm7841_vm0 = vcmp.lt.f32.partialorder %v1901_v46, 0.0004427343  ;;  %v7845_v21 = vpop.eup %4912 }
 0x249   :  { %v3078_v41 = vmul.f32 0.6931472, %v4909_v6  ;;  %4920 = vlog2.f32 %v3085_v29  ;;  %v1828_v52 = vmul.f32 %v7729_v2, %v1827_v12  ;;  %v1904_v55 = vadd.f32 1.0, %v7830_v31  ;;  %v7849_v35 = vpop.eup %4914 }
 0x24a   :  { %v1903_v32 = vsel %vm7841_vm0, %v1900_v17, %v1897_v36  ;;  %vm7853_vm5 = vcmp.lt.f32.partialorder %v1829_v5, 0.0004427343  ;;  %4922 = vlog2.f32 %v1913_v7  ;;  %v1032_v39 = vmin.f32 %v7834_v50, 20.0  ;;  %v4917_v43 = vpop.eup %4916 }
 0x24b   :  { %v3075_v46 = vsel %vm7823_vm1, %v3072_v18, %v3069_v49  ;;  %v3098_v6 = vadd.f32 1.0, %v3097_v59  ;;  %v1831_v2 = vsel %vm7853_vm5, %v1828_v52, %v1825_v30  ;;  %v1197_v29 = vmul.f32 1.442695, %v1002_v1 }
 0x24c   :  { %vm10795_vm2 = vcmask 195712   ;;  %vm7863_vm10 = vcmp.lt.f32.partialorder %v3082_v58, 0.0004427343  ;;  %v3088_v5 = vmul.f32 -0.5, %v7808_v34  ;;  %v2048_v7 = vadd.f32 1.0, %v7845_v21 }
 0x24d   :  { %v4161_v12 = vsel %vm10795_vm2, %v4160_v3, %v4156_v37  ;;  %v3084_v14 = vsel %vm7863_vm10, %v7819_v0, %v3078_v41  ;;  %v7875_v49 = vsel %vm871_vm12, %v7593_v4, %v1903_v32  ;;  %4924 = vlog2.f32 %v1904_v55  ;;  %v10801_v55 = vld [vmem:[#allocation15_spill] sm:$0xff] }
 0x24e   :  { %v2039_v37 = vadd.f32 1.0, %v7849_v35  ;;  %v4170_v3 = vrot.slane %v3075_v46, %v5685_v40  ;;  %v3096_v58 = vmul.f32 0.6931472, %v4917_v43  ;;  %v7882_v59 = vsel %vm863_vm9, %v7600_v53, %v1831_v2  ;;  %v584_v53 = vpop.xlane.xlu0 %583 }
 0x24f   :  { %v1257_v30 = vmul.f32 1.442695, %v1032_v39  ;;  %v4166_v1 = vsel %vm3904_vm11, %v4165_v27, %v4161_v12  ;;  %v3099_v0 = vmul.f32 %v3098_v6, %v7764_v44  ;;  %vm7886_vm1 = vcmp.lt.f32.partialorder %v3100_v56, 0.0004427343  ;;  %v10800_v56 = vld [vmem:[#allocation16_spill] sm:$0xff] }
 0x250   :  { %4926 = vpow2.f32 %v1197_v29  ;;  %v7890_v4 = vpop.eup %4918  ;;  %v3089_v17 = vadd.f32 1.0, %v3088_v5  ;;  %v3091_v61 = vand.u32 2147483647, %v7808_v34  ;;  %v3175_v41 = vadd.f32 1.0, %v7875_v49 }
 0x251   :  { %4928 = vlog2.f32 %v2048_v7  ;;  %v4175_v52 = vrot.slane %v3084_v14, %v5675_v33  ;;  %v3103_v27 = vadd.f32 1.0, %v7882_v59  ;;  %v1916_v44 = vmul.f32 -0.5, %v7810_v25 }
 0x252   :  { %4930 = vlog2.f32 %v2039_v37  ;;  %v3989_v32 = vsel %vm10528_vm7, %v10801_v55, %v10800_v56  ;;  %v4171_v8 = vsel %vm3911_vm13, %v4170_v3, %v4166_v1  ;;  %v3102_v39 = vsel %vm7886_vm1, %v3099_v0, %v3096_v58  ;;  %v545_v3 = vpop.xlane.xlu1 %544 }
 0x253   :  { %4932 = vpow2.f32 %v1257_v30  ;;  %v4921_v43 = vpop.eup %4920  ;;  %v7905_v46 = vsel %vm4543_vm8, %v7454_v22, %v3989_v32  ;;  %v1907_v6 = vmul.f32 -0.5, %v7830_v31  ;;  %v2057_v2 = vadd.f32 1.0, %v7890_v4 }
 0x254   :  { %10802 = vst [vmem:[#allocation8_spill] sm:$0xff] %v7905_v46  ;;  %v7910_v29 = vadd.f32 %v5588_v26, %v584_v53  ;;  %v4923_v12 = vpop.eup %4922  ;;  %v7915_v36 = vsel %vm10528_vm7, %v7695_v13, %v7803_v38  ;;  %v3090_v5 = vmul.f32 %v3089_v17, %v7808_v34  ;;  %vm7918_vm12 = vcmp.lt.f32.partialorder %v3091_v61, 0.0004427343 }
 0x255   :  { %10803 = vst [vmem:[#allocation7_spill] sm:$0xff] %v7915_v36  ;;  %4934 = vlog2.f32 %v3175_v41  ;;  %v7923_v22 = vrot.slane %v3102_v39, %v5691_v45  ;;  %v7926_v14 = vsel %vm3918_vm15, %v4175_v52, %v4171_v8  ;;  %vm873_vm9 = vcmp.gt.f32.partialorder %v7687_v9, 20.0 }
 0x256   :  { %4936 = vlog2.f32 %v3103_v27  ;;  %v1917_v37 = vadd.f32 1.0, %v1916_v44  ;;  %v3087_v13 = vmul.f32 0.6931472, %v4921_v43  ;;  %v3178_v38 = vmul.f32 -0.5, %v7875_v49 }
 0x257   :  { %v3106_v34 = vmul.f32 -0.5, %v7882_v59  ;;  %v1919_v58 = vand.u32 2147483647, %v7810_v25  ;;  %v4925_v30 = vpop.eup %4924  ;;  %v1915_v1 = vmul.f32 0.6931472, %v4923_v12  ;;  %v1908_v0 = vadd.f32 1.0, %v1907_v6 }
 0x258   :  { %4938 = vlog2.f32 %v2057_v2  ;;  %v1031_v18 = vmin.f32 %v7910_v29, 20.0  ;;  %v3181_v17 = vand.u32 2147483647, %v7875_v49  ;;  %v3109_v61 = vand.u32 2147483647, %v7882_v59 }
 0x259   :  { %v2051_v41 = vmul.f32 -0.5, %v7845_v21  ;;  %v7937_v53 = vadd.f32 %v5588_v26, %v545_v3  ;;  %v1918_v27 = vmul.f32 %v7810_v25, %v1917_v37  ;;  %vm872_vm8 = vcmp.gt.f32.partialorder %v7713_v63, 20.0 }
 0x25a   :  { %v7939_v52 = vpop.eup %4926  ;;  %v1910_v44 = vand.u32 2147483647, %v7830_v31  ;;  %v2054_v56 = vand.u32 2147483647, %v7845_v21  ;;  %v2042_v55 = vmul.f32 -0.5, %v7849_v35  ;;  %v3093_v8 = vsel %vm7918_vm12, %v3090_v5, %v3087_v13 }
 0x25b   :  { %v4929_v32 = vpop.eup %4928  ;;  %v3179_v39 = vadd.f32 1.0, %v3178_v38  ;;  %vm7948_vm0 = vcmp.lt.f32.partialorder %v1919_v58, 0.0004427343  ;;  %v1906_v6 = vmul.f32 0.6931472, %v4925_v30  ;;  %v3107_v25 = vadd.f32 1.0, %v3106_v34  ;;  %v500_v58 = vpop.xlane.xlu0 %499 }
 0x25c   :  { %v4931_v2 = vpop.eup %4930  ;;  %v1921_v12 = vsel %vm7948_vm0, %v1918_v27, %v1915_v1  ;;  %v1909_v37 = vmul.f32 %v7830_v31, %v1908_v0  ;;  %v1255_v3 = vmul.f32 1.442695, %v1031_v18  ;;  %vm888_vm5 = vcmp.gt.f32.partialorder %v7734_v51, 20.0 }
 0x25d   :  { %v7955_v54 = vpop.eup %4932  ;;  %v2052_v7 = vadd.f32 1.0, %v2051_v41  ;;  %v2045_v5 = vand.u32 2147483647, %v7849_v35  ;;  %v1922_v13 = vadd.f32 1.0, %v7939_v52  ;;  %v1018_v38 = vmin.f32 %v7937_v53, 20.0 }
 0x25e   :  { %v4180_v34 = vrot.slane %v3093_v8, %v5694_v47  ;;  %vm7962_vm2 = vcmp.lt.f32.partialorder %v3181_v17, 0.0004427343  ;;  %vm7966_vm10 = vcmp.lt.f32.partialorder %v1910_v44, 0.0004427343  ;;  %vm7970_vm1 = vcmp.lt.f32.partialorder %v2054_v56, 0.0004427343 }
 0x25f   :  { %vm887_vm12 = vcmp.gt.f32.partialorder %v7744_v11, 20.0  ;;  %v2043_v0 = vadd.f32 1.0, %v2042_v55  ;;  %v4935_v18 = vpop.eup %4934  ;;  %vm7975_vm0 = vcmp.lt.f32.partialorder %v3109_v61, 0.0004427343  ;;  %v7982_v17 = vsel %vm873_vm9, %v7687_v9, %v1921_v12 }
 0x260   :  { %v1912_v27 = vsel %vm7966_vm10, %v1909_v37, %v1906_v6  ;;  %v2050_v44 = vmul.f32 0.6931472, %v4929_v32  ;;  %v2060_v56 = vmul.f32 -0.5, %v7890_v4  ;;  %v4937_v8 = vpop.eup %4936  ;;  %v2041_v43 = vmul.f32 0.6931472, %v4931_v2  ;;  %v632_v6 = vpop.xlane.xlu1 %631 }
 0x261   :  { %v2192_v55 = vadd.f32 1.0, %v7955_v54  ;;  %4940 = vpow2.f32 %v1255_v3  ;;  %v7989_v61 = vadd.f32 %v5588_v26, %v500_v58  ;;  %v2053_v62 = vmul.f32 %v7845_v21, %v2052_v7 }
 0x262   :  { %vm7992_vm7 = vcmp.lt.f32.partialorder %v2045_v5, 0.0004427343  ;;  %4942 = vlog2.f32 %v1922_v13  ;;  %v1229_v9 = vmul.f32 1.442695, %v1018_v38  ;;  %v4939_v32 = vpop.eup %4938  ;;  %v3177_v12 = vmul.f32 0.6931472, %v4935_v18 }
 0x263   :  { %v3193_v37 = vadd.f32 1.0, %v7982_v17  ;;  %v2044_v2 = vmul.f32 %v7849_v35, %v2043_v0  ;;  %v2063_v3 = vand.u32 2147483647, %v7890_v4  ;;  %v3105_v31 = vmul.f32 0.6931472, %v4937_v8 }
 0x264   :  { %v8002_v21 = vsel %vm872_vm8, %v7713_v63, %v1912_v27  ;;  %v2056_v7 = vsel %vm7970_vm1, %v2053_v62, %v2050_v44  ;;  %v2061_v5 = vadd.f32 1.0, %v2060_v56  ;;  %4944 = vlog2.f32 %v2192_v55 }
 0x265   :  { %v2047_v13 = vsel %vm7992_vm7, %v2044_v2, %v2041_v43  ;;  %v1003_v38 = vmin.f32 %v7989_v61, 20.0  ;;  %v8010_v35 = vadd.f32 %v5588_v26, %v632_v6  ;;  %v3180_v58 = vmul.f32 %v3179_v39, %v7875_v49 }
 0x266   :  { %v3108_v0 = vmul.f32 %v3107_v25, %v7882_v59  ;;  %v2059_v18 = vmul.f32 0.6931472, %v4939_v32  ;;  %4946 = vpow2.f32 %v1229_v9  ;;  %v4181_v63 = vsel %vm3925_vm6, %v4180_v34, %v7926_v14 }
 0x267   :  { %4948 = vlog2.f32 %v3193_v37  ;;  %v3184_v62 = vadd.f32 1.0, %v8002_v21  ;;  %v8020_v36 = vsel %vm888_vm5, %v7734_v51, %v2056_v7  ;;  %v3183_v1 = vsel %vm7962_vm2, %v3180_v58, %v3177_v12 }
 0x268   :  { %v8027_v49 = vsel %vm887_vm12, %v7744_v11, %v2047_v13  ;;  %v2062_v59 = vmul.f32 %v7890_v4, %v2061_v5  ;;  %vm8030_vm7 = vcmp.lt.f32.partialorder %v2063_v3, 0.0004427343  ;;  %v3111_v39 = vsel %vm7975_vm0, %v3108_v0, %v3105_v31  ;;  %v590_v31 = vpop.xlane.xlu0 %589 }
 0x269   :  { %v1925_v51 = vmul.f32 -0.5, %v7939_v52  ;;  %v1199_v25 = vmul.f32 1.442695, %v1003_v38  ;;  %v1047_v34 = vmin.f32 %v8010_v35, 20.0  ;;  %v3196_v30 = vmul.f32 -0.5, %v7982_v17 }
 0x26a   :  { %v3328_v27 = vadd.f32 1.0, %v8020_v36  ;;  %vm889_vm9 = vcmp.gt.f32.partialorder %v7768_v42, 20.0  ;;  %v2065_v11 = vsel %vm8030_vm7, %v2062_v59, %v2059_v18  ;;  %v8047_v41 = vsel %vm3932_vm14, %v7923_v22, %v4181_v63 }
 0x26b   :  { %v8043_v4 = vpop.eup %4940  ;;  %v3199_v44 = vand.u32 2147483647, %v7982_v17  ;;  %4950 = vlog2.f32 %v3184_v62  ;;  %v3319_v56 = vadd.f32 1.0, %v8027_v49  ;;  %v8052_v43 = vrot.slane %v3183_v1, %v5658_v23 }
 0x26c   :  { %v4943_v8 = vpop.eup %4942  ;;  %v8055_v55 = vrot.slane %v3111_v39, %v5705_v57  ;;  %v3187_v9 = vmul.f32 -0.5, %v8002_v21  ;;  %v2195_v6 = vmul.f32 -0.5, %v7955_v54  ;;  %v8060_v32 = vsel %vm889_vm9, %v7768_v42, %v2065_v11 }
 0x26d   :  { %vm874_vm8 = vcmp.gt.f32.partialorder %v7816_v16, 20.0  ;;  %v1926_v22 = vadd.f32 1.0, %v1925_v51  ;;  %4952 = vpow2.f32 %v1199_v25  ;;  %v1287_v12 = vmul.f32 1.442695, %v1047_v34  ;;  %v503_v34 = vpop.xlane.xlu1 %502 }
 0x26e   :  { %v3197_v37 = vadd.f32 1.0, %v3196_v30  ;;  %4954 = vlog2.f32 %v3328_v27  ;;  %v1928_v2 = vand.u32 2147483647, %v7939_v52  ;;  %v2183_v3 = vadd.f32 1.0, %v8043_v4  ;;  %v4945_v7 = vpop.eup %4944 }
 0x26f   :  { %vm8065_vm5 = vcmp.lt.f32.partialorder %v3199_v44, 0.0004427343  ;;  %v3331_v42 = vmul.f32 -0.5, %v8020_v36  ;;  %4956 = vlog2.f32 %v3319_v56  ;;  %v1924_v13 = vmul.f32 0.6931472, %v4943_v8 }
 0x270   :  { %v8070_v38 = vpop.eup %4946  ;;  %v3190_v58 = vand.u32 2147483647, %v8002_v21  ;;  %v3334_v0 = vand.u32 2147483647, %v8020_v36  ;;  %v3337_v18 = vadd.f32 1.0, %v8060_v32  ;;  %vm904_vm2 = vcmp.gt.f32.partialorder %v7834_v50, 20.0 }
 0x271   :  { %v2196_v63 = vadd.f32 1.0, %v2195_v6  ;;  %v4949_v62 = vpop.eup %4948  ;;  %v3188_v1 = vadd.f32 1.0, %v3187_v9  ;;  %v1927_v59 = vmul.f32 %v7939_v52, %v1926_v22  ;;  %v2198_v14 = vand.u32 2147483647, %v7955_v54  ;;  %v635_v9 = vpop.xlane.xlu0 %634 }
 0x272   :  { %4958 = vpow2.f32 %v1287_v12  ;;  %v3322_v39 = vmul.f32 -0.5, %v8027_v49  ;;  %vm8079_vm10 = vcmp.lt.f32.partialorder %v1928_v2, 0.0004427343  ;;  %v2194_v25 = vmul.f32 0.6931472, %v4945_v7 }
 0x273   :  { %4960 = vlog2.f32 %v2183_v3  ;;  %v3332_v30 = vadd.f32 1.0, %v3331_v42  ;;  %v1930_v27 = vsel %vm8079_vm10, %v1927_v59, %v1924_v13  ;;  %v2066_v11 = vadd.f32 1.0, %v8070_v38 }
 0x274   :  { %v8087_v52 = vadd.f32 %v5588_v26, %v590_v31  ;;  %v3195_v44 = vmul.f32 0.6931472, %v4949_v62  ;;  %v3325_v56 = vand.u32 2147483647, %v8027_v49  ;;  %4962 = vlog2.f32 %v3337_v18 }
 0x275   :  { %v2197_v8 = vmul.f32 %v7955_v54, %v2196_v63  ;;  %v4951_v6 = vpop.eup %4950  ;;  %v3198_v22 = vmul.f32 %v3197_v37, %v7982_v17  ;;  %vm8092_vm1 = vcmp.lt.f32.partialorder %v3190_v58, 0.0004427343  ;;  %vm8096_vm12 = vcmp.lt.f32.partialorder %v2198_v14, 0.0004427343 }
 0x276   :  { %v8101_v3 = vadd.f32 %v5588_v26, %v503_v34  ;;  %v3323_v31 = vadd.f32 1.0, %v3322_v39  ;;  %v3340_v7 = vmul.f32 -0.5, %v8060_v32  ;;  %v8107_v54 = vsel %vm874_vm8, %v7816_v16, %v1930_v27 }
 0x277   :  { %v2200_v17 = vsel %vm8096_vm12, %v2197_v8, %v2194_v25  ;;  %v8111_v37 = vpop.eup %4952  ;;  %v3189_v42 = vmul.f32 %v3188_v1, %v8002_v21  ;;  %vm8114_vm0 = vcmp.lt.f32.partialorder %v3334_v0, 0.0004427343  ;;  %4964 = vlog2.f32 %v2066_v11  ;;  %v593_v21 = vpop.xlane.xlu1 %592 }
 0x278   :  { %v1033_v58 = vmin.f32 %v8087_v52, 20.0  ;;  %v8120_v18 = vadd.f32 %v5588_v26, %v635_v9  ;;  %v4955_v63 = vpop.eup %4954  ;;  %v3201_v16 = vsel %vm8065_vm5, %v3198_v22, %v3195_v44  ;;  %v3186_v62 = vmul.f32 0.6931472, %v4951_v6 }
 0x279   :  { %v3333_v59 = vmul.f32 %v3332_v30, %v8020_v36  ;;  %vm8125_vm7 = vcmp.lt.f32.partialorder %v3325_v56, 0.0004427343  ;;  %v4957_v0 = vpop.eup %4956  ;;  %v3202_v1 = vadd.f32 1.0, %v8107_v54  ;;  %v8133_v39 = vsel %vm904_vm2, %v7834_v50, %v2200_v17 }
 0x27a   :  { %v2186_v51 = vmul.f32 -0.5, %v8043_v4  ;;  %v1004_v5 = vmin.f32 %v8101_v3, 20.0  ;;  %v3324_v25 = vmul.f32 %v3323_v31, %v8027_v49  ;;  %v3341_v36 = vadd.f32 1.0, %v3340_v7 }
 0x27b   :  { %v3343_v34 = vand.u32 2147483647, %v8060_v32  ;;  %v1931_v30 = vadd.f32 1.0, %v8111_v37  ;;  %v4239_v11 = vrot.slane %v3201_v16, %v10788_v10  ;;  %v1259_v44 = vmul.f32 1.442695, %v1033_v58 }
 0x27c   :  { %v8140_v27 = vpop.eup %4958  ;;  %v1048_v56 = vmin.f32 %v8120_v18, 20.0  ;;  %v8145_v50 = vadd.f32 %v5588_v26, %v593_v21  ;;  %v3192_v9 = vsel %vm8092_vm1, %v3189_v42, %v3186_v62  ;;  %v3330_v49 = vmul.f32 0.6931472, %v4955_v63  ;;  %v548_v21 = vpop.xlane.xlu0 %547 }
 0x27d   :  { %v4961_v8 = vpop.eup %4960  ;;  %v3321_v6 = vmul.f32 0.6931472, %v4957_v0  ;;  %v3472_v22 = vadd.f32 1.0, %v8133_v39  ;;  %4966 = vlog2.f32 %v3202_v1  ;;  %vm903_vm9 = vcmp.gt.f32.partialorder %v7910_v29, 20.0 }
 0x27e   :  { %v2187_v2 = vadd.f32 1.0, %v2186_v51  ;;  %v2189_v31 = vand.u32 2147483647, %v8043_v4  ;;  %v1201_v7 = vmul.f32 1.442695, %v1004_v5  ;;  %v4963_v17 = vpop.eup %4962  ;;  %v2069_v16 = vmul.f32 -0.5, %v8070_v38  ;;  %v506_v5 = vpop.xlane.xlu1 %505 }
 0x27f   :  { %vm8152_vm8 = vcmp.lt.f32.partialorder %v3343_v34, 0.0004427343  ;;  %4968 = vlog2.f32 %v1931_v30  ;;  %v2327_v12 = vadd.f32 1.0, %v8140_v27  ;;  %v2185_v42 = vmul.f32 0.6931472, %v4961_v8 }
 0x280   :  { %4970 = vpow2.f32 %v1259_v44  ;;  %v1289_v63 = vmul.f32 1.442695, %v1048_v56  ;;  %v1034_v62 = vmin.f32 %v8145_v50, 20.0  ;;  %v4234_v0 = vrot.slane %v3192_v9, %v10709_v20 }
 0x281   :  { %v3336_v1 = vsel %vm8114_vm0, %v3333_v59, %v3330_v49  ;;  %v3327_v51 = vsel %vm8125_vm7, %v3324_v25, %v3321_v6  ;;  %4972 = vlog2.f32 %v3472_v22  ;;  %v4965_v34 = vpop.eup %4964  ;;  %v3339_v30 = vmul.f32 0.6931472, %v4963_v17 }
 0x282   :  { %v2188_v46 = vmul.f32 %v8043_v4, %v2187_v2  ;;  %vm8165_vm5 = vcmp.lt.f32.partialorder %v2189_v31, 0.0004427343  ;;  %4974 = vpow2.f32 %v1201_v7  ;;  %v2070_v56 = vadd.f32 1.0, %v2069_v16 }
 0x283   :  { %v2072_v8 = vand.u32 2147483647, %v8070_v38  ;;  %4976 = vlog2.f32 %v2327_v12  ;;  %v8171_v13 = vadd.f32 %v5588_v26, %v548_v21  ;;  %v1261_v14 = vmul.f32 1.442695, %v1034_v62 }
 0x284   :  { %v2191_v59 = vsel %vm8165_vm5, %v2188_v46, %v2185_v42  ;;  %4978 = vpow2.f32 %v1289_v63  ;;  %v8176_v25 = vadd.f32 %v5588_v26, %v506_v5  ;;  %v3342_v4 = vmul.f32 %v3341_v36, %v8060_v32 }
 0x285   :  { %v3205_v9 = vmul.f32 -0.5, %v8107_v54  ;;  %vm890_vm2 = vcmp.gt.f32.partialorder %v7937_v53, 20.0  ;;  %v2068_v49 = vmul.f32 0.6931472, %v4965_v34  ;;  %vm10836_vm10 = vcmask 130112  }
 0x286   :  { %v4235_v6 = vsel %vm10836_vm10, %v4234_v0, %v8052_v43  ;;  %v8184_v22 = vrot.slane %v3336_v1, %v10709_v20  ;;  %v8187_v46 = vrot.slane %v3327_v51, %v5658_v23  ;;  %v1934_v2 = vmul.f32 -0.5, %v8111_v37  ;;  %v638_v43 = vpop.xlane.xlu0 %637 }
 0x287   :  { %v3208_v31 = vand.u32 2147483647, %v8107_v54  ;;  %v8194_v32 = vsel %vm903_vm9, %v7910_v29, %v2191_v59  ;;  %v2071_v36 = vmul.f32 %v8070_v38, %v2070_v56  ;;  %v1019_v7 = vmin.f32 %v8171_v13, 20.0  ;;  %v4967_v17 = vpop.eup %4966 }
 0x288   :  { %v3345_v16 = vsel %vm8152_vm8, %v3342_v4, %v3339_v30  ;;  %vm8200_vm1 = vcmp.lt.f32.partialorder %v2072_v8, 0.0004427343  ;;  %4980 = vpow2.f32 %v1261_v14  ;;  %v1005_v42 = vmin.f32 %v8176_v25, 20.0 }
 0x289   :  { %v4969_v63 = vpop.eup %4968  ;;  %vm10839_vm12 = vcmask 195712   ;;  %v3206_v62 = vadd.f32 1.0, %v3205_v9  ;;  %v3475_v38 = vmul.f32 -0.5, %v8133_v39  ;;  %v2074_v21 = vsel %vm8200_vm1, %v2071_v36, %v2068_v49 }
 0x28a   :  { %v8206_v29 = vsel %vm10839_vm12, %v4239_v11, %v4235_v6  ;;  %v8211_v0 = vpop.eup %4970  ;;  %v3463_v58 = vadd.f32 1.0, %v8194_v32  ;;  %vm875_vm0 = vcmp.gt.f32.partialorder %v7989_v61, 20.0  ;;  %v1935_v1 = vadd.f32 1.0, %v1934_v2 }
 0x28b   :  { %v2330_v51 = vmul.f32 -0.5, %v8140_v27  ;;  %v8217_v5 = vadd.f32 %v5588_v26, %v638_v43  ;;  %v4973_v11 = vpop.eup %4972  ;;  %v4318_v34 = vrot.slane %v3345_v16, %v10788_v10  ;;  %vm8220_vm7 = vcmp.lt.f32.partialorder %v3208_v31, 0.0004427343 }
 0x28c   :  { %v1937_v44 = vand.u32 2147483647, %v8111_v37  ;;  %v1231_v56 = vmul.f32 1.442695, %v1019_v7  ;;  %v8225_v8 = vpop.eup %4974  ;;  %v3478_v59 = vand.u32 2147483647, %v8133_v39  ;;  %v8231_v14 = vsel %vm890_vm2, %v7937_v53, %v2074_v21 }
 0x28d   :  { %v1933_v4 = vmul.f32 0.6931472, %v4969_v63  ;;  %v1203_v9 = vmul.f32 1.442695, %v1005_v42  ;;  %v4977_v49 = vpop.eup %4976  ;;  %v3204_v6 = vmul.f32 0.6931472, %v4967_v17  ;;  %4982 = vlog2.f32 %v3463_v58 }
 0x28e   :  { %v3476_v2 = vadd.f32 1.0, %v3475_v38  ;;  %v2333_v31 = vand.u32 2147483647, %v8140_v27  ;;  %v2201_v36 = vadd.f32 1.0, %v8211_v0  ;;  %v8235_v43 = vpop.eup %4978  ;;  %v1936_v7 = vmul.f32 %v8111_v37, %v1935_v1 }
 0x28f   :  { %vm919_vm9 = vcmp.gt.f32.partialorder %v8010_v35, 20.0  ;;  %v2331_v16 = vadd.f32 1.0, %v2330_v51  ;;  %v1049_v53 = vmin.f32 %v8217_v5, 20.0  ;;  %v3207_v12 = vmul.f32 %v3206_v62, %v8107_v54 }
 0x290   :  { %v3346_v42 = vadd.f32 1.0, %v8231_v14  ;;  %vm8242_vm8 = vcmp.lt.f32.partialorder %v1937_v44, 0.0004427343  ;;  %4984 = vpow2.f32 %v1231_v56  ;;  %v2329_v38 = vmul.f32 0.6931472, %v4977_v49 }
 0x291   :  { %v1939_v63 = vsel %vm8242_vm8, %v1936_v7, %v1933_v4  ;;  %v1940_v37 = vadd.f32 1.0, %v8225_v8  ;;  %4986 = vpow2.f32 %v1203_v9  ;;  %v3210_v21 = vsel %vm8220_vm7, %v3207_v12, %v3204_v6 }
 0x292   :  { %v3474_v58 = vmul.f32 0.6931472, %v4973_v11  ;;  %4988 = vlog2.f32 %v2201_v36  ;;  %v2336_v54 = vadd.f32 1.0, %v8235_v43  ;;  %v8252_v62 = vpop.eup %4980  ;;  %v3477_v1 = vmul.f32 %v3476_v2, %v8133_v39 }
 0x293   :  { %v2332_v51 = vmul.f32 %v8140_v27, %v2331_v16  ;;  %vm8256_vm5 = vcmp.lt.f32.partialorder %v2333_v31, 0.0004427343  ;;  %v1291_v56 = vmul.f32 1.442695, %v1049_v53  ;;  %v3466_v4 = vmul.f32 -0.5, %v8194_v32 }
 0x294   :  { %4990 = vlog2.f32 %v3346_v42  ;;  %v3349_v30 = vmul.f32 -0.5, %v8231_v14  ;;  %v8265_v11 = vsel %vm875_vm0, %v7989_v61, %v1939_v63  ;;  %v4244_v9 = vrot.slane %v3210_v21, %v10787_v19 }
 0x295   :  { %vm8268_vm2 = vcmp.lt.f32.partialorder %v3478_v59, 0.0004427343  ;;  %v2335_v27 = vsel %vm8256_vm5, %v2332_v51, %v2329_v38  ;;  %4992 = vlog2.f32 %v1940_v37  ;;  %v2204_v6 = vmul.f32 -0.5, %v8211_v0 }
 0x296   :  { %v3480_v49 = vsel %vm8268_vm2, %v3477_v1, %v3474_v58  ;;  %4994 = vlog2.f32 %v2336_v54  ;;  %v2210_v2 = vadd.f32 1.0, %v8252_v62  ;;  %v3469_v61 = vand.u32 2147483647, %v8194_v32 }
 0x297   :  { %v3211_v31 = vadd.f32 1.0, %v8265_v11  ;;  %v3214_v59 = vmul.f32 -0.5, %v8265_v11  ;;  %4996 = vpow2.f32 %v1291_v56  ;;  %v4314_v36 = vsel %vm10836_vm10, %v8184_v22, %v8187_v46  ;;  %v4983_v12 = vpop.eup %4982 }
 0x298   :  { %v3467_v7 = vadd.f32 1.0, %v3466_v4  ;;  %v3350_v16 = vadd.f32 1.0, %v3349_v30  ;;  %v8287_v53 = vsel %vm919_vm9, %v8010_v35, %v2335_v27  ;;  %vm10848_vm1 = vcmask 589312  }
 0x299   :  { %v8292_v42 = vsel %vm10848_vm1, %v8055_v55, %v8047_v41  ;;  %v8295_v17 = vsel %vm10839_vm12, %v4318_v34, %v4314_v36  ;;  %v8299_v63 = vsel %vm3904_vm11, %v4244_v9, %v8206_v29  ;;  %v8302_v22 = vrot.slane %v3480_v49, %v10709_v20  ;;  %v596_v41 = vpop.xlane.xlu1 %595  ;;  %v551_v36 = vpop.xlane.xlu0 %550 }
 0x29a   :  { %v8304_v46 = vpop.eup %4984  ;;  %v3352_v35 = vand.u32 2147483647, %v8231_v14  ;;  %v2205_v38 = vadd.f32 1.0, %v2204_v6  ;;  %v2207_v37 = vand.u32 2147483647, %v8211_v0  ;;  %4998 = vlog2.f32 %v2210_v2 }
 0x29b   :  { %v8308_v55 = vpop.eup %4986  ;;  %vm8310_vm0 = vcmp.lt.f32.partialorder %v3469_v61, 0.0004427343  ;;  %5000 = vlog2.f32 %v3211_v31  ;;  %v3215_v29 = vadd.f32 1.0, %v3214_v59  ;;  %v3607_v21 = vadd.f32 1.0, %v8287_v53 }
 0x29c   :  { %v4989_v58 = vpop.eup %4988  ;;  %v3468_v54 = vmul.f32 %v3467_v7, %v8194_v32  ;;  %v8317_v1 = vmul.f32 %v3350_v16, %v8231_v14  ;;  %v3610_v51 = vmul.f32 -0.5, %v8287_v53  ;;  %v1943_v44 = vmul.f32 -0.5, %v8225_v8 }
 0x29d   :  { %v3217_v56 = vand.u32 2147483647, %v8265_v11  ;;  %vm905_vm7 = vcmp.gt.f32.partialorder %v8087_v52, 20.0  ;;  %v2339_v4 = vmul.f32 -0.5, %v8235_v43  ;;  %v2075_v30 = vadd.f32 1.0, %v8304_v46 }
 0x29e   :  { %v8326_v9 = vadd.f32 %v5588_v26, %v596_v41  ;;  %v4991_v39 = vpop.eup %4990  ;;  %vm8328_vm9 = vcmp.lt.f32.partialorder %v3352_v35, 0.0004427343  ;;  %v3613_v14 = vand.u32 2147483647, %v8287_v53  ;;  %v2206_v27 = vmul.f32 %v8211_v0, %v2205_v38 }
 0x29f   :  { %vm8334_vm8 = vcmp.lt.f32.partialorder %v2207_v37, 0.0004427343  ;;  %v1949_v6 = vadd.f32 1.0, %v8308_v55  ;;  %v4993_v2 = vpop.eup %4992  ;;  %v3465_v61 = vmul.f32 0.6931472, %v4983_v12  ;;  %v8340_v31 = vmul.f32 %v3215_v29, %v8265_v11  ;;  %v509_v37 = vpop.xlane.xlu1 %508 }
 0x2a0   :  { %5002 = vlog2.f32 %v3607_v21  ;;  %v2203_v59 = vmul.f32 0.6931472, %v4989_v58  ;;  %v4995_v7 = vpop.eup %4994  ;;  %v3611_v16 = vadd.f32 1.0, %v3610_v51  ;;  %vm876_vm5 = vcmp.gt.f32.partialorder %v8101_v3, 20.0 }
 0x2a1   :  { %v1944_v35 = vadd.f32 1.0, %v1943_v44  ;;  %v1946_v0 = vand.u32 2147483647, %v8225_v8  ;;  %v2213_v38 = vmul.f32 -0.5, %v8252_v62  ;;  %v8345_v41 = vpop.eup %4996  ;;  %vm920_vm2 = vcmp.gt.f32.partialorder %v8120_v18, 20.0 }
 0x2a2   :  { %v2340_v12 = vadd.f32 1.0, %v2339_v4  ;;  %v2342_v11 = vand.u32 2147483647, %v8235_v43  ;;  %5004 = vlog2.f32 %v2075_v30  ;;  %v1035_v29 = vmin.f32 %v8326_v9, 20.0 }
 0x2a3   :  { %v3348_v21 = vmul.f32 0.6931472, %v4991_v39  ;;  %v1942_v58 = vmul.f32 0.6931472, %v4993_v2  ;;  %5006 = vlog2.f32 %v1949_v6  ;;  %v8351_v51 = vadd.f32 %v5588_v26, %v551_v36 }
 0x2a4   :  { %v3471_v44 = vsel %vm8310_vm0, %v3468_v54, %v3465_v61  ;;  %vm8355_vm10 = vcmp.lt.f32.partialorder %v3217_v56, 0.0004427343  ;;  %v2209_v4 = vsel %vm8334_vm8, %v2206_v27, %v2203_v59  ;;  %v2338_v28 = vmul.f32 0.6931472, %v4995_v7  ;;  %v4999_v39 = vpop.eup %4998 }
 0x2a5   :  { %v8362_v30 = vadd.f32 %v5588_v26, %v509_v37  ;;  %v1945_v6 = vmul.f32 %v8225_v8, %v1944_v35  ;;  %vm8365_vm1 = vcmp.lt.f32.partialorder %v1946_v0, 0.0004427343  ;;  %v2214_v34 = vadd.f32 1.0, %v2213_v38  ;;  %v5001_v56 = vpop.eup %5000 }
 0x2a6   :  { %v2345_v54 = vadd.f32 1.0, %v8345_v41  ;;  %v2341_v61 = vmul.f32 %v8235_v43, %v2340_v12  ;;  %vm8371_vm12 = vcmp.lt.f32.partialorder %v2342_v11, 0.0004427343  ;;  %vm906_vm0 = vcmp.gt.f32.partialorder %v8145_v50, 20.0 }
 0x2a7   :  { %v2216_v27 = vand.u32 2147483647, %v8252_v62  ;;  %v1263_v59 = vmul.f32 1.442695, %v1035_v29  ;;  %v4388_v8 = vrot.slane %v3471_v44, %v5658_v23  ;;  %v8381_v36 = vsel %vm905_vm7, %v8087_v52, %v2209_v4 }
 0x2a8   :  { %v1948_v7 = vsel %vm8365_vm1, %v1945_v6, %v1942_v58  ;;  %v1020_v43 = vmin.f32 %v8351_v51, 20.0  ;;  %v3354_v35 = vsel %vm8328_vm9, %v8317_v1, %v3348_v21  ;;  %v2344_v0 = vsel %vm8371_vm12, %v2341_v61, %v2338_v28  ;;  %v641_v6 = vpop.xlane.xlu0 %640 }
 0x2a9   :  { %v2212_v38 = vmul.f32 0.6931472, %v4999_v39  ;;  %v1006_v37 = vmin.f32 %v8362_v30, 20.0  ;;  %v3213_v12 = vmul.f32 0.6931472, %v5001_v56  ;;  %v2215_v11 = vmul.f32 %v8252_v62, %v2214_v34  ;;  %v599_v56 = vpop.xlane.xlu1 %598 }
 0x2aa   :  { %v2078_v52 = vmul.f32 -0.5, %v8304_v46  ;;  %5008 = vlog2.f32 %v2345_v54  ;;  %v5003_v29 = vpop.eup %5002  ;;  %v3481_v58 = vadd.f32 1.0, %v8381_v36  ;;  %v8398_v32 = vsel %vm876_vm5, %v8101_v3, %v1948_v7 }
 0x2ab   :  { %v1952_v1 = vmul.f32 -0.5, %v8308_v55  ;;  %5010 = vpow2.f32 %v1263_v59  ;;  %v8402_v28 = vmul.f32 %v3611_v16, %v8287_v53  ;;  %vm8404_vm7 = vcmp.lt.f32.partialorder %v3613_v14, 0.0004427343 }
 0x2ac   :  { %v8411_v62 = vsel %vm920_vm2, %v8120_v18, %v2344_v0  ;;  %vm8413_vm9 = vcmp.lt.f32.partialorder %v2216_v27, 0.0004427343  ;;  %v1233_v3 = vmul.f32 1.442695, %v1020_v43  ;;  %v5005_v4 = vpop.eup %5004  ;;  %vm10865_vm8 = vcmask 130112  }
 0x2ad   :  { %v8419_v39 = vsel %vm10865_vm8, %v8302_v22, %v4388_v8  ;;  %v4323_v53 = vrot.slane %v3354_v35, %v10787_v19  ;;  %v2218_v14 = vsel %vm8413_vm9, %v2215_v11, %v2212_v38  ;;  %v1205_v16 = vmul.f32 1.442695, %v1006_v37  ;;  %v5007_v2 = vpop.eup %5006  ;;  %v554_v11 = vpop.xlane.xlu0 %553 }
 0x2ae   :  { %v3219_v18 = vsel %vm8355_vm10, %v8340_v31, %v3213_v12  ;;  %v3484_v34 = vmul.f32 -0.5, %v8381_v36  ;;  %v3220_v54 = vadd.f32 1.0, %v8398_v32  ;;  %vm891_vm5 = vcmp.gt.f32.partialorder %v8171_v13, 20.0 }
 0x2af   :  { %v2079_v22 = vadd.f32 1.0, %v2078_v52  ;;  %5012 = vlog2.f32 %v3481_v58  ;;  %v3616_v61 = vadd.f32 1.0, %v8411_v62  ;;  %v2081_v49 = vand.u32 2147483647, %v8304_v46 }
 0x2b0   :  { %vm877_vm2 = vcmp.gt.f32.partialorder %v8176_v25, 20.0  ;;  %v1953_v27 = vadd.f32 1.0, %v1952_v1  ;;  %v8436_v24 = vsel %vm906_vm0, %v8145_v50, %v2218_v14  ;;  %v2077_v31 = vmul.f32 0.6931472, %v5005_v4  ;;  %v467_v1 = vpop.xlane.xlu1 %466 }
 0x2b1   :  { %v1955_v59 = vand.u32 2147483647, %v8308_v55  ;;  %5014 = vpow2.f32 %v1233_v3  ;;  %v8439_v8 = vmul.f32 0.6931472, %v5003_v29  ;;  %v1951_v7 = vmul.f32 0.6931472, %v5007_v2 }
 0x2b2   :  { %v2348_v43 = vmul.f32 -0.5, %v8345_v41  ;;  %5016 = vpow2.f32 %v1205_v16  ;;  %v8444_v35 = vsel %vm3904_vm11, %v4323_v53, %v8295_v17  ;;  %v3487_v0 = vand.u32 2147483647, %v8381_v36 }
 0x2b3   :  { %5018 = vlog2.f32 %v3220_v54  ;;  %v2080_v50 = vmul.f32 %v8304_v46, %v2079_v22  ;;  %v3490_v38 = vadd.f32 1.0, %v8436_v24  ;;  %vm8449_vm10 = vcmp.lt.f32.partialorder %v2081_v49, 0.0004427343 }
 0x2b4   :  { %5020 = vlog2.f32 %v3616_v61  ;;  %v1954_v12 = vmul.f32 %v8308_v55, %v1953_v27  ;;  %v5009_v52 = vpop.eup %5008  ;;  %v4249_v29 = vrot.slane %v3219_v18, %v5685_v40  ;;  %vm8457_vm1 = vcmp.lt.f32.partialorder %v1955_v59, 0.0004427343 }
 0x2b5   :  { %v2083_v17 = vsel %vm8449_vm10, %v2080_v50, %v2077_v31  ;;  %v8462_v46 = vadd.f32 %v5588_v26, %v641_v6  ;;  %v8464_v44 = vpop.eup %5010  ;;  %v3485_v3 = vadd.f32 1.0, %v3484_v34  ;;  %vm921_vm12 = vcmp.gt.f32.partialorder %v8217_v5, 20.0 }
 0x2b6   :  { %v1957_v4 = vsel %vm8457_vm1, %v1954_v12, %v1951_v7  ;;  %v2349_v53 = vadd.f32 1.0, %v2348_v43  ;;  %v3223_v14 = vmul.f32 -0.5, %v8398_v32  ;;  %v3226_v16 = vand.u32 2147483647, %v8398_v32  ;;  %v644_v7 = vpop.xlane.xlu0 %643  ;;  %v557_v12 = vpop.xlane.xlu1 %556 }
 0x2b7   :  { %v3619_v6 = vmul.f32 -0.5, %v8411_v62  ;;  %v2351_v2 = vand.u32 2147483647, %v8345_v41  ;;  %5022 = vlog2.f32 %v3490_v38  ;;  %v8480_v18 = vsel %vm891_vm5, %v8171_v13, %v2083_v17 }
 0x2b8   :  { %v2347_v34 = vmul.f32 0.6931472, %v5009_v52  ;;  %v8483_v54 = vadd.f32 %v5588_v26, %v599_v56  ;;  %v8488_v22 = vsel %vm877_vm2, %v8176_v25, %v1957_v4  ;;  %v2219_v61 = vadd.f32 1.0, %v8464_v44 }
 0x2b9   :  { %v1050_v49 = vmin.f32 %v8462_v46, 20.0  ;;  %v8493_v27 = vadd.f32 %v5588_v26, %v554_v11  ;;  %v5013_v31 = vpop.eup %5012  ;;  %v8497_v13 = vsel %vm3911_vm13, %v4249_v29, %v8299_v63  ;;  %v8500_v56 = vmul.f32 %v3485_v3, %v8381_v36 }
 0x2ba   :  { %v3622_v59 = vand.u32 2147483647, %v8411_v62  ;;  %v2350_v25 = vmul.f32 %v8345_v41, %v2349_v53  ;;  %vm8506_vm0 = vcmp.lt.f32.partialorder %v3487_v0, 0.0004427343  ;;  %v3224_v38 = vadd.f32 1.0, %v3223_v14 }
 0x2bb   :  { %v8504_v43 = vpop.eup %5014  ;;  %v3355_v37 = vadd.f32 1.0, %v8480_v18  ;;  %vm8511_vm9 = vcmp.lt.f32.partialorder %v2351_v2, 0.0004427343  ;;  %v8516_v36 = vadd.f32 %v5588_v26, %v467_v1  ;;  %vm8520_vm8 = vcmp.lt.f32.partialorder %v3226_v16, 0.0004427343 }
 0x2bc   :  { %v8518_v11 = vpop.eup %5016  ;;  %v3620_v0 = vadd.f32 1.0, %v3619_v6  ;;  %v3229_v52 = vadd.f32 1.0, %v8488_v22  ;;  %v2353_v29 = vsel %vm8511_vm9, %v2350_v25, %v2347_v34  ;;  %v1036_v17 = vmin.f32 %v8483_v54, 20.0 }
 0x2bd   :  { %v5019_v58 = vpop.eup %5018  ;;  %5024 = vlog2.f32 %v2219_v61  ;;  %v1293_v3 = vmul.f32 1.442695, %v1050_v49  ;;  %v1021_v1 = vmin.f32 %v8493_v27, 20.0  ;;  %v8530_v4 = vadd.f32 %v5588_v26, %v644_v7 }
 0x2be   :  { %v5021_v53 = vpop.eup %5020  ;;  %vm8532_vm5 = vcmp.lt.f32.partialorder %v3622_v59, 0.0004427343  ;;  %v3493_v16 = vmul.f32 -0.5, %v8436_v24  ;;  %v2084_v6 = vadd.f32 1.0, %v8504_v43  ;;  %v8539_v2 = vadd.f32 %v5588_v26, %v557_v12 }
 0x2bf   :  { %5026 = vlog2.f32 %v3355_v37  ;;  %v8544_v34 = vsel %vm921_vm12, %v8217_v5, %v2353_v29  ;;  %v1958_v61 = vadd.f32 1.0, %v8518_v11  ;;  %v992_v49 = vmin.f32 %v8516_v36, 20.0 }
 0x2c0   :  { %v3483_v59 = vmul.f32 0.6931472, %v5013_v31  ;;  %v3222_v25 = vmul.f32 0.6931472, %v5019_v58  ;;  %5028 = vlog2.f32 %v3229_v52  ;;  %v1265_v7 = vmul.f32 1.442695, %v1036_v17 }
 0x2c1   :  { %v3618_v63 = vmul.f32 0.6931472, %v5021_v53  ;;  %5030 = vpow2.f32 %v1293_v3  ;;  %v1235_v55 = vmul.f32 1.442695, %v1021_v1  ;;  %v1051_v12 = vmin.f32 %v8530_v4, 20.0  ;;  %v5023_v60 = vpop.eup %5022 }
 0x2c2   :  { %v3225_v37 = vmul.f32 %v3224_v38, %v8398_v32  ;;  %v3625_v15 = vadd.f32 1.0, %v8544_v34  ;;  %5032 = vlog2.f32 %v2084_v6  ;;  %v1022_v5 = vmin.f32 %v8539_v2, 20.0 }
 0x2c3   :  { %v3621_v29 = vmul.f32 %v3620_v0, %v8411_v62  ;;  %v3496_v31 = vand.u32 2147483647, %v8436_v24  ;;  %5034 = vlog2.f32 %v1958_v61  ;;  %v1177_v52 = vmul.f32 1.442695, %v992_v49 }
 0x2c4   :  { %v3489_v17 = vsel %vm8506_vm0, %v8500_v56, %v3483_v59  ;;  %v3494_v58 = vadd.f32 1.0, %v3493_v16  ;;  %v2222_v3 = vmul.f32 -0.5, %v8464_v44  ;;  %5036 = vpow2.f32 %v1265_v7 }
 0x2c5   :  { %v3228_v32 = vsel %vm8520_vm8, %v3225_v37, %v3222_v25  ;;  %v3624_v38 = vsel %vm8532_vm5, %v3621_v29, %v3618_v63  ;;  %5038 = vpow2.f32 %v1235_v55  ;;  %v1295_v62 = vmul.f32 1.442695, %v1051_v12 }
 0x2c6   :  { %v3492_v0 = vmul.f32 0.6931472, %v5023_v60  ;;  %v3358_v1 = vmul.f32 -0.5, %v8480_v18  ;;  %5040 = vlog2.f32 %v3625_v15  ;;  %v1237_v53 = vmul.f32 1.442695, %v1022_v5 }
 0x2c7   :  { %v5025_v6 = vpop.eup %5024  ;;  %v10878_v56 = vsel %vm8404_vm7, %v8402_v28, %v8439_v8  ;;  %v4397_v41 = vrot.slane %v3489_v17, %v10788_v10  ;;  %vm8570_vm2 = vcmp.lt.f32.partialorder %v3496_v31, 0.0004427343  ;;  %5042 = vpow2.f32 %v1177_v52 }
 0x2c8   :  { %v4467_v50 = vrot.slane %v10878_v56, %v5658_v23  ;;  %v4254_v60 = vrot.slane %v3228_v32, %v5675_v33  ;;  %v3495_v15 = vmul.f32 %v3494_v58, %v8436_v24  ;;  %v3232_v55 = vmul.f32 -0.5, %v8488_v22  ;;  %v512_v32 = vpop.xlane.xlu0 %511 }
 0x2c9   :  { %vm907_vm10 = vcmp.gt.f32.partialorder %v8326_v9, 20.0  ;;  %v2223_v21 = vadd.f32 1.0, %v2222_v3  ;;  %v5027_v16 = vpop.eup %5026  ;;  %v4471_v28 = vrot.slane %v3624_v38, %v10709_v20  ;;  %v3361_v23 = vand.u32 2147483647, %v8480_v18 }
 0x2ca   :  { %v2225_v8 = vand.u32 2147483647, %v8464_v44  ;;  %5044 = vpow2.f32 %v1295_v62  ;;  %v5029_v61 = vpop.eup %5028  ;;  %v3498_v49 = vsel %vm8570_vm2, %v3495_v15, %v3492_v0  ;;  %v3359_v59 = vadd.f32 1.0, %v3358_v1 }
 0x2cb   :  { %v2221_v25 = vmul.f32 0.6931472, %v5025_v6  ;;  %5046 = vpow2.f32 %v1237_v53  ;;  %v8583_v24 = vpop.eup %5030  ;;  %vm10881_vm7 = vcmask 195712   ;;  %v3235_v63 = vand.u32 2147483647, %v8488_v22 }
 0x2cc   :  { %v4398_v7 = vsel %vm10881_vm7, %v4397_v41, %v8419_v39  ;;  %v3628_v20 = vmul.f32 -0.5, %v8544_v34  ;;  %v2087_v12 = vmul.f32 -0.5, %v8504_v43  ;;  %v5033_v37 = vpop.eup %5032  ;;  %v8592_v5 = vsel %vm3918_vm15, %v4254_v60, %v8497_v13 }
 0x2cd   :  { %v3233_v29 = vadd.f32 1.0, %v3232_v55  ;;  %v2224_v31 = vmul.f32 %v8464_v44, %v2223_v21  ;;  %v1961_v52 = vmul.f32 -0.5, %v8518_v11  ;;  %v5035_v17 = vpop.eup %5034  ;;  %vm10882_vm1 = vcmask 130112  }
 0x2ce   :  { %v8597_v58 = vsel %vm10882_vm1, %v4471_v28, %v4467_v50  ;;  %v4402_v39 = vrot.slane %v3498_v49, %v10787_v19  ;;  %vm8600_vm12 = vcmp.lt.f32.partialorder %v3361_v23, 0.0004427343  ;;  %vm8604_vm0 = vcmp.lt.f32.partialorder %v2225_v8, 0.0004427343  ;;  %v8608_v13 = vpop.eup %5036 }
 0x2cf   :  { %v3357_v38 = vmul.f32 0.6931472, %v5027_v16  ;;  %v3360_v44 = vmul.f32 %v3359_v59, %v8480_v18  ;;  %v2227_v62 = vsel %vm8604_vm0, %v2224_v31, %v2221_v25  ;;  %v2354_v0 = vadd.f32 1.0, %v8583_v24  ;;  %v8614_v1 = vpop.eup %5038 }
 0x2d0   :  { %vm8616_vm9 = vcmp.lt.f32.partialorder %v3235_v63, 0.0004427343  ;;  %v3629_v6 = vadd.f32 1.0, %v3628_v20  ;;  %vm892_vm8 = vcmp.gt.f32.partialorder %v8351_v51, 20.0  ;;  %v2088_v56 = vadd.f32 1.0, %v2087_v12  ;;  %v5041_v41 = vpop.eup %5040 }
 0x2d1   :  { %v2090_v50 = vand.u32 2147483647, %v8504_v43  ;;  %v3231_v14 = vmul.f32 0.6931472, %v5029_v61  ;;  %v3234_v18 = vmul.f32 %v3233_v29, %v8488_v22  ;;  %v3631_v60 = vand.u32 2147483647, %v8544_v34  ;;  %v8625_v55 = vpop.eup %5042 }
 0x2d2   :  { %vm878_vm5 = vcmp.gt.f32.partialorder %v8362_v30, 20.0  ;;  %v1962_v15 = vadd.f32 1.0, %v1961_v52  ;;  %v8630_v21 = vsel %vm907_vm10, %v8326_v9, %v2227_v62  ;;  %v2086_v16 = vmul.f32 0.6931472, %v5033_v37 }
 0x2d3   :  { %v1964_v28 = vand.u32 2147483647, %v8518_v11  ;;  %v2228_v23 = vadd.f32 1.0, %v8608_v13  ;;  %v3363_v22 = vsel %vm8600_vm12, %v3360_v44, %v3357_v38  ;;  %v1960_v8 = vmul.f32 0.6931472, %v5035_v17 }
 0x2d4   :  { %5048 = vlog2.f32 %v2354_v0  ;;  %v2093_v61 = vadd.f32 1.0, %v8614_v1  ;;  %v8637_v49 = vpop.eup %5044  ;;  %v3627_v59 = vmul.f32 0.6931472, %v5041_v41  ;;  %v3630_v25 = vmul.f32 %v3629_v6, %v8544_v34  ;;  %v647_v34 = vpop.xlane.xlu1 %646 }
 0x2d5   :  { %v2089_v9 = vmul.f32 %v8504_v43, %v2088_v56  ;;  %vm8641_vm2 = vcmp.lt.f32.partialorder %v2090_v50, 0.0004427343  ;;  %v8645_v20 = vpop.eup %5046  ;;  %v3237_v12 = vsel %vm8616_vm9, %v3234_v18, %v3231_v14  ;;  %v3502_v37 = vmul.f32 -0.5, %v8630_v21 }
 0x2d6   :  { %v1963_v29 = vmul.f32 %v8518_v11, %v1962_v15  ;;  %v1832_v31 = vadd.f32 1.0, %v8625_v55  ;;  %v4328_v52 = vrot.slane %v3363_v22, %v5685_v40  ;;  %vm8655_vm10 = vcmp.lt.f32.partialorder %v1964_v28, 0.0004427343 }
 0x2d7   :  { %v2092_v43 = vsel %vm8641_vm2, %v2089_v9, %v2086_v16  ;;  %5050 = vlog2.f32 %v2228_v23  ;;  %vm8659_vm7 = vcmp.lt.f32.partialorder %v3631_v60, 0.0004427343  ;;  %v2363_v11 = vadd.f32 1.0, %v8637_v49 }
 0x2d8   :  { %v1966_v3 = vsel %vm8655_vm10, %v1963_v29, %v1960_v8  ;;  %5052 = vlog2.f32 %v2093_v61  ;;  %v8667_v38 = vsel %vm3904_vm11, %v4402_v39, %v4398_v7  ;;  %v4259_v44 = vrot.slane %v3237_v12, %v5694_v47 }
 0x2d9   :  { %v3633_v62 = vsel %vm8659_vm7, %v3630_v25, %v3627_v59  ;;  %v2102_v0 = vadd.f32 1.0, %v8645_v20  ;;  %v3499_v53 = vadd.f32 1.0, %v8630_v21  ;;  %v3503_v6 = vadd.f32 1.0, %v3502_v37 }
 0x2da   :  { %v8677_v56 = vsel %vm892_vm8, %v8351_v51, %v2092_v43  ;;  %5054 = vlog2.f32 %v1832_v31  ;;  %v8681_v7 = vsel %vm3911_vm13, %v4328_v52, %v8444_v35  ;;  %v8686_v39 = vsel %vm878_vm5, %v8362_v30, %v1966_v3 }
 0x2db   :  { %v2357_v50 = vmul.f32 -0.5, %v8583_v24  ;;  %v8690_v41 = vadd.f32 %v5588_v26, %v512_v32  ;;  %v4476_v14 = vrot.slane %v3633_v62, %v10788_v10  ;;  %v3505_v51 = vand.u32 2147483647, %v8630_v21 }
 0x2dc   :  { %v2231_v18 = vmul.f32 -0.5, %v8608_v13  ;;  %5056 = vlog2.f32 %v2363_v11  ;;  %v8697_v35 = vsel %vm3925_vm6, %v4259_v44, %v8592_v5  ;;  %v3364_v60 = vadd.f32 1.0, %v8677_v56  ;;  %v602_v44 = vpop.xlane.xlu0 %601 }
 0x2dd   :  { %v3367_v30 = vmul.f32 -0.5, %v8677_v56  ;;  %5058 = vlog2.f32 %v2102_v0  ;;  %v8702_v16 = vmul.f32 %v3503_v6, %v8630_v21  ;;  %v3238_v10 = vadd.f32 1.0, %v8686_v39 }
 0x2de   :  { %v5049_v15 = vpop.eup %5048  ;;  %5060 = vlog2.f32 %v3499_v53  ;;  %v3241_v28 = vmul.f32 -0.5, %v8686_v39  ;;  %v3370_v23 = vand.u32 2147483647, %v8677_v56  ;;  %vm922_vm1 = vcmp.gt.f32.partialorder %v8462_v46, 20.0 }
 0x2df   :  { %v2358_v5 = vadd.f32 1.0, %v2357_v50  ;;  %v2360_v22 = vand.u32 2147483647, %v8583_v24  ;;  %v2096_v8 = vmul.f32 -0.5, %v8614_v1  ;;  %vm10895_vm12 = vcmask 195712  }
 0x2e0   :  { %v8712_v61 = vsel %vm10895_vm12, %v4476_v14, %v8597_v58  ;;  %v2232_v59 = vadd.f32 1.0, %v2231_v18  ;;  %v2234_v25 = vand.u32 2147483647, %v8608_v13  ;;  %v1835_v9 = vmul.f32 -0.5, %v8625_v55 }
 0x2e1   :  { %v5051_v63 = vpop.eup %5050  ;;  %5062 = vlog2.f32 %v3364_v60  ;;  %v8716_v12 = vadd.f32 1.0, %v3367_v30  ;;  %v3244_v37 = vand.u32 2147483647, %v8686_v39  ;;  %v2356_v29 = vmul.f32 0.6931472, %v5049_v15 }
 0x2e2   :  { %v5053_v31 = vpop.eup %5052  ;;  %5064 = vlog2.f32 %v3238_v10  ;;  %v8719_v52 = vadd.f32 1.0, %v3241_v28  ;;  %v2099_v43 = vand.u32 2147483647, %v8614_v1  ;;  %v1007_v58 = vmin.f32 %v8690_v41, 20.0 }
 0x2e3   :  { %v2359_v17 = vmul.f32 %v8583_v24, %v2358_v5  ;;  %vm8724_vm0 = vcmp.lt.f32.partialorder %v2360_v22, 0.0004427343  ;;  %vm908_vm9 = vcmp.gt.f32.partialorder %v8483_v54, 20.0  ;;  %vm893_vm8 = vcmp.gt.f32.partialorder %v8493_v27, 20.0 }
 0x2e4   :  { %v2097_v11 = vadd.f32 1.0, %v2096_v8  ;;  %v2366_v32 = vmul.f32 -0.5, %v8637_v49  ;;  %v5055_v62 = vpop.eup %5054  ;;  %v2233_v0 = vmul.f32 %v8608_v13, %v2232_v59  ;;  %vm8732_vm5 = vcmp.lt.f32.partialorder %v2234_v25, 0.0004427343 }
 0x2e5   :  { %v1836_v24 = vadd.f32 1.0, %v1835_v9  ;;  %v2105_v6 = vmul.f32 -0.5, %v8645_v20  ;;  %v2362_v50 = vsel %vm8724_vm0, %v2359_v17, %v2356_v29  ;;  %v2230_v14 = vmul.f32 0.6931472, %v5051_v63  ;;  %v515_v17 = vpop.xlane.xlu1 %514 }
 0x2e6   :  { %v2095_v18 = vmul.f32 0.6931472, %v5053_v31  ;;  %vm864_vm2 = vcmp.gt.f32.partialorder %v8516_v36, 20.0  ;;  %v8741_v60 = vadd.f32 %v5588_v26, %v647_v34  ;;  %v5057_v30 = vpop.eup %5056  ;;  %vm8743_vm10 = vcmp.lt.f32.partialorder %v2099_v43, 0.0004427343 }
 0x2e7   :  { %v1838_v15 = vand.u32 2147483647, %v8625_v55  ;;  %v1207_v10 = vmul.f32 1.442695, %v1007_v58  ;;  %v8749_v28 = vadd.f32 %v5588_v26, %v602_v44  ;;  %v5059_v5 = vpop.eup %5058  ;;  %v2098_v22 = vmul.f32 %v8614_v1, %v2097_v11 }
 0x2e8   :  { %v1834_v8 = vmul.f32 0.6931472, %v5055_v62  ;;  %vm923_vm7 = vcmp.gt.f32.partialorder %v8530_v4, 20.0  ;;  %v2367_v59 = vadd.f32 1.0, %v2366_v32  ;;  %v2369_v25 = vand.u32 2147483647, %v8637_v49  ;;  %v5061_v9 = vpop.eup %5060  ;;  %v470_v32 = vpop.xlane.xlu0 %469 }
 0x2e9   :  { %v8757_v63 = vsel %vm922_vm1, %v8462_v46, %v2362_v50  ;;  %v1837_v29 = vmul.f32 %v8625_v55, %v1836_v24  ;;  %vm894_vm12 = vcmp.gt.f32.partialorder %v8539_v2, 20.0  ;;  %v2106_v31 = vadd.f32 1.0, %v2105_v6 }
 0x2ea   :  { %v2108_v43 = vand.u32 2147483647, %v8645_v20  ;;  %vm8764_vm0 = vcmp.lt.f32.partialorder %v3505_v51, 0.0004427343  ;;  %v2236_v58 = vsel %vm8732_vm5, %v2233_v0, %v2230_v14  ;;  %v2101_v46 = vsel %vm8743_vm10, %v2098_v22, %v2095_v18 }
 0x2eb   :  { %v2365_v34 = vmul.f32 0.6931472, %v5057_v30  ;;  %v1052_v55 = vmin.f32 %v8741_v60, 20.0  ;;  %vm8773_vm1 = vcmp.lt.f32.partialorder %v3370_v23, 0.0004427343  ;;  %5066 = vpow2.f32 %v1207_v10  ;;  %v5063_v44 = vpop.eup %5062 }
 0x2ec   :  { %vm8777_vm3 = vcmp.lt.f32.partialorder %v1838_v15, 0.0004427343  ;;  %v2104_v51 = vmul.f32 0.6931472, %v5059_v5  ;;  %v1037_v11 = vmin.f32 %v8749_v28, 20.0  ;;  %v2368_v53 = vmul.f32 %v8637_v49, %v2367_v59  ;;  %v5065_v24 = vpop.eup %5064 }
 0x2ed   :  { %v3501_v62 = vmul.f32 0.6931472, %v5061_v9  ;;  %v1840_v0 = vsel %vm8777_vm3, %v1837_v29, %v1834_v8  ;;  %vm8785_vm5 = vcmp.lt.f32.partialorder %v2369_v25, 0.0004427343  ;;  %v3634_v6 = vadd.f32 1.0, %v8757_v63  ;;  %v605_v25 = vpop.xlane.xlu1 %604 }
 0x2ee   :  { %v8793_v50 = vsel %vm908_vm9, %v8483_v54, %v2236_v58  ;;  %v8798_v14 = vsel %vm893_vm8, %v8493_v27, %v2101_v46  ;;  %v2107_v18 = vmul.f32 %v8645_v20, %v2106_v31  ;;  %v2371_v49 = vsel %vm8785_vm5, %v2368_v53, %v2365_v34  ;;  %v560_v31 = vpop.xlane.xlu0 %559 }
 0x2ef   :  { %vm8803_vm3 = vcmp.lt.f32.partialorder %v2108_v43, 0.0004427343  ;;  %v1297_v13 = vmul.f32 1.442695, %v1052_v55  ;;  %v8808_v15 = vadd.f32 %v5588_v26, %v515_v17  ;;  %v8813_v54 = vsel %vm864_vm2, %v8516_v36, %v1840_v0 }
 0x2f0   :  { %v2110_v27 = vsel %vm8803_vm3, %v2107_v18, %v2104_v51  ;;  %v1267_v20 = vmul.f32 1.442695, %v1037_v11  ;;  %v8818_v10 = vadd.f32 %v5588_v26, %v470_v32  ;;  %v3366_v5 = vmul.f32 0.6931472, %v5063_v44 }
 0x2f1   :  { %v3369_v22 = vmul.f32 %v8716_v12, %v8677_v56  ;;  %v3243_v8 = vmul.f32 %v8719_v52, %v8686_v39  ;;  %v3508_v59 = vadd.f32 1.0, %v8793_v50  ;;  %v3240_v9 = vmul.f32 0.6931472, %v5065_v24  ;;  %v473_v11 = vpop.xlane.xlu1 %472 }
 0x2f2   :  { %5068 = vlog2.f32 %v3634_v6  ;;  %v3373_v36 = vadd.f32 1.0, %v8798_v14  ;;  %v8829_v29 = vsel %vm923_vm7, %v8530_v4, %v2371_v49  ;;  %v3112_v43 = vadd.f32 1.0, %v8813_v54 }
 0x2f3   :  { %v8835_v56 = vsel %vm894_vm12, %v8539_v2, %v2110_v27  ;;  %5070 = vpow2.f32 %v1297_v13  ;;  %v1008_v12 = vmin.f32 %v8808_v15, 20.0  ;;  %v3507_v52 = vsel %vm8764_vm0, %v8702_v16, %v3501_v62 }
 0x2f4   :  { %5072 = vpow2.f32 %v1267_v20  ;;  %v993_v58 = vmin.f32 %v8818_v10, 20.0  ;;  %v8843_v4 = vadd.f32 %v5588_v26, %v605_v25  ;;  %v3372_v46 = vsel %vm8773_vm1, %v3369_v22, %v3366_v5 }
 0x2f5   :  { %5074 = vlog2.f32 %v3508_v59  ;;  %v3643_v2 = vadd.f32 1.0, %v8829_v29  ;;  %v8849_v34 = vadd.f32 %v5588_v26, %v560_v31  ;;  %v8851_v55 = vpop.eup %5066  ;;  %vm8855_vm9 = vcmp.lt.f32.partialorder %v3244_v37, 0.0004427343 }
 0x2f6   :  { %v3637_v1 = vmul.f32 -0.5, %v8757_v63  ;;  %5076 = vlog2.f32 %v3373_v36  ;;  %v3382_v17 = vadd.f32 1.0, %v8835_v56  ;;  %v3246_v3 = vsel %vm8855_vm9, %v3243_v8, %v3240_v9 }
 0x2f7   :  { %v3511_v21 = vmul.f32 -0.5, %v8793_v50  ;;  %5078 = vlog2.f32 %v3112_v43  ;;  %v1209_v51 = vmul.f32 1.442695, %v1008_v12  ;;  %v4407_v32 = vrot.slane %v3507_v52, %v5685_v40 }
 0x2f8   :  { %v4333_v39 = vrot.slane %v3372_v46, %v5675_v33  ;;  %v1179_v37 = vmul.f32 1.442695, %v993_v58  ;;  %v1038_v44 = vmin.f32 %v8843_v4, 20.0  ;;  %v3640_v62 = vand.u32 2147483647, %v8757_v63 }
 0x2f9   :  { %5080 = vlog2.f32 %v3643_v2  ;;  %v1967_v0 = vadd.f32 1.0, %v8851_v55  ;;  %v1023_v53 = vmin.f32 %v8849_v34, 20.0  ;;  %v4264_v23 = vrot.slane %v3246_v3, %v5691_v45  ;;  %v650_v2 = vpop.xlane.xlu0 %649 }
 0x2fa   :  { %v3638_v24 = vadd.f32 1.0, %v3637_v1  ;;  %5082 = vlog2.f32 %v3382_v17  ;;  %v8872_v6 = vadd.f32 %v5588_v26, %v473_v11  ;;  %v3512_v18 = vadd.f32 1.0, %v3511_v21 }
 0x2fb   :  { %v3514_v49 = vand.u32 2147483647, %v8793_v50  ;;  %v3376_v30 = vmul.f32 -0.5, %v8798_v14  ;;  %5084 = vpow2.f32 %v1209_v51  ;;  %v8878_v27 = vsel %vm3911_vm13, %v4407_v32, %v8667_v38 }
 0x2fc   :  { %v5069_v13 = vpop.eup %5068  ;;  %v3379_v20 = vand.u32 2147483647, %v8798_v14  ;;  %5086 = vpow2.f32 %v1179_v37  ;;  %v1269_v5 = vmul.f32 1.442695, %v1038_v44  ;;  %v8885_v8 = vsel %vm3918_vm15, %v4333_v39, %v8681_v7 }
 0x2fd   :  { %v8881_v22 = vpop.eup %5070  ;;  %v3115_v59 = vmul.f32 -0.5, %v8813_v54  ;;  %5088 = vlog2.f32 %v1967_v0  ;;  %v1239_v25 = vmul.f32 1.442695, %v1023_v53  ;;  %v8892_v38 = vsel %vm3932_vm14, %v4264_v23, %v8697_v35 }
 0x2fe   :  { %v8888_v9 = vpop.eup %5072  ;;  %v3639_v36 = vmul.f32 %v3638_v24, %v8757_v63  ;;  %vm8895_vm8 = vcmp.lt.f32.partialorder %v3640_v62, 0.0004427343  ;;  %v994_v43 = vmin.f32 %v8872_v6, 20.0  ;;  %v3636_v12 = vmul.f32 0.6931472, %v5069_v13 }
 0x2ff   :  { %v5075_v7 = vpop.eup %5074  ;;  %v3513_v52 = vmul.f32 %v3512_v18, %v8793_v50  ;;  %vm8901_vm2 = vcmp.lt.f32.partialorder %v3514_v49, 0.0004427343  ;;  %v3377_v46 = vadd.f32 1.0, %v3376_v30  ;;  %vm8905_vm10 = vcmp.lt.f32.partialorder %v3379_v20, 0.0004427343 }
 0x300   :  { %v5077_v35 = vpop.eup %5076  ;;  %v3118_v63 = vand.u32 2147483647, %v8813_v54  ;;  %v2372_v1 = vadd.f32 1.0, %v8881_v22  ;;  %5090 = vpow2.f32 %v1269_v5  ;;  %v3116_v3 = vadd.f32 1.0, %v3115_v59 }
 0x301   :  { %v5079_v17 = vpop.eup %5078  ;;  %v3646_v50 = vmul.f32 -0.5, %v8829_v29  ;;  %v2237_v21 = vadd.f32 1.0, %v8888_v9  ;;  %5092 = vpow2.f32 %v1239_v25  ;;  %v3649_v51 = vand.u32 2147483647, %v8829_v29 }
 0x302   :  { %v3385_v11 = vmul.f32 -0.5, %v8835_v56  ;;  %v1181_v32 = vmul.f32 1.442695, %v994_v43  ;;  %v8916_v39 = vadd.f32 %v5588_v26, %v650_v2  ;;  %v3642_v44 = vsel %vm8895_vm8, %v3639_v36, %v3636_v12 }
 0x303   :  { %v5081_v37 = vpop.eup %5080  ;;  %v3510_v62 = vmul.f32 0.6931472, %v5075_v7  ;;  %v3375_v0 = vmul.f32 0.6931472, %v5077_v35  ;;  %v3388_v53 = vand.u32 2147483647, %v8835_v56  ;;  %v3378_v24 = vmul.f32 %v3377_v46, %v8798_v14 }
 0x304   :  { %v5083_v23 = vpop.eup %5082  ;;  %v3114_v18 = vmul.f32 0.6931472, %v5079_v17  ;;  %v1970_v49 = vmul.f32 -0.5, %v8851_v55  ;;  %5094 = vlog2.f32 %v2372_v1  ;;  %v3117_v13 = vmul.f32 %v3116_v3, %v8813_v54 }
 0x305   :  { %v8923_v30 = vpop.eup %5084  ;;  %vm8926_vm7 = vcmp.lt.f32.partialorder %v3118_v63, 0.0004427343  ;;  %v3647_v5 = vadd.f32 1.0, %v3646_v50  ;;  %5096 = vlog2.f32 %v2237_v21  ;;  %v4481_v25 = vrot.slane %v3642_v44, %v10787_v19  ;;  %v563_v19 = vpop.xlane.xlu1 %562 }
 0x306   :  { %v8930_v59 = vpop.eup %5086  ;;  %vm8933_vm12 = vcmp.lt.f32.partialorder %v3649_v51, 0.0004427343  ;;  %5098 = vpow2.f32 %v1181_v32  ;;  %v1053_v36 = vmin.f32 %v8916_v39, 20.0  ;;  %v3516_v54 = vsel %vm8901_vm2, %v3513_v52, %v3510_v62 }
 0x307   :  { %v5089_v31 = vpop.eup %5088  ;;  %v3381_v43 = vsel %vm8905_vm10, %v3378_v24, %v3375_v0  ;;  %v3386_v7 = vadd.f32 1.0, %v3385_v11  ;;  %vm8942_vm0 = vcmp.lt.f32.partialorder %v3388_v53, 0.0004427343  ;;  %v3120_v46 = vsel %vm8926_vm7, %v3117_v13, %v3114_v18 }
 0x308   :  { %v3645_v2 = vmul.f32 0.6931472, %v5081_v37  ;;  %vm879_vm1 = vcmp.gt.f32.partialorder %v8690_v41, 20.0  ;;  %v1971_v35 = vadd.f32 1.0, %v1970_v49  ;;  %v1976_v63 = vadd.f32 1.0, %v8923_v30 }
 0x309   :  { %v3648_v52 = vmul.f32 %v3647_v5, %v8829_v29  ;;  %v3384_v58 = vmul.f32 0.6931472, %v5083_v23  ;;  %v1973_v16 = vand.u32 2147483647, %v8851_v55  ;;  %v1841_v1 = vadd.f32 1.0, %v8930_v59 }
 0x30a   :  { %v8953_v17 = vpop.eup %5090  ;;  %v4412_v3 = vrot.slane %v3516_v54, %v5675_v33  ;;  %v1969_v50 = vmul.f32 0.6931472, %v5089_v31  ;;  %v1299_v21 = vmul.f32 1.442695, %v1053_v36  ;;  %v8957_v51 = vadd.f32 %v5588_v26, %v563_v19 }
 0x30b   :  { %v8959_v11 = vpop.eup %5092  ;;  %v4338_v32 = vrot.slane %v3381_v43, %v5694_v47  ;;  %v4195_v29 = vrot.slane %v3120_v46, %v5697_v48  ;;  %v3387_v37 = vmul.f32 %v3386_v7, %v8835_v56  ;;  %v2375_v44 = vmul.f32 -0.5, %v8881_v22 }
 0x30c   :  { %v3651_v62 = vsel %vm8933_vm12, %v3648_v52, %v3645_v2  ;;  %v1972_v0 = vmul.f32 %v8851_v55, %v1971_v35  ;;  %v2240_v53 = vmul.f32 -0.5, %v8888_v9  ;;  %5100 = vlog2.f32 %v1976_v63 }
 0x30d   :  { %v3390_v23 = vsel %vm8942_vm0, %v3387_v37, %v3384_v58  ;;  %vm8971_vm5 = vcmp.lt.f32.partialorder %v1973_v16, 0.0004427343  ;;  %5102 = vlog2.f32 %v1841_v1  ;;  %v2246_v56 = vadd.f32 1.0, %v8953_v17  ;;  %v518_v1 = vpop.xlane.xlu0 %517 }
 0x30e   :  { %v5095_v18 = vpop.eup %5094  ;;  %v1975_v49 = vsel %vm8971_vm5, %v1972_v0, %v1969_v50  ;;  %v2111_v13 = vadd.f32 1.0, %v8959_v11  ;;  %5104 = vpow2.f32 %v1299_v21  ;;  %v1024_v55 = vmin.f32 %v8957_v51, 20.0 }
 0x30f   :  { %v5097_v20 = vpop.eup %5096  ;;  %v4482_v5 = vsel %vm3904_vm11, %v4481_v25, %v8712_v61  ;;  %v8984_v14 = vsel %vm3918_vm15, %v4412_v3, %v8878_v27  ;;  %v2376_v36 = vadd.f32 1.0, %v2375_v44  ;;  %v2378_v31 = vand.u32 2147483647, %v8881_v22 }
 0x310   :  { %v8987_v54 = vpop.eup %5098  ;;  %v4339_v43 = vsel %vm3925_vm6, %v4338_v32, %v8885_v8  ;;  %vm10928_vm3 = vcmask 654912   ;;  %v4486_v12 = vrot.slane %v3651_v62, %v5685_v40  ;;  %vm924_vm11 = vcmp.gt.f32.partialorder %v8741_v60, 20.0 }
 0x311   :  { %v8993_v7 = vsel %vm10928_vm3, %v4195_v29, %v8292_v42  ;;  %vm909_vm9 = vcmp.gt.f32.partialorder %v8749_v28, 20.0  ;;  %v2241_v61 = vadd.f32 1.0, %v2240_v53  ;;  %v4343_v27 = vrot.slane %v3390_v23, %v5691_v45  ;;  %v653_v23 = vpop.xlane.xlu1 %652 }
 0x312   :  { %v9002_v25 = vsel %vm879_vm1, %v8690_v41, %v1975_v49  ;;  %v2243_v8 = vand.u32 2147483647, %v8888_v9  ;;  %5106 = vlog2.f32 %v2246_v56  ;;  %v2374_v19 = vmul.f32 0.6931472, %v5095_v18 }
 0x313   :  { %v2239_v42 = vmul.f32 0.6931472, %v5097_v20  ;;  %5108 = vlog2.f32 %v2111_v13  ;;  %v1241_v46 = vmul.f32 1.442695, %v1024_v55  ;;  %v2377_v40 = vmul.f32 %v8881_v22, %v2376_v36 }
 0x314   :  { %vm9006_vm8 = vcmp.lt.f32.partialorder %v2378_v31, 0.0004427343  ;;  %v1979_v35 = vmul.f32 -0.5, %v8923_v30  ;;  %v1850_v63 = vadd.f32 1.0, %v8987_v54  ;;  %v3247_v41 = vadd.f32 1.0, %v9002_v25 }
 0x315   :  { %v2242_v52 = vmul.f32 %v8888_v9, %v2241_v61  ;;  %v1982_v58 = vand.u32 2147483647, %v8923_v30  ;;  %v1844_v16 = vmul.f32 -0.5, %v8930_v59  ;;  %v9017_v3 = vsel %vm3911_vm13, %v4486_v12, %v4482_v5 }
 0x316   :  { %vm9019_vm2 = vcmp.lt.f32.partialorder %v2243_v8, 0.0004427343  ;;  %v1847_v50 = vand.u32 2147483647, %v8930_v59  ;;  %v2249_v21 = vmul.f32 -0.5, %v8953_v17  ;;  %v5101_v32 = vpop.eup %5100  ;;  %v3250_v29 = vmul.f32 -0.5, %v9002_v25 }
 0x317   :  { %v2380_v9 = vsel %vm9006_vm8, %v2377_v40, %v2374_v19  ;;  %v2245_v37 = vsel %vm9019_vm2, %v2242_v52, %v2239_v42  ;;  %5110 = vpow2.f32 %v1241_v46  ;;  %v5103_v44 = vpop.eup %5102  ;;  %v9031_v62 = vsel %vm3932_vm14, %v4343_v27, %v4339_v43 }
 0x318   :  { %v1980_v0 = vadd.f32 1.0, %v1979_v35  ;;  %5112 = vlog2.f32 %v1850_v63  ;;  %v9034_v53 = vadd.f32 %v5588_v26, %v518_v1  ;;  %v9036_v24 = vpop.eup %5104  ;;  %v3253_v56 = vand.u32 2147483647, %v9002_v25 }
 0x319   :  { %5114 = vlog2.f32 %v3247_v41  ;;  %vm9039_vm13 = vcmp.lt.f32.partialorder %v1982_v58, 0.0004427343  ;;  %v1845_v49 = vadd.f32 1.0, %v1844_v16  ;;  %v9046_v13 = vsel %vm924_vm11, %v8741_v60, %v2380_v9 }
 0x31a   :  { %v9051_v55 = vsel %vm909_vm9, %v8749_v28, %v2245_v37  ;;  %vm880_vm10 = vcmp.gt.f32.partialorder %v8808_v15, 20.0  ;;  %vm865_vm7 = vcmp.gt.f32.partialorder %v8818_v10, 20.0  ;;  %v2250_v20 = vadd.f32 1.0, %v2249_v21 }
 0x31b   :  { %v2114_v5 = vmul.f32 -0.5, %v8959_v11  ;;  %v3251_v36 = vadd.f32 1.0, %v3250_v29  ;;  %vm9056_vm12 = vcmp.lt.f32.partialorder %v1847_v50, 0.0004427343  ;;  %v2252_v60 = vand.u32 2147483647, %v8953_v17  ;;  %v608_v50 = vpop.xlane.xlu0 %607 }
 0x31c   :  { %v9062_v43 = vadd.f32 %v5588_v26, %v653_v23  ;;  %v5107_v12 = vpop.eup %5106  ;;  %v1978_v28 = vmul.f32 0.6931472, %v5101_v32  ;;  %v1981_v61 = vmul.f32 %v8923_v30, %v1980_v0  ;;  %v1843_v27 = vmul.f32 0.6931472, %v5103_v44 }
 0x31d   :  { %v2381_v8 = vadd.f32 1.0, %v9036_v24  ;;  %v5109_v19 = vpop.eup %5108  ;;  %v3652_v42 = vadd.f32 1.0, %v9046_v13  ;;  %v3655_v46 = vmul.f32 -0.5, %v9046_v13  ;;  %v3520_v40 = vmul.f32 -0.5, %v9051_v55 }
 0x31e   :  { %v1846_v2 = vmul.f32 %v8930_v59, %v1845_v49  ;;  %vm910_vm0 = vcmp.gt.f32.partialorder %v8843_v4, 20.0  ;;  %v3517_v35 = vadd.f32 1.0, %v9051_v55  ;;  %v2251_v63 = vmul.f32 %v8953_v17, %v2250_v20 }
 0x31f   :  { %vm895_vm1 = vcmp.gt.f32.partialorder %v8849_v34, 20.0  ;;  %v2115_v30 = vadd.f32 1.0, %v2114_v5  ;;  %v2117_v41 = vand.u32 2147483647, %v8959_v11  ;;  %v9076_v52 = vmul.f32 %v3251_v36, %v9002_v25 }
 0x320   :  { %v2248_v58 = vmul.f32 0.6931472, %v5107_v12  ;;  %vm9078_vm5 = vcmp.lt.f32.partialorder %v2252_v60, 0.0004427343  ;;  %v1853_v59 = vmul.f32 -0.5, %v8987_v54  ;;  %v1984_v1 = vsel %vm9039_vm13, %v1981_v61, %v1978_v28  ;;  %v521_v60 = vpop.xlane.xlu1 %520 }
 0x321   :  { %v1849_v17 = vsel %vm9056_vm12, %v1846_v2, %v1843_v27  ;;  %v2113_v22 = vmul.f32 0.6931472, %v5109_v19  ;;  %5116 = vlog2.f32 %v2381_v8  ;;  %v9087_v21 = vpop.eup %5110  ;;  %vm9089_vm3 = vcmp.lt.f32.partialorder %v3253_v56, 0.0004427343 }
 0x322   :  { %5118 = vlog2.f32 %v3652_v42  ;;  %v3656_v32 = vadd.f32 1.0, %v3655_v46  ;;  %v3658_v29 = vand.u32 2147483647, %v9046_v13  ;;  %v3521_v9 = vadd.f32 1.0, %v3520_v40  ;;  %v5113_v37 = vpop.eup %5112  ;;  %v476_v46 = vpop.xlane.xlu0 %475 }
 0x323   :  { %5120 = vlog2.f32 %v3517_v35  ;;  %v3523_v44 = vand.u32 2147483647, %v9051_v55  ;;  %v2116_v0 = vmul.f32 %v8959_v11, %v2115_v30  ;;  %vm9096_vm11 = vcmp.lt.f32.partialorder %v2117_v41, 0.0004427343  ;;  %v5115_v18 = vpop.eup %5114 }
 0x324   :  { %v9103_v56 = vsel %vm880_vm10, %v8808_v15, %v1984_v1  ;;  %v9108_v49 = vsel %vm865_vm7, %v8818_v10, %v1849_v17  ;;  %v2254_v20 = vsel %vm9078_vm5, %v2251_v63, %v2248_v58  ;;  %vm866_vm9 = vcmp.gt.f32.partialorder %v8872_v6, 20.0  ;;  %v611_v17 = vpop.xlane.xlu1 %610 }
 0x325   :  { %v1854_v11 = vadd.f32 1.0, %v1853_v59  ;;  %v2119_v5 = vsel %vm9096_vm11, %v2116_v0, %v2113_v22  ;;  %v1856_v36 = vand.u32 2147483647, %v8987_v54  ;;  %v2120_v31 = vadd.f32 1.0, %v9087_v21 }
 0x326   :  { %v1009_v15 = vmin.f32 %v9034_v53, 20.0  ;;  %v9119_v12 = vmul.f32 %v3656_v32, %v9046_v13  ;;  %v9122_v10 = vmul.f32 %v3521_v9, %v9051_v55  ;;  %v1852_v28 = vmul.f32 0.6931472, %v5113_v37 }
 0x327   :  { %v9125_v61 = vadd.f32 %v5588_v26, %v608_v50  ;;  %v3249_v27 = vmul.f32 0.6931472, %v5115_v18  ;;  %v3256_v8 = vadd.f32 1.0, %v9103_v56  ;;  %v3121_v19 = vadd.f32 1.0, %v9108_v49  ;;  %v10963_v18 = vld [vmem:[#allocation10_spill] sm:$0xff] }
 0x328   :  { %v9132_v42 = vsel %vm910_vm0, %v8843_v4, %v2254_v20  ;;  %v9137_v13 = vsel %vm895_vm1, %v8849_v34, %v2119_v5  ;;  %v1855_v55 = vmul.f32 %v8987_v54, %v1854_v11  ;;  %v2384_v40 = vmul.f32 -0.5, %v9036_v24 }
 0x329   :  { %v1054_v2 = vmin.f32 %v9062_v43, 20.0  ;;  %vm9142_vm8 = vcmp.lt.f32.partialorder %v1856_v36, 0.0004427343  ;;  %5122 = vlog2.f32 %v2120_v31  ;;  %v1211_v63 = vmul.f32 1.442695, %v1009_v15 }
 0x32a   :  { %v9147_v4 = vadd.f32 %v5588_v26, %v521_v60  ;;  %v3259_v30 = vmul.f32 -0.5, %v9103_v56  ;;  %v1858_v34 = vsel %vm9142_vm8, %v1855_v55, %v1852_v28  ;;  %v1039_v54 = vmin.f32 %v9125_v61, 20.0 }
 0x32b   :  { %v9154_v41 = vadd.f32 %v5588_v26, %v476_v46  ;;  %v5117_v58 = vpop.eup %5116  ;;  %v3255_v16 = vsel %vm9089_vm3, %v9076_v52, %v3249_v27  ;;  %5124 = vlog2.f32 %v3256_v8  ;;  %v3262_v59 = vand.u32 2147483647, %v9103_v56 }
 0x32c   :  { %v3526_v1 = vadd.f32 1.0, %v9132_v42  ;;  %v5119_v22 = vpop.eup %5118  ;;  %5126 = vlog2.f32 %v3121_v19  ;;  %v3391_v50 = vadd.f32 1.0, %v9137_v13  ;;  %vm925_vm2 = vcmp.gt.f32.partialorder %v8916_v39, 20.0  ;;  %v566_v19 = vpop.xlane.xlu0 %565 }
 0x32d   :  { %v2385_v32 = vadd.f32 1.0, %v2384_v40  ;;  %v1301_v9 = vmul.f32 1.442695, %v1054_v2  ;;  %v5121_v37 = vpop.eup %5120  ;;  %v9166_v25 = vsel %vm866_vm9, %v8872_v6, %v1858_v34  ;;  %v2387_v52 = vand.u32 2147483647, %v9036_v24 }
 0x32e   :  { %5128 = vpow2.f32 %v1211_v63  ;;  %v1010_v0 = vmin.f32 %v9147_v4, 20.0  ;;  %vm9170_vm13 = vcmp.lt.f32.partialorder %v3658_v29, 0.0004427343  ;;  %vm9174_vm10 = vcmp.lt.f32.partialorder %v3523_v44, 0.0004427343 }
 0x32f   :  { %v2383_v20 = vmul.f32 0.6931472, %v5117_v58  ;;  %v1271_v11 = vmul.f32 1.442695, %v1039_v54  ;;  %v995_v5 = vmin.f32 %v9154_v41, 20.0  ;;  %v9180_v6 = vadd.f32 %v5588_v26, %v611_v17  ;;  %v479_v54 = vpop.xlane.xlu1 %478 }
 0x330   :  { %v3260_v36 = vadd.f32 1.0, %v3259_v30  ;;  %v3124_v31 = vmul.f32 -0.5, %v9108_v49  ;;  %v3127_v15 = vand.u32 2147483647, %v9108_v49  ;;  %5130 = vlog2.f32 %v3526_v1 }
 0x331   :  { %v3130_v29 = vadd.f32 1.0, %v9166_v25  ;;  %v2386_v44 = vmul.f32 %v9036_v24, %v2385_v32  ;;  %v2123_v60 = vmul.f32 -0.5, %v9087_v21  ;;  %5132 = vpow2.f32 %v1301_v9 }
 0x332   :  { %v4269_v28 = vrot.slane %v3255_v16, %v5705_v57  ;;  %5134 = vlog2.f32 %v3391_v50  ;;  %vm9188_vm7 = vcmp.lt.f32.partialorder %v2387_v52, 0.0004427343  ;;  %v1213_v8 = vmul.f32 1.442695, %v1010_v0 }
 0x333   :  { %v2389_v46 = vsel %vm9188_vm7, %v2386_v44, %v2383_v20  ;;  %5136 = vpow2.f32 %v1271_v11  ;;  %v1183_v55 = vmul.f32 1.442695, %v995_v5  ;;  %v1040_v40 = vmin.f32 %v9180_v6, 20.0  ;;  %v5123_v24 = vpop.eup %5122 }
 0x334   :  { %v3654_v2 = vmul.f32 0.6931472, %v5119_v22  ;;  %v3519_v35 = vmul.f32 0.6931472, %v5121_v37  ;;  %v9196_v63 = vmul.f32 %v3260_v36, %v9103_v56  ;;  %vm9198_vm12 = vcmp.lt.f32.partialorder %v3262_v59, 0.0004427343 }
 0x335   :  { %v3125_v34 = vadd.f32 1.0, %v3124_v31  ;;  %v3529_v58 = vmul.f32 -0.5, %v9132_v42  ;;  %5138 = vlog2.f32 %v3130_v29  ;;  %vm896_vm0 = vcmp.gt.f32.partialorder %v8957_v51, 20.0  ;;  %v5125_v17 = vpop.eup %5124 }
 0x336   :  { %v2124_v16 = vadd.f32 1.0, %v2123_v60  ;;  %v9205_v1 = vadd.f32 %v5588_v26, %v566_v19  ;;  %v3532_v22 = vand.u32 2147483647, %v9132_v42  ;;  %v9211_v56 = vsel %vm925_vm2, %v8916_v39, %v2389_v46  ;;  %v5127_v50 = vpop.eup %5126 }
 0x337   :  { %v2126_v59 = vand.u32 2147483647, %v9087_v21  ;;  %5140 = vpow2.f32 %v1213_v8  ;;  %v2122_v32 = vmul.f32 0.6931472, %v5123_v24  ;;  %v1273_v9 = vmul.f32 1.442695, %v1040_v40 }
 0x338   :  { %5142 = vpow2.f32 %v1183_v55  ;;  %v9215_v37 = vadd.f32 %v5588_v26, %v479_v54  ;;  %v9217_v52 = vpop.eup %5128  ;;  %vm10953_vm1 = vcmask 589312   ;;  %v3660_v39 = vsel %vm9170_vm13, %v9119_v12, %v3654_v2 }
 0x339   :  { %v4270_v0 = vsel %vm10953_vm1, %v4269_v28, %v8892_v38  ;;  %v3525_v20 = vsel %vm9174_vm10, %v9122_v10, %v3519_v35  ;;  %v3394_v11 = vmul.f32 -0.5, %v9137_v13  ;;  %v3258_v5 = vmul.f32 0.6931472, %v5125_v17  ;;  %vm10967_vm10 = vmmov %vm10953_vm1 }
 0x33a   :  { %vm9228_vm5 = vcmp.lt.f32.partialorder %v3127_v15, 0.0004427343  ;;  %v3661_v31 = vadd.f32 1.0, %v9211_v56  ;;  %v2125_v29 = vmul.f32 %v9087_v21, %v2124_v16  ;;  %v1025_v38 = vmin.f32 %v9205_v1, 20.0  ;;  %v5131_v44 = vpop.eup %5130 }
 0x33b   :  { %v3126_v12 = vmul.f32 %v3125_v34, %v9108_v49  ;;  %v3530_v23 = vadd.f32 1.0, %v3529_v58  ;;  %vm9236_vm3 = vcmp.lt.f32.partialorder %v3532_v22, 0.0004427343  ;;  %vm9240_vm11 = vcmp.lt.f32.partialorder %v2126_v59, 0.0004427343  ;;  %v9244_v15 = vpop.eup %5132 }
 0x33c   :  { %v2128_v60 = vsel %vm9240_vm11, %v2125_v29, %v2122_v32  ;;  %v1985_v21 = vadd.f32 1.0, %v9217_v52  ;;  %5144 = vpow2.f32 %v1273_v9  ;;  %v996_v28 = vmin.f32 %v9215_v37, 20.0  ;;  %v5135_v49 = vpop.eup %5134 }
 0x33d   :  { %v4491_v27 = vrot.slane %v3660_v39, %v5675_v33  ;;  %v4417_v8 = vrot.slane %v3525_v20, %v5694_v47  ;;  %v3395_v19 = vadd.f32 1.0, %v3394_v11  ;;  %v3397_v46 = vand.u32 2147483647, %v9137_v13  ;;  %v9253_v55 = vpop.eup %5136 }
 0x33e   :  { %v3264_v40 = vsel %vm9198_vm12, %v9196_v63, %v3258_v5  ;;  %v3123_v24 = vmul.f32 0.6931472, %v5127_v50  ;;  %5146 = vlog2.f32 %v3661_v31  ;;  %v1243_v2 = vmul.f32 1.442695, %v1025_v38 }
 0x33f   :  { %v3528_v35 = vmul.f32 0.6931472, %v5131_v44  ;;  %v3133_v34 = vmul.f32 -0.5, %v9166_v25  ;;  %v9262_v33 = vsel %vm896_vm0, %v8957_v51, %v2128_v60  ;;  %v2390_v54 = vadd.f32 1.0, %v9244_v15  ;;  %v5139_v58 = vpop.eup %5138 }
 0x340   :  { %v3531_v16 = vmul.f32 %v3530_v23, %v9132_v42  ;;  %v3393_v17 = vmul.f32 0.6931472, %v5135_v49  ;;  %5148 = vlog2.f32 %v1985_v21  ;;  %v1185_v30 = vmul.f32 1.442695, %v996_v28 }
 0x341   :  { %v9266_v63 = vpop.eup %5140  ;;  %v9270_v22 = vsel %vm3918_vm15, %v4491_v27, %v9017_v3  ;;  %v4418_v59 = vsel %vm3925_vm6, %v4417_v8, %v8984_v14  ;;  %vm9274_vm9 = vcmp.lt.f32.partialorder %v3397_v46, 0.0004427343  ;;  %v2255_v50 = vadd.f32 1.0, %v9253_v55 }
 0x342   :  { %v9279_v32 = vpop.eup %5142  ;;  %v4274_v42 = vrot.slane %v3264_v40, %v5697_v48  ;;  %v3396_v9 = vmul.f32 %v3395_v19, %v9137_v13  ;;  %v3400_v39 = vadd.f32 1.0, %v9262_v33  ;;  %5150 = vpow2.f32 %v1243_v2 }
 0x343   :  { %v3129_v3 = vsel %vm9228_vm5, %v3126_v12, %v3123_v24  ;;  %v3534_v14 = vsel %vm9236_vm3, %v3531_v16, %v3528_v35  ;;  %v3134_v20 = vadd.f32 1.0, %v3133_v34  ;;  %5152 = vlog2.f32 %v2390_v54 }
 0x344   :  { %v3399_v11 = vsel %vm9274_vm9, %v3396_v9, %v3393_v17  ;;  %v3136_v5 = vand.u32 2147483647, %v9166_v25  ;;  %v1994_v31 = vadd.f32 1.0, %v9266_v63  ;;  %5154 = vpow2.f32 %v1185_v30 }
 0x345   :  { %v3132_v13 = vmul.f32 0.6931472, %v5139_v58  ;;  %v3664_v29 = vmul.f32 -0.5, %v9211_v56  ;;  %5156 = vlog2.f32 %v2255_v50  ;;  %v1859_v36 = vadd.f32 1.0, %v9279_v32  ;;  %v10968_v50 = vld [vmem:[#allocation9_spill] sm:$0xff] }
 0x346   :  { %v9294_v38 = vpop.eup %5144  ;;  %vm10962_vm15 = vcmask 654912   ;;  %5158 = vlog2.f32 %v3400_v39  ;;  %v3403_v12 = vmul.f32 -0.5, %v9262_v33  ;;  %v1988_v23 = vmul.f32 -0.5, %v9217_v52 }
 0x347   :  { %v9297_v44 = vsel %vm10962_vm15, %v4274_v42, %v4270_v0  ;;  %v4200_v10 = vrot.slane %v3129_v3, %v10963_v18  ;;  %v4422_v60 = vrot.slane %v3534_v14, %v5691_v45  ;;  %v4348_v21 = vrot.slane %v3399_v11, %v5705_v57 }
 0x348   :  { %v3135_v28 = vmul.f32 %v3134_v20, %v9166_v25  ;;  %v5147_v49 = vpop.eup %5146  ;;  %vm9305_vm8 = vcmp.lt.f32.partialorder %v3136_v5, 0.0004427343  ;;  %v3667_v0 = vand.u32 2147483647, %v9211_v56  ;;  %v2393_v8 = vmul.f32 -0.5, %v9244_v15 }
 0x349   :  { %5160 = vlog2.f32 %v1994_v31  ;;  %v3665_v46 = vadd.f32 1.0, %v3664_v29  ;;  %v2264_v40 = vadd.f32 1.0, %v9294_v38  ;;  %v3404_v2 = vadd.f32 1.0, %v3403_v12 }
 0x34a   :  { %v3138_v19 = vsel %vm9305_vm8, %v3135_v28, %v3132_v13  ;;  %5162 = vlog2.f32 %v1859_v36  ;;  %v5149_v24 = vpop.eup %5148  ;;  %v3406_v25 = vand.u32 2147483647, %v9262_v33  ;;  %v1989_v35 = vadd.f32 1.0, %v1988_v23  ;;  %v656_v23 = vpop.xlane.xlu0 %655 }
 0x34b   :  { %v1991_v34 = vand.u32 2147483647, %v9217_v52  ;;  %vm10966_vm2 = vcmask 720512   ;;  %v9319_v58 = vsel %vm3932_vm14, %v4422_v60, %v4418_v59  ;;  %v3663_v16 = vmul.f32 0.6931472, %v5147_v49 }
 0x34c   :  { %v4201_v54 = vsel %vm10966_vm2, %v4200_v10, %v8993_v7  ;;  %vm881_vm13 = vcmp.gt.f32.partialorder %v9034_v53, 20.0  ;;  %v2258_v17 = vmul.f32 -0.5, %v9253_v55  ;;  %v9323_v30 = vpop.eup %5150  ;;  %v9327_v51 = vsel %vm10967_vm10, %v4348_v21, %v9031_v62 }
 0x34d   :  { %v4205_v42 = vrot.slane %v3138_v19, %v10968_v50  ;;  %v2394_v9 = vadd.f32 1.0, %v2393_v8  ;;  %v2396_v39 = vand.u32 2147483647, %v9244_v15  ;;  %v5153_v7 = vpop.eup %5152  ;;  %v3666_v59 = vmul.f32 %v3665_v46, %v9211_v56 }
 0x34e   :  { %vm9332_vm7 = vcmp.lt.f32.partialorder %v3667_v0, 0.0004427343  ;;  %v1987_v14 = vmul.f32 0.6931472, %v5149_v24  ;;  %5164 = vlog2.f32 %v2264_v40  ;;  %v9336_v20 = vpop.eup %5154  ;;  %v9339_v11 = vmul.f32 %v3404_v2, %v9262_v33 }
 0x34f   :  { %vm9341_vm12 = vcmp.lt.f32.partialorder %v3406_v25, 0.0004427343  ;;  %v1990_v5 = vmul.f32 %v9217_v52, %v1989_v35  ;;  %vm9346_vm0 = vcmp.lt.f32.partialorder %v1991_v34, 0.0004427343  ;;  %v2261_v56 = vand.u32 2147483647, %v9253_v55  ;;  %v5157_v13 = vpop.eup %5156 }
 0x350   :  { %v3669_v29 = vsel %vm9332_vm7, %v3666_v59, %v3663_v16  ;;  %vm926_vm1 = vcmp.gt.f32.partialorder %v9062_v43, 20.0  ;;  %v2259_v33 = vadd.f32 1.0, %v2258_v17  ;;  %v1997_v36 = vmul.f32 -0.5, %v9266_v63  ;;  %v5159_v10 = vpop.eup %5158 }
 0x351   :  { %v2129_v12 = vadd.f32 1.0, %v9323_v30  ;;  %vm10975_vm5 = vcmask 786112   ;;  %v2395_v60 = vmul.f32 %v9244_v15, %v2394_v9  ;;  %vm9360_vm3 = vcmp.lt.f32.partialorder %v2396_v39, 0.0004427343 }
 0x352   :  { %v9357_v52 = vsel %vm10975_vm5, %v4205_v42, %v4201_v54  ;;  %vm911_vm11 = vcmp.gt.f32.partialorder %v9125_v61, 20.0  ;;  %v1862_v28 = vmul.f32 -0.5, %v9279_v32  ;;  %v1993_v49 = vsel %vm9346_vm0, %v1990_v5, %v1987_v14  ;;  %v569_v42 = vpop.xlane.xlu1 %568 }
 0x353   :  { %v2392_v27 = vmul.f32 0.6931472, %v5153_v7  ;;  %v2000_v0 = vand.u32 2147483647, %v9266_v63  ;;  %v1868_v8 = vadd.f32 1.0, %v9336_v20  ;;  %v5161_v19 = vpop.eup %5160  ;;  %v4496_v46 = vrot.slane %v3669_v29, %v5694_v47 }
 0x354   :  { %v2257_v15 = vmul.f32 0.6931472, %v5157_v13  ;;  %vm9371_vm9 = vcmp.lt.f32.partialorder %v2261_v56, 0.0004427343  ;;  %v9376_v24 = vadd.f32 %v5588_v26, %v656_v23  ;;  %v5163_v2 = vpop.eup %5162  ;;  %v3402_v25 = vmul.f32 0.6931472, %v5159_v10 }
 0x355   :  { %v2260_v35 = vmul.f32 %v9253_v55, %v2259_v33  ;;  %v1998_v34 = vadd.f32 1.0, %v1997_v36  ;;  %5166 = vlog2.f32 %v2129_v12  ;;  %v9382_v54 = vsel %vm881_vm13, %v9034_v53, %v1993_v49 }
 0x356   :  { %vm882_vm15 = vcmp.gt.f32.partialorder %v9147_v4, 20.0  ;;  %vm867_vm8 = vcmp.gt.f32.partialorder %v9154_v41, 20.0  ;;  %v1863_v47 = vadd.f32 1.0, %v1862_v28  ;;  %v1865_v16 = vand.u32 2147483647, %v9279_v32  ;;  %v659_v21 = vpop.xlane.xlu1 %658 }
 0x357   :  { %v2267_v17 = vmul.f32 -0.5, %v9294_v38  ;;  %v2398_v55 = vsel %vm9360_vm3, %v2395_v60, %v2392_v27  ;;  %v1996_v9 = vmul.f32 0.6931472, %v5161_v19  ;;  %vm9390_vm2 = vcmp.lt.f32.partialorder %v2000_v0, 0.0004427343 }
 0x358   :  { %5168 = vlog2.f32 %v1868_v8  ;;  %v9396_v53 = vsel %vm3925_vm6, %v4496_v46, %v9270_v22  ;;  %v2263_v7 = vsel %vm9371_vm9, %v2260_v35, %v2257_v15  ;;  %v1861_v59 = vmul.f32 0.6931472, %v5163_v2  ;;  %v5165_v14 = vpop.eup %5164  ;;  %v524_v22 = vpop.xlane.xlu0 %523 }
 0x359   :  { %v1055_v3 = vmin.f32 %v9376_v24, 20.0  ;;  %v3408_v5 = vsel %vm9341_vm12, %v9339_v11, %v3402_v25  ;;  %v3265_v31 = vadd.f32 1.0, %v9382_v54  ;;  %v1999_v56 = vmul.f32 %v9266_v63, %v1998_v34 }
 0x35a   :  { %v9407_v13 = vadd.f32 %v5588_v26, %v569_v42  ;;  %v9412_v29 = vsel %vm926_vm1, %v9062_v43, %v2398_v55  ;;  %v1864_v33 = vmul.f32 %v9279_v32, %v1863_v47  ;;  %vm9415_vm6 = vcmp.lt.f32.partialorder %v1865_v16, 0.0004427343 }
 0x35b   :  { %vm912_vm13 = vcmp.gt.f32.partialorder %v9180_v6, 20.0  ;;  %v2268_v11 = vadd.f32 1.0, %v2267_v17  ;;  %v9423_v63 = vsel %vm911_vm11, %v9125_v61, %v2263_v7  ;;  %v2002_v62 = vsel %vm9390_vm2, %v1999_v56, %v1996_v9  ;;  %v527_v7 = vpop.xlane.xlu1 %526 }
 0x35c   :  { %v2270_v43 = vand.u32 2147483647, %v9294_v38  ;;  %v2132_v12 = vmul.f32 -0.5, %v9323_v30  ;;  %v1867_v32 = vsel %vm9415_vm6, %v1864_v33, %v1861_v59  ;;  %v2266_v23 = vmul.f32 0.6931472, %v5165_v14  ;;  %v614_v35 = vpop.xlane.xlu0 %613 }
 0x35d   :  { %v1303_v10 = vmul.f32 1.442695, %v1055_v3  ;;  %v9432_v60 = vadd.f32 %v5588_v26, %v524_v22  ;;  %5170 = vlog2.f32 %v3265_v31  ;;  %v3268_v61 = vmul.f32 -0.5, %v9382_v54 }
 0x35e   :  { %v3271_v28 = vand.u32 2147483647, %v9382_v54  ;;  %v1026_v49 = vmin.f32 %v9407_v13, 20.0  ;;  %v3670_v27 = vadd.f32 1.0, %v9412_v29  ;;  %v3535_v0 = vadd.f32 1.0, %v9423_v63 }
 0x35f   :  { %v2269_v8 = vmul.f32 %v9294_v38, %v2268_v11  ;;  %v1871_v19 = vmul.f32 -0.5, %v9336_v20  ;;  %v5167_v46 = vpop.eup %5166  ;;  %v9444_v15 = vsel %vm882_vm15, %v9147_v4, %v2002_v62  ;;  %v9449_v40 = vsel %vm867_vm8, %v9154_v41, %v1867_v32 }
 0x360   :  { %vm9451_vm10 = vcmp.lt.f32.partialorder %v2270_v43, 0.0004427343  ;;  %v2133_v25 = vadd.f32 1.0, %v2132_v12  ;;  %vm897_vm7 = vcmp.gt.f32.partialorder %v9205_v1, 20.0  ;;  %5172 = vpow2.f32 %v1303_v10  ;;  %v482_v62 = vpop.xlane.xlu0 %481 }
 0x361   :  { %v2272_v38 = vsel %vm9451_vm10, %v2269_v8, %v2266_v23  ;;  %v1011_v4 = vmin.f32 %v9432_v60, 20.0  ;;  %v9460_v34 = vadd.f32 %v5588_v26, %v659_v21  ;;  %v9463_v41 = vrot.slane %v3408_v5, %v5697_v48 }
 0x362   :  { %v5169_v47 = vpop.eup %5168  ;;  %v3269_v16 = vadd.f32 1.0, %v3268_v61  ;;  %v2135_v17 = vand.u32 2147483647, %v9323_v30  ;;  %v1245_v42 = vmul.f32 1.442695, %v1026_v49  ;;  %5174 = vlog2.f32 %v3670_v27  ;;  %v617_v27 = vpop.xlane.xlu1 %616 }
 0x363   :  { %v3274_v55 = vadd.f32 1.0, %v9444_v15  ;;  %v2131_v9 = vmul.f32 0.6931472, %v5167_v46  ;;  %vm868_vm12 = vcmp.gt.f32.partialorder %v9215_v37, 20.0  ;;  %v1872_v39 = vadd.f32 1.0, %v1871_v19 }
 0x364   :  { %5176 = vlog2.f32 %v3535_v0  ;;  %v3139_v59 = vadd.f32 1.0, %v9449_v40  ;;  %v9472_v3 = vsel %vm912_vm13, %v9180_v6, %v2272_v38  ;;  %v1874_v14 = vand.u32 2147483647, %v9336_v20 }
 0x365   :  { %v2134_v5 = vmul.f32 %v9323_v30, %v2133_v25  ;;  %v1870_v31 = vmul.f32 0.6931472, %v5169_v47  ;;  %v1215_v56 = vmul.f32 1.442695, %v1011_v4  ;;  %v1056_v22 = vmin.f32 %v9460_v34, 20.0 }
 0x366   :  { %v3673_v33 = vmul.f32 -0.5, %v9412_v29  ;;  %v3676_v36 = vand.u32 2147483647, %v9412_v29  ;;  %vm9479_vm0 = vcmp.lt.f32.partialorder %v2135_v17, 0.0004427343  ;;  %5178 = vpow2.f32 %v1245_v42 }
 0x367   :  { %5180 = vlog2.f32 %v3274_v55  ;;  %v3544_v6 = vadd.f32 1.0, %v9472_v3  ;;  %v2137_v30 = vsel %vm9479_vm0, %v2134_v5, %v2131_v9  ;;  %v1873_v43 = vmul.f32 %v9336_v20, %v1872_v39  ;;  %v5171_v12 = vpop.eup %5170 }
 0x368   :  { %v3538_v32 = vmul.f32 -0.5, %v9423_v63  ;;  %5182 = vlog2.f32 %v3139_v59  ;;  %vm9488_vm1 = vcmp.lt.f32.partialorder %v1874_v14, 0.0004427343  ;;  %v9493_v10 = vadd.f32 %v5588_v26, %v527_v7 }
 0x369   :  { %vm9495_vm5 = vcmp.lt.f32.partialorder %v3271_v28, 0.0004427343  ;;  %v1876_v61 = vsel %vm9488_vm1, %v1873_v43, %v1870_v31  ;;  %5184 = vpow2.f32 %v1215_v56  ;;  %v1305_v20 = vmul.f32 1.442695, %v1056_v22 }
 0x36a   :  { %v9502_v49 = vadd.f32 %v5588_v26, %v482_v62  ;;  %v3270_v0 = vmul.f32 %v3269_v16, %v9382_v54  ;;  %v3674_v8 = vadd.f32 1.0, %v3673_v33  ;;  %v9508_v19 = vsel %vm897_vm7, %v9205_v1, %v2137_v30  ;;  %v9513_v46 = vpop.eup %5172 }
 0x36b   :  { %v9511_v28 = vadd.f32 %v5588_v26, %v614_v35  ;;  %vm9515_vm3 = vcmp.lt.f32.partialorder %v3676_v36, 0.0004427343  ;;  %v3541_v25 = vand.u32 2147483647, %v9423_v63  ;;  %v3277_v38 = vmul.f32 -0.5, %v9444_v15 }
 0x36c   :  { %5186 = vlog2.f32 %v3544_v6  ;;  %v3539_v54 = vadd.f32 1.0, %v3538_v32  ;;  %v9524_v1 = vsel %vm868_vm12, %v9215_v37, %v1876_v61  ;;  %v1012_v35 = vmin.f32 %v9493_v10, 20.0  ;;  %v5175_v47 = vpop.eup %5174 }
 0x36d   :  { %v9528_v4 = vadd.f32 %v5588_v26, %v617_v27  ;;  %v3280_v16 = vand.u32 2147483647, %v9444_v15  ;;  %v3409_v17 = vadd.f32 1.0, %v9508_v19  ;;  %5188 = vpow2.f32 %v1305_v20 }
 0x36e   :  { %v997_v42 = vmin.f32 %v9502_v49, 20.0  ;;  %v5177_v55 = vpop.eup %5176  ;;  %v3267_v9 = vmul.f32 0.6931472, %v5171_v12  ;;  %v3675_v39 = vmul.f32 %v3674_v8, %v9412_v29  ;;  %v2399_v37 = vadd.f32 1.0, %v9513_v46 }
 0x36f   :  { %v1041_v7 = vmin.f32 %v9511_v28, 20.0  ;;  %vm9536_vm11 = vcmp.lt.f32.partialorder %v3541_v25, 0.0004427343  ;;  %v3278_v14 = vadd.f32 1.0, %v3277_v38  ;;  %v3142_v5 = vmul.f32 -0.5, %v9449_v40 }
 0x370   :  { %v3148_v31 = vadd.f32 1.0, %v9524_v1  ;;  %v9542_v56 = vpop.eup %5178  ;;  %v3672_v22 = vmul.f32 0.6931472, %v5175_v47  ;;  %v3540_v33 = vmul.f32 %v3539_v54, %v9423_v63  ;;  %v1217_v36 = vmul.f32 1.442695, %v1012_v35 }
 0x371   :  { %v1042_v29 = vmin.f32 %v9528_v4, 20.0  ;;  %v5181_v11 = vpop.eup %5180  ;;  %v3537_v62 = vmul.f32 0.6931472, %v5177_v55  ;;  %vm9546_vm9 = vcmp.lt.f32.partialorder %v3280_v16, 0.0004427343  ;;  %5190 = vlog2.f32 %v3409_v17 }
 0x372   :  { %v1187_v30 = vmul.f32 1.442695, %v997_v42  ;;  %v5183_v43 = vpop.eup %5182  ;;  %v3273_v12 = vsel %vm9495_vm5, %v3270_v0, %v3267_v9  ;;  %v3547_v32 = vmul.f32 -0.5, %v9472_v3  ;;  %5192 = vlog2.f32 %v2399_v37 }
 0x373   :  { %v1275_v23 = vmul.f32 1.442695, %v1041_v7  ;;  %v9553_v63 = vpop.eup %5184  ;;  %v3279_v61 = vmul.f32 %v3278_v14, %v9444_v15  ;;  %v3143_v20 = vadd.f32 1.0, %v3142_v5  ;;  %5194 = vlog2.f32 %v3148_v31 }
 0x374   :  { %v2138_v27 = vadd.f32 1.0, %v9542_v56  ;;  %v3678_v8 = vsel %vm9515_vm3, %v3675_v39, %v3672_v22  ;;  %v3276_v25 = vmul.f32 0.6931472, %v5181_v11  ;;  %5196 = vpow2.f32 %v1217_v36 }
 0x375   :  { %v1277_v38 = vmul.f32 1.442695, %v1042_v29  ;;  %v4279_v0 = vrot.slane %v3273_v12, %v10963_v18  ;;  %v3543_v54 = vsel %vm9536_vm11, %v3540_v33, %v3537_v62  ;;  %v3145_v35 = vand.u32 2147483647, %v9449_v40  ;;  %v11004_v12 = vld [vmem:[#allocation12_spill] sm:$0xff] }
 0x376   :  { %v5187_v21 = vpop.eup %5186  ;;  %5198 = vpow2.f32 %v1187_v30  ;;  %v3141_v15 = vmul.f32 0.6931472, %v5183_v43  ;;  %v3548_v47 = vadd.f32 1.0, %v3547_v32  ;;  %v2003_v16 = vadd.f32 1.0, %v9553_v63 }
 0x377   :  { %5200 = vpow2.f32 %v1275_v23  ;;  %v9564_v17 = vpop.eup %5188  ;;  %v4501_v2 = vrot.slane %v3678_v8, %v5691_v45  ;;  %v3144_v42 = vmul.f32 %v3143_v20, %v9449_v40  ;;  %v3550_v55 = vand.u32 2147483647, %v9472_v3 }
 0x378   :  { %5202 = vlog2.f32 %v2138_v27  ;;  %v3282_v9 = vsel %vm9546_vm9, %v3279_v61, %v3276_v25  ;;  %v3546_v39 = vmul.f32 0.6931472, %v5187_v21  ;;  %v3412_v37 = vmul.f32 -0.5, %v9508_v19 }
 0x379   :  { %5204 = vpow2.f32 %v1277_v38  ;;  %v4427_v7 = vrot.slane %v3543_v54, %v5705_v57  ;;  %vm9573_vm15 = vcmp.lt.f32.partialorder %v3145_v35, 0.0004427343  ;;  %v3151_v45 = vmul.f32 -0.5, %v9524_v1  ;;  %v572_v54 = vpop.xlane.xlu0 %571 }
 0x37a   :  { %v2402_v40 = vmul.f32 -0.5, %v9513_v46  ;;  %v3147_v14 = vsel %vm9573_vm15, %v3144_v42, %v3141_v15  ;;  %v3549_v5 = vmul.f32 %v3548_v47, %v9472_v3  ;;  %5206 = vlog2.f32 %v2003_v16 }
 0x37b   :  { %v2408_v31 = vadd.f32 1.0, %v9564_v17  ;;  %v5191_v22 = vpop.eup %5190  ;;  %vm11000_vm8 = vcmask 654912   ;;  %v4284_v36 = vrot.slane %v3282_v9, %v10968_v50  ;;  %vm9589_vm2 = vcmp.lt.f32.partialorder %v3550_v55, 0.0004427343 }
 0x37c   :  { %v9586_v33 = vsel %vm11000_vm8, %v9463_v41, %v9327_v51  ;;  %v3415_v11 = vand.u32 2147483647, %v9508_v19  ;;  %v5193_v62 = vpop.eup %5192  ;;  %vm11003_vm6 = vcmask 720512   ;;  %v3552_v6 = vsel %vm9589_vm2, %v3549_v5, %v3546_v39  ;;  %vm11014_vm3 = vmmov %vm11000_vm8 }
 0x37d   :  { %v4280_v3 = vsel %vm11003_vm6, %v4279_v0, %v9297_v44  ;;  %v3413_v30 = vadd.f32 1.0, %v3412_v37  ;;  %v3154_v43 = vand.u32 2147483647, %v9524_v1  ;;  %v5195_v51 = vpop.eup %5194  ;;  %v9601_v41 = vsel %vm3932_vm14, %v4501_v2, %v9396_v53  ;;  %vm11021_vm2 = vmmov %vm11003_vm6 }
 0x37e   :  { %v4210_v32 = vrot.slane %v3147_v14, %v11004_v12  ;;  %v3152_v23 = vadd.f32 1.0, %v3151_v45  ;;  %vm927_vm13 = vcmp.gt.f32.partialorder %v9376_v24, 20.0  ;;  %v2403_v61 = vadd.f32 1.0, %v2402_v40  ;;  %v9605_v20 = vpop.eup %5196 }
 0x37f   :  { %vm11005_vm10 = vcmask 589312   ;;  %v2405_v27 = vand.u32 2147483647, %v9513_v46  ;;  %v2141_v8 = vmul.f32 -0.5, %v9542_v56  ;;  %5208 = vlog2.f32 %v2408_v31 }
 0x380   :  { %v4428_v44 = vsel %vm11005_vm10, %v4427_v7, %v9319_v58  ;;  %v9611_v25 = vpop.eup %5198  ;;  %vm11006_vm14 = vcmask 786112   ;;  %v4432_v38 = vrot.slane %v3552_v6, %v5697_v48  ;;  %vm9617_vm7 = vcmp.lt.f32.partialorder %v3415_v11, 0.0004427343 }
 0x381   :  { %v9614_v53 = vsel %vm11006_vm14, %v4284_v36, %v4280_v3  ;;  %v2401_v0 = vmul.f32 0.6931472, %v5193_v62  ;;  %v9621_v35 = vpop.eup %5200  ;;  %v3411_v58 = vmul.f32 0.6931472, %v5191_v22  ;;  %v3414_v15 = vmul.f32 %v3413_v30, %v9508_v19 }
 0x382   :  { %vm9624_vm12 = vcmp.lt.f32.partialorder %v3154_v43, 0.0004427343  ;;  %v2006_v16 = vmul.f32 -0.5, %v9553_v63  ;;  %v5203_v2 = vpop.eup %5202  ;;  %vm11011_vm0 = vcmask 851712   ;;  %v3153_v55 = vmul.f32 %v3152_v23, %v9524_v1 }
 0x383   :  { %v9631_v42 = vsel %vm11011_vm0, %v4210_v32, %v9357_v52  ;;  %v2404_v9 = vmul.f32 %v9513_v46, %v2403_v61  ;;  %v2012_v39 = vadd.f32 1.0, %v9605_v20  ;;  %v9636_v37 = vpop.eup %5204  ;;  %vm9638_vm1 = vcmp.lt.f32.partialorder %v2405_v27, 0.0004427343  ;;  %v485_v61 = vpop.xlane.xlu1 %484 }
 0x384   :  { %vm898_vm5 = vcmp.gt.f32.partialorder %v9407_v13, 20.0  ;;  %v2142_v7 = vadd.f32 1.0, %v2141_v8  ;;  %v1877_v59 = vadd.f32 1.0, %v9611_v25  ;;  %v9645_v52 = vadd.f32 %v5588_v26, %v572_v54  ;;  %v5207_v14 = vpop.eup %5206 }
 0x385   :  { %v9648_v1 = vsel %vm11014_vm3, %v4432_v38, %v4428_v44  ;;  %v3150_v46 = vmul.f32 0.6931472, %v5195_v51  ;;  %v2407_v45 = vsel %vm9638_vm1, %v2404_v9, %v2401_v0  ;;  %v2144_v40 = vand.u32 2147483647, %v9542_v56  ;;  %v11018_v0 = vld [vmem:[#allocation11_spill] sm:$0xff] }
 0x386   :  { %11015 = vst [vmem:[#allocation6_spill] sm:$0xff] %v9648_v1  ;;  %v3417_v5 = vsel %vm9617_vm7, %v3414_v15, %v3411_v58  ;;  %v2140_v31 = vmul.f32 0.6931472, %v5203_v2  ;;  %v2007_v22 = vadd.f32 1.0, %v2006_v16  ;;  %v2273_v36 = vadd.f32 1.0, %v9621_v35 }
 0x387   :  { %vm883_vm11 = vcmp.gt.f32.partialorder %v9432_v60, 20.0  ;;  %v2009_v29 = vand.u32 2147483647, %v9553_v63  ;;  %v2411_v11 = vmul.f32 -0.5, %v9564_v17  ;;  %5210 = vlog2.f32 %v2012_v39 }
 0x388   :  { %v2282_v62 = vadd.f32 1.0, %v9636_v37  ;;  %v9663_v3 = vsel %vm927_vm13, %v9376_v24, %v2407_v45  ;;  %v2143_v6 = vmul.f32 %v9542_v56, %v2142_v7  ;;  %5212 = vlog2.f32 %v1877_v59  ;;  %v662_v45 = vpop.xlane.xlu0 %661 }
 0x389   :  { %v1027_v30 = vmin.f32 %v9645_v52, 20.0  ;;  %v4358_v43 = vrot.slane %v3417_v5, %v10963_v18  ;;  %v3156_v51 = vsel %vm9624_vm12, %v3153_v55, %v3150_v46  ;;  %vm9670_vm9 = vcmp.lt.f32.partialorder %v2144_v40, 0.0004427343  ;;  %v5209_v44 = vpop.eup %5208 }
 0x38a   :  { %v2005_v23 = vmul.f32 0.6931472, %v5207_v14  ;;  %v2146_v24 = vsel %vm9670_vm9, %v2143_v6, %v2140_v31  ;;  %v2008_v56 = vmul.f32 %v9553_v63, %v2007_v22  ;;  %v2414_v27 = vand.u32 2147483647, %v9564_v17 }
 0x38b   :  { %5214 = vlog2.f32 %v2273_v36  ;;  %v3679_v8 = vadd.f32 1.0, %v9663_v3  ;;  %vm928_vm15 = vcmp.gt.f32.partialorder %v9460_v34, 20.0  ;;  %v2412_v38 = vadd.f32 1.0, %v2411_v11 }
 0x38c   :  { %v2276_v21 = vmul.f32 -0.5, %v9621_v35  ;;  %5216 = vlog2.f32 %v2282_v62  ;;  %v4215_v54 = vrot.slane %v3156_v51, %v11018_v0  ;;  %vm9682_vm8 = vcmp.lt.f32.partialorder %v2009_v29, 0.0004427343 }
 0x38d   :  { %v1247_v15 = vmul.f32 1.442695, %v1027_v30  ;;  %v9687_v63 = vadd.f32 %v5588_v26, %v485_v61  ;;  %v9692_v47 = vsel %vm898_vm5, %v9407_v13, %v2146_v24  ;;  %v2011_v16 = vsel %vm9682_vm8, %v2008_v56, %v2005_v23  ;;  %v575_v23 = vpop.xlane.xlu1 %574 }
 0x38e   :  { %v2410_v2 = vmul.f32 0.6931472, %v5209_v44  ;;  %v2015_v55 = vmul.f32 -0.5, %v9605_v20  ;;  %v9699_v9 = vsel %vm11021_vm2, %v4358_v43, %v9586_v33  ;;  %vm9701_vm6 = vcmp.lt.f32.partialorder %v2414_v27, 0.0004427343 }
 0x38f   :  { %v2279_v19 = vand.u32 2147483647, %v9621_v35  ;;  %v1880_v7 = vmul.f32 -0.5, %v9611_v25  ;;  %5218 = vlog2.f32 %v3679_v8  ;;  %v2413_v13 = vmul.f32 %v9564_v17, %v2412_v38 }
 0x390   :  { %v2277_v59 = vadd.f32 1.0, %v2276_v21  ;;  %v2018_v46 = vand.u32 2147483647, %v9605_v20  ;;  %v3418_v40 = vadd.f32 1.0, %v9692_v47  ;;  %v9713_v33 = vsel %vm883_vm11, %v9432_v60, %v2011_v16 }
 0x391   :  { %5220 = vpow2.f32 %v1247_v15  ;;  %v998_v14 = vmin.f32 %v9687_v63, 20.0  ;;  %v5211_v5 = vpop.eup %5210  ;;  %v9718_v31 = vsel %vm3974_vm4, %v4215_v54, %v9631_v42  ;;  %v3682_v17 = vmul.f32 -0.5, %v9663_v3 }
 0x392   :  { %v2416_v22 = vsel %vm9701_vm6, %v2413_v13, %v2410_v2  ;;  %v2016_v36 = vadd.f32 1.0, %v2015_v55  ;;  %v5213_v29 = vpop.eup %5212  ;;  %vm9723_vm13 = vcmp.lt.f32.partialorder %v2279_v19, 0.0004427343  ;;  %vm884_vm10 = vcmp.gt.f32.partialorder %v9493_v10, 20.0 }
 0x393   :  { %v1881_v60 = vadd.f32 1.0, %v1880_v7  ;;  %v1883_v62 = vand.u32 2147483647, %v9611_v25  ;;  %v2285_v6 = vmul.f32 -0.5, %v9636_v37  ;;  %v9731_v42 = vadd.f32 %v5588_v26, %v662_v45  ;;  %v530_v7 = vpop.xlane.xlu0 %529 }
 0x394   :  { %v3685_v30 = vand.u32 2147483647, %v9663_v3  ;;  %v3283_v43 = vadd.f32 1.0, %v9713_v33  ;;  %v2278_v51 = vmul.f32 %v9621_v35, %v2277_v59  ;;  %vm9736_vm14 = vcmp.lt.f32.partialorder %v2018_v46, 0.0004427343 }
 0x395   :  { %vm869_vm7 = vcmp.gt.f32.partialorder %v9502_v49, 20.0  ;;  %v5215_v61 = vpop.eup %5214  ;;  %5222 = vlog2.f32 %v3418_v40  ;;  %v9744_v44 = vsel %vm928_vm15, %v9460_v34, %v2416_v22  ;;  %v2014_v24 = vmul.f32 0.6931472, %v5211_v5 }
 0x396   :  { %v1189_v56 = vmul.f32 1.442695, %v998_v14  ;;  %v5217_v27 = vpop.eup %5216  ;;  %v3683_v8 = vadd.f32 1.0, %v3682_v17  ;;  %v3421_v35 = vmul.f32 -0.5, %v9692_v47  ;;  %vm913_vm12 = vcmp.gt.f32.partialorder %v9511_v28, 20.0  ;;  %v665_v14 = vpop.xlane.xlu1 %664 }
 0x397   :  { %v2017_v38 = vmul.f32 %v9605_v20, %v2016_v36  ;;  %v1879_v21 = vmul.f32 0.6931472, %v5213_v29  ;;  %v1882_v54 = vmul.f32 %v9611_v25, %v1881_v60  ;;  %vm9750_vm0 = vcmp.lt.f32.partialorder %v1883_v62, 0.0004427343 }
 0x398   :  { %vm914_vm1 = vcmp.gt.f32.partialorder %v9528_v4, 20.0  ;;  %v2286_v34 = vadd.f32 1.0, %v2285_v6  ;;  %v1057_v15 = vmin.f32 %v9731_v42, 20.0  ;;  %5224 = vlog2.f32 %v3283_v43 }
 0x399   :  { %v3688_v16 = vadd.f32 1.0, %v9744_v44  ;;  %v2275_v2 = vmul.f32 0.6931472, %v5215_v61  ;;  %v2288_v55 = vand.u32 2147483647, %v9636_v37  ;;  %v2020_v25 = vsel %vm9736_vm14, %v2017_v38, %v2014_v24  ;;  %v5219_v13 = vpop.eup %5218 }
 0x39a   :  { %vm9758_vm5 = vcmp.lt.f32.partialorder %v3685_v30, 0.0004427343  ;;  %v2284_v39 = vmul.f32 0.6931472, %v5217_v27  ;;  %5226 = vpow2.f32 %v1189_v56  ;;  %v9765_v19 = vadd.f32 %v5588_v26, %v575_v23 }
 0x39b   :  { %v3684_v59 = vmul.f32 %v3683_v8, %v9663_v3  ;;  %v3422_v46 = vadd.f32 1.0, %v3421_v35  ;;  %v3424_v45 = vand.u32 2147483647, %v9692_v47  ;;  %v1885_v40 = vsel %vm9750_vm0, %v1882_v54, %v1879_v21  ;;  %v9771_v5 = vpop.eup %5220  ;;  %v578_v35 = vpop.xlane.xlu1 %577 }
 0x39c   :  { %v3286_v17 = vmul.f32 -0.5, %v9713_v33  ;;  %v3289_v22 = vand.u32 2147483647, %v9713_v33  ;;  %v2287_v36 = vmul.f32 %v9636_v37, %v2286_v34  ;;  %v1307_v29 = vmul.f32 1.442695, %v1057_v15 }
 0x39d   :  { %v2281_v60 = vsel %vm9723_vm13, %v2278_v51, %v2275_v2  ;;  %v9781_v3 = vsel %vm884_vm10, %v9493_v10, %v2020_v25  ;;  %vm9783_vm3 = vcmp.lt.f32.partialorder %v2288_v55, 0.0004427343  ;;  %v9788_v6 = vadd.f32 %v5588_v26, %v530_v7  ;;  %v620_v25 = vpop.xlane.xlu0 %619 }
 0x39e   :  { %5228 = vlog2.f32 %v3688_v16  ;;  %v9793_v37 = vsel %vm869_vm7, %v9502_v49, %v1885_v40  ;;  %v2290_v11 = vsel %vm9783_vm3, %v2287_v36, %v2284_v39  ;;  %v1028_v30 = vmin.f32 %v9765_v19, 20.0 }
 0x39f   :  { %v3681_v10 = vmul.f32 0.6931472, %v5219_v13  ;;  %v3423_v43 = vmul.f32 %v3422_v46, %v9692_v47  ;;  %vm9799_vm11 = vcmp.lt.f32.partialorder %v3424_v45, 0.0004427343  ;;  %v2147_v32 = vadd.f32 1.0, %v9771_v5  ;;  %v5223_v23 = vpop.eup %5222 }
 0x3a0   :  { %v3287_v61 = vadd.f32 1.0, %v3286_v17  ;;  %v9807_v49 = vsel %vm913_vm12, %v9511_v28, %v2281_v60  ;;  %v3292_v24 = vadd.f32 1.0, %v9781_v3  ;;  %5230 = vpow2.f32 %v1307_v29 }
 0x3a1   :  { %v3691_v56 = vmul.f32 -0.5, %v9744_v44  ;;  %v3157_v47 = vadd.f32 1.0, %v9793_v37  ;;  %v9815_v27 = vsel %vm914_vm1, %v9528_v4, %v2290_v11  ;;  %v1013_v8 = vmin.f32 %v9788_v6, 20.0 }
 0x3a2   :  { %vm9818_vm9 = vcmp.lt.f32.partialorder %v3289_v22, 0.0004427343  ;;  %v3694_v28 = vand.u32 2147483647, %v9744_v44  ;;  %v1249_v21 = vmul.f32 1.442695, %v1028_v30  ;;  %v9824_v54 = vadd.f32 %v5588_v26, %v665_v14  ;;  %v5225_v58 = vpop.eup %5224 }
 0x3a3   :  { %v3687_v34 = vsel %vm9758_vm5, %v3684_v59, %v3681_v10  ;;  %v3420_v15 = vmul.f32 0.6931472, %v5223_v23  ;;  %v3553_v4 = vadd.f32 1.0, %v9807_v49  ;;  %5232 = vlog2.f32 %v2147_v32  ;;  %v533_v23 = vpop.xlane.xlu0 %532 }
 0x3a4   :  { %v9829_v16 = vpop.eup %5226  ;;  %v3556_v2 = vmul.f32 -0.5, %v9807_v49  ;;  %5234 = vlog2.f32 %v3292_v24  ;;  %v3562_v55 = vadd.f32 1.0, %v9815_v27  ;;  %v9834_v39 = vadd.f32 %v5588_v26, %v578_v35 }
 0x3a5   :  { %v3288_v7 = vmul.f32 %v3287_v61, %v9713_v33  ;;  %v3692_v13 = vadd.f32 1.0, %v3691_v56  ;;  %5236 = vlog2.f32 %v3157_v47  ;;  %v1219_v20 = vmul.f32 1.442695, %v1013_v8 }
 0x3a6   :  { %v4506_v59 = vrot.slane %v3687_v34, %v5705_v57  ;;  %vm9838_vm15 = vcmp.lt.f32.partialorder %v3694_v28, 0.0004427343  ;;  %v3295_v45 = vmul.f32 -0.5, %v9781_v3  ;;  %5238 = vpow2.f32 %v1249_v21 }
 0x3a7   :  { %v1058_v40 = vmin.f32 %v9824_v54, 20.0  ;;  %v3426_v14 = vsel %vm9799_vm11, %v3423_v43, %v3420_v15  ;;  %v3285_v17 = vmul.f32 0.6931472, %v5225_v58  ;;  %5240 = vlog2.f32 %v3553_v4 }
 0x3a8   :  { %v1886_v33 = vadd.f32 1.0, %v9829_v16  ;;  %v5229_v22 = vpop.eup %5228  ;;  %v3557_v36 = vadd.f32 1.0, %v3556_v2  ;;  %5242 = vlog2.f32 %v3562_v55  ;;  %v9848_v57 = vadd.f32 %v5588_v26, %v620_v25 }
 0x3a9   :  { %v1029_v29 = vmin.f32 %v9834_v39, 20.0  ;;  %v3693_v60 = vmul.f32 %v3692_v13, %v9744_v44  ;;  %v3559_v62 = vand.u32 2147483647, %v9807_v49  ;;  %v3298_v11 = vand.u32 2147483647, %v9781_v3 }
 0x3aa   :  { %5244 = vpow2.f32 %v1219_v20  ;;  %v9854_v30 = vpop.eup %5230  ;;  %v4363_v10 = vrot.slane %v3426_v14, %v10968_v50  ;;  %v3296_v43 = vadd.f32 1.0, %v3295_v45  ;;  %v2150_v51 = vmul.f32 -0.5, %v9771_v5 }
 0x3ab   :  { %vm4545_vm8 = vcmask 1042434   ;;  %v1309_v32 = vmul.f32 1.442695, %v1058_v40  ;;  %v3291_v61 = vsel %vm9818_vm9, %v3288_v7, %v3285_v17  ;;  %v3690_v24 = vmul.f32 0.6931472, %v5229_v22 }
 0x3ac   :  { %v3160_v44 = vmul.f32 -0.5, %v9793_v37  ;;  %5246 = vlog2.f32 %v1886_v33  ;;  %vm11040_vm2 = vcmask 589312   ;;  %v9864_v47 = vmul.f32 %v3557_v36, %v9807_v49 }
 0x3ad   :  { %v4507_v56 = vsel %vm11040_vm2, %v4506_v59, %v9601_v41  ;;  %v1043_v8 = vmin.f32 %v9848_v57, 20.0  ;;  %v1251_v35 = vmul.f32 1.442695, %v1029_v29  ;;  %v5233_v28 = vpop.eup %5232  ;;  %vm9867_vm6 = vcmp.lt.f32.partialorder %v3298_v11, 0.0004427343 }
 0x3ae   :  { %v3163_v38 = vand.u32 2147483647, %v9793_v37  ;;  %v2417_v58 = vadd.f32 1.0, %v9854_v30  ;;  %v9874_v34 = vadd.f32 %v5588_v26, %v533_v23  ;;  %v5235_v15 = vpop.eup %5234  ;;  %v4289_v41 = vrot.slane %v3291_v61, %v11004_v12 }
 0x3af   :  { %v3297_v49 = vmul.f32 %v3296_v43, %v9781_v3  ;;  %vm899_vm13 = vcmp.gt.f32.partialorder %v9645_v52, 20.0  ;;  %v2151_v4 = vadd.f32 1.0, %v2150_v51  ;;  %5248 = vpow2.f32 %v1309_v32  ;;  %v5237_v2 = vpop.eup %5236 }
 0x3b0   :  { %vm11043_vm10 = vcmask 786112   ;;  %v3696_v25 = vsel %vm9838_vm15, %v3693_v60, %v3690_v24  ;;  %vm9885_vm14 = vcmp.lt.f32.partialorder %v3559_v62, 0.0004427343  ;;  %v3161_v13 = vadd.f32 1.0, %v3160_v44  ;;  %v9890_v3 = vpop.eup %5238  ;;  %v11051_v24 = vld [vmem:[#allocation8_spill] sm:$0xff] }
 0x3b1   :  { %v9881_v55 = vsel %vm11043_vm10, %v4363_v10, %v9699_v9  ;;  %v2153_v20 = vand.u32 2147483647, %v9771_v5  ;;  %v3565_v59 = vmul.f32 -0.5, %v9815_v27  ;;  %v2149_v45 = vmul.f32 0.6931472, %v5233_v28  ;;  %v5241_v14 = vpop.eup %5240 }
 0x3b2   :  { %v1279_v40 = vmul.f32 1.442695, %v1043_v8  ;;  %5250 = vpow2.f32 %v1251_v35  ;;  %v3294_v9 = vmul.f32 0.6931472, %v5235_v15  ;;  %vm9893_vm7 = vcmp.lt.f32.partialorder %v3163_v38, 0.0004427343  ;;  %v5243_v33 = vpop.eup %5242 }
 0x3b3   :  { %5252 = vlog2.f32 %v2417_v58  ;;  %v1014_v46 = vmin.f32 %v9874_v34, 20.0  ;;  %vm11048_vm12 = vcmask 851712   ;;  %v3159_v36 = vmul.f32 0.6931472, %v5237_v2 }
 0x3b4   :  { %v4290_v22 = vsel %vm11048_vm12, %v4289_v41, %v9614_v53  ;;  %v2152_v29 = vmul.f32 %v9771_v5, %v2151_v4  ;;  %v1889_v60 = vmul.f32 -0.5, %v9829_v16  ;;  %v9902_v62 = vpop.eup %5244  ;;  %v4511_v11 = vrot.slane %v3696_v25, %v5697_v48 }
 0x3b5   :  { %v3162_v10 = vmul.f32 %v3161_v13, %v9793_v37  ;;  %vm9906_vm0 = vcmp.lt.f32.partialorder %v2153_v20, 0.0004427343  ;;  %v2156_v51 = vadd.f32 1.0, %v9890_v3  ;;  %v3555_v32 = vmul.f32 0.6931472, %v5241_v14  ;;  %v11052_v37 = vld [vmem:[#allocation7_spill] sm:$0xff] }
 0x3b6   :  { %v3566_v23 = vadd.f32 1.0, %v3565_v59  ;;  %v2155_v53 = vsel %vm9906_vm0, %v2152_v29, %v2149_v45  ;;  %5254 = vpow2.f32 %v1279_v40  ;;  %v5247_v5 = vpop.eup %5246  ;;  %v3300_v61 = vsel %vm9867_vm6, %v3297_v49, %v3294_v9  ;;  %v11055_v20 = vld [vmem:[#allocation14_spill] sm:$0xff] }
 0x3b7   :  { %v3568_v48 = vand.u32 2147483647, %v9815_v27  ;;  %v9919_v44 = vsel %vm4545_vm8, %v11052_v37, %v11051_v24  ;;  %v1221_v8 = vmul.f32 1.442695, %v1014_v46  ;;  %v3165_v35 = vsel %vm9893_vm7, %v3162_v10, %v3159_v36 }
 0x3b8   :  { %v3564_v28 = vmul.f32 0.6931472, %v5243_v33  ;;  %vm870_vm1 = vcmp.gt.f32.partialorder %v9687_v63, 20.0  ;;  %v1890_v38 = vadd.f32 1.0, %v1889_v60  ;;  %v2021_v58 = vadd.f32 1.0, %v9902_v62  ;;  %v668_v33 = vpop.xlane.xlu1 %667 }
 0x3b9   :  { %vm11053_vm5 = vcmask 654912   ;;  %v9931_v15 = vsel %vm899_vm13, %v9645_v52, %v2155_v53  ;;  %v1892_v41 = vand.u32 2147483647, %v9829_v16  ;;  %5256 = vlog2.f32 %v2156_v51  ;;  %v9934_v49 = vpop.eup %5248 }
 0x3ba   :  { %v9926_v21 = vsel %vm11053_vm5, %v4511_v11, %v4507_v56  ;;  %v3561_v4 = vsel %vm9885_vm14, %v9864_v47, %v3555_v32  ;;  %v3567_v2 = vmul.f32 %v3566_v23, %v9815_v27  ;;  %v1888_v25 = vmul.f32 0.6931472, %v5247_v5 }
 0x3bb   :  { %11054 = vst [vmem:[#allocation16_spill] sm:$0xff] %v9926_v21  ;;  %v2420_v56 = vmul.f32 -0.5, %v9854_v30  ;;  %v4294_v13 = vrot.slane %v3300_v61, %v11018_v0  ;;  %v4220_v59 = vrot.slane %v3165_v35, %v11055_v20  ;;  %vm9943_vm3 = vcmp.lt.f32.partialorder %v3568_v48, 0.0004427343 }
 0x3bc   :  { %5258 = vpow2.f32 %v1221_v8  ;;  %v9947_v45 = vpop.eup %5250  ;;  %v3570_v7 = vsel %vm9943_vm3, %v3567_v2, %v3564_v28  ;;  %v3427_v47 = vadd.f32 1.0, %v9931_v15  ;;  %v1891_v27 = vmul.f32 %v9829_v16, %v1890_v38 }
 0x3bd   :  { %5260 = vlog2.f32 %v2021_v58  ;;  %v5253_v40 = vpop.eup %5252  ;;  %v9954_v14 = vrot.slane %v3561_v4, %v10963_v18  ;;  %vm9956_vm11 = vcmp.lt.f32.partialorder %v1892_v41, 0.0004427343  ;;  %v2159_v17 = vmul.f32 -0.5, %v9890_v3  ;;  %v623_v41 = vpop.xlane.xlu0 %622 }
 0x3be   :  { %v2426_v46 = vadd.f32 1.0, %v9934_v49  ;;  %v3430_v36 = vmul.f32 -0.5, %v9931_v15  ;;  %v1894_v29 = vsel %vm9956_vm11, %v1891_v27, %v1888_v25  ;;  %vm929_vm9 = vcmp.gt.f32.partialorder %v9731_v42, 20.0 }
 0x3bf   :  { %11058 = vst [vmem:[#allocation15_spill] sm:$0xff] %v9954_v14  ;;  %v2421_v16 = vadd.f32 1.0, %v2420_v56  ;;  %v2024_v60 = vmul.f32 -0.5, %v9902_v62  ;;  %v9968_v11 = vsel %vm3974_vm4, %v4294_v13, %v4290_v22  ;;  %vm11061_vm15 = vcmask 982912  }
 0x3c0   :  { %v9972_v10 = vsel %vm11061_vm15, %v4220_v59, %v9718_v31  ;;  %v9975_v43 = vrot.slane %v3570_v7, %v10968_v50  ;;  %v2423_v51 = vand.u32 2147483647, %v9854_v30  ;;  %v9978_v32 = vpop.eup %5254  ;;  %5262 = vlog2.f32 %v3427_v47 }
 0x3c1   :  { %v2419_v23 = vmul.f32 0.6931472, %v5253_v40  ;;  %v2165_v53 = vadd.f32 1.0, %v9947_v45  ;;  %v9982_v5 = vadd.f32 %v5588_v26, %v668_v33  ;;  %v9987_v22 = vsel %vm870_vm1, %v9687_v63, %v1894_v29 }
 0x3c2   :  { %11062 = vst [vmem:[#allocation10_spill] sm:$0xff] %v9975_v43  ;;  %v2160_v31 = vadd.f32 1.0, %v2159_v17  ;;  %v2162_v61 = vand.u32 2147483647, %v9890_v3  ;;  %5264 = vlog2.f32 %v2426_v46  ;;  %v3431_v48 = vadd.f32 1.0, %v3430_v36  ;;  %v626_v17 = vpop.xlane.xlu1 %625 }
 0x3c3   :  { %v2422_v24 = vmul.f32 %v9854_v30, %v2421_v16  ;;  %v2025_v37 = vadd.f32 1.0, %v2024_v60  ;;  %v2027_v8 = vand.u32 2147483647, %v9902_v62  ;;  %v5257_v35 = vpop.eup %5256  ;;  %v3433_v28 = vand.u32 2147483647, %v9931_v15 }
 0x3c4   :  { %vm9993_vm8 = vcmp.lt.f32.partialorder %v2423_v51, 0.0004427343  ;;  %v2429_v63 = vmul.f32 -0.5, %v9934_v49  ;;  %v2294_v58 = vmul.f32 -0.5, %v9978_v32  ;;  %v3169_v4 = vmul.f32 -0.5, %v9987_v22 }
 0x3c5   :  { %v2425_v30 = vsel %vm9993_vm8, %v2422_v24, %v2419_v23  ;;  %vm900_vm2 = vcmp.gt.f32.partialorder %v9765_v19, 20.0  ;;  %v2291_v2 = vadd.f32 1.0, %v9978_v32  ;;  %5266 = vlog2.f32 %v2165_v53  ;;  %v581_v53 = vpop.xlane.xlu0 %580 }
 0x3c6   :  { %v10004_v25 = vpop.eup %5258  ;;  %v3166_v56 = vadd.f32 1.0, %v9987_v22  ;;  %v2161_v13 = vmul.f32 %v9890_v3, %v2160_v31  ;;  %vm10008_vm6 = vcmp.lt.f32.partialorder %v2162_v61, 0.0004427343  ;;  %v2432_v52 = vand.u32 2147483647, %v9934_v49 }
 0x3c7   :  { %v5261_v7 = vpop.eup %5260  ;;  %v10014_v47 = vmul.f32 %v3431_v48, %v9931_v15  ;;  %v2158_v27 = vmul.f32 0.6931472, %v5257_v35  ;;  %v2026_v40 = vmul.f32 %v9902_v62, %v2025_v37  ;;  %vm10017_vm13 = vcmp.lt.f32.partialorder %v2027_v8, 0.0004427343 }
 0x3c8   :  { %v10024_v3 = vsel %vm929_vm9, %v9731_v42, %v2425_v30  ;;  %vm885_vm10 = vcmp.gt.f32.partialorder %v9788_v6, 20.0  ;;  %v2430_v46 = vadd.f32 1.0, %v2429_v63  ;;  %v2295_v33 = vadd.f32 1.0, %v2294_v58  ;;  %v629_v30 = vpop.xlane.xlu1 %628 }
 0x3c9   :  { %v2297_v15 = vand.u32 2147483647, %v9978_v32  ;;  %vm10028_vm14 = vcmp.lt.f32.partialorder %v3433_v28, 0.0004427343  ;;  %v3170_v62 = vadd.f32 1.0, %v3169_v4  ;;  %5268 = vlog2.f32 %v2291_v2 }
 0x3ca   :  { %v3172_v29 = vand.u32 2147483647, %v9987_v22  ;;  %v2030_v16 = vadd.f32 1.0, %v10004_v25  ;;  %5270 = vlog2.f32 %v3166_v56  ;;  %v2023_v60 = vmul.f32 0.6931472, %v5261_v7  ;;  %v5263_v31 = vpop.eup %5262 }
 0x3cb   :  { %vm10034_vm7 = vcmp.lt.f32.partialorder %v2432_v52, 0.0004427343  ;;  %v1059_v51 = vmin.f32 %v9982_v5, 20.0  ;;  %v10040_v23 = vadd.f32 %v5588_v26, %v623_v41  ;;  %v3697_v61 = vadd.f32 1.0, %v10024_v3 }
 0x3cc   :  { %v2164_v48 = vsel %vm10008_vm6, %v2161_v13, %v2158_v27  ;;  %v2168_v24 = vmul.f32 -0.5, %v9947_v45  ;;  %v10047_v37 = vadd.f32 %v5588_v26, %v626_v17  ;;  %v5265_v8 = vpop.eup %5264  ;;  %v2431_v35 = vmul.f32 %v9934_v49, %v2430_v46 }
 0x3cd   :  { %v10051_v28 = vmul.f32 %v9978_v32, %v2295_v33  ;;  %v1311_v38 = vmul.f32 1.442695, %v1059_v51  ;;  %v1044_v63 = vmin.f32 %v10040_v23, 20.0  ;;  %v10055_v58 = vmul.f32 %v3170_v62, %v9987_v22 }
 0x3ce   :  { %v2171_v41 = vand.u32 2147483647, %v9947_v45  ;;  %5272 = vlog2.f32 %v2030_v16  ;;  %v1045_v4 = vmin.f32 %v10047_v37, 20.0  ;;  %v3429_v2 = vmul.f32 0.6931472, %v5263_v31 }
 0x3cf   :  { %v10062_v49 = vsel %vm900_vm2, %v9765_v19, %v2164_v48  ;;  %v2029_v32 = vsel %vm10017_vm13, %v2026_v40, %v2023_v60  ;;  %vm930_vm12 = vcmp.gt.f32.partialorder %v9824_v54, 20.0  ;;  %v1281_v56 = vmul.f32 1.442695, %v1044_v63  ;;  %v5267_v22 = vpop.eup %5266  ;;  %v671_v40 = vpop.xlane.xlu0 %670 }
 0x3d0   :  { %5274 = vlog2.f32 %v3697_v61  ;;  %v2428_v13 = vmul.f32 0.6931472, %v5265_v8  ;;  %v2169_v59 = vadd.f32 1.0, %v2168_v24  ;;  %v10068_v52 = vadd.f32 %v5588_v26, %v581_v53  ;;  %v677_v8 = vpop.xlane.xlu1 %676 }
 0x3d1   :  { %v3700_v7 = vmul.f32 -0.5, %v10024_v3  ;;  %vm901_vm0 = vcmp.gt.f32.partialorder %v9834_v39, 20.0  ;;  %5276 = vpow2.f32 %v1311_v38  ;;  %v1283_v19 = vmul.f32 1.442695, %v1045_v4 }
 0x3d2   :  { %v10073_v27 = vadd.f32 %v5588_v26, %v629_v30  ;;  %v3703_v9 = vand.u32 2147483647, %v10024_v3  ;;  %v3436_v17 = vadd.f32 1.0, %v10062_v49  ;;  %v10080_v46 = vsel %vm885_vm10, %v9788_v6, %v2029_v32 }
 0x3d3   :  { %vm10082_vm1 = vcmp.lt.f32.partialorder %v2297_v15, 0.0004427343  ;;  %5278 = vpow2.f32 %v1281_v56  ;;  %v3435_v62 = vsel %vm10028_vm14, %v10014_v47, %v3429_v2  ;;  %v3439_v16 = vmul.f32 -0.5, %v10062_v49  ;;  %v5269_v53 = vpop.eup %5268 }
 0x3d4   :  { %v2167_v60 = vmul.f32 0.6931472, %v5267_v22  ;;  %v1030_v51 = vmin.f32 %v10068_v52, 20.0  ;;  %vm10091_vm5 = vcmp.lt.f32.partialorder %v3172_v29, 0.0004427343  ;;  %v2434_v6 = vsel %vm10034_vm7, %v2431_v35, %v2428_v13  ;;  %v5271_v47 = vpop.eup %5270 }
 0x3d5   :  { %v2170_v15 = vmul.f32 %v9947_v45, %v2169_v59  ;;  %v1046_v61 = vmin.f32 %v10073_v27, 20.0  ;;  %v10100_v36 = vadd.f32 %v5588_v26, %v671_v40  ;;  %v3301_v48 = vadd.f32 1.0, %v10080_v46  ;;  %v11084_v45 = vld [vmem:[#allocation13_spill] sm:$0xff] }
 0x3d6   :  { %vm915_vm3 = vcmp.gt.f32.partialorder %v9848_v57, 20.0  ;;  %v2033_v29 = vmul.f32 -0.5, %v10004_v25  ;;  %5280 = vpow2.f32 %v1283_v19  ;;  %v1253_v24 = vmul.f32 1.442695, %v1030_v51  ;;  %v674_v51 = vpop.xlane.xlu0 %673 }
 0x3d7   :  { %v4368_v42 = vrot.slane %v3435_v62, %v11004_v12  ;;  %v3701_v35 = vadd.f32 1.0, %v3700_v7  ;;  %5282 = vlog2.f32 %v3436_v17  ;;  %vm10106_vm11 = vcmp.lt.f32.partialorder %v2171_v41, 0.0004427343 }
 0x3d8   :  { %v3440_v38 = vadd.f32 1.0, %v3439_v16  ;;  %v2293_v63 = vmul.f32 0.6931472, %v5269_v53  ;;  %v2173_v4 = vsel %vm10106_vm11, %v2170_v15, %v2167_v60  ;;  %v1285_v30 = vmul.f32 1.442695, %v1046_v61  ;;  %v5273_v2 = vpop.eup %5272 }
 0x3d9   :  { %v10115_v32 = vsel %vm930_vm12, %v9824_v54, %v2434_v6  ;;  %5284 = vpow2.f32 %v1253_v24  ;;  %v1060_v56 = vmin.f32 %v10100_v36, 20.0  ;;  %v10119_v41 = vadd.f32 %v5588_v26, %v677_v8 }
 0x3da   :  { %v3168_v22 = vmul.f32 0.6931472, %v5271_v47  ;;  %v3442_v13 = vand.u32 2147483647, %v10062_v49  ;;  %5286 = vlog2.f32 %v3301_v48  ;;  %vm886_vm9 = vcmp.gt.f32.partialorder %v9874_v34, 20.0  ;;  %v5275_v7 = vpop.eup %5274 }
 0x3db   :  { %v2034_v59 = vadd.f32 1.0, %v2033_v29  ;;  %vm11079_vm15 = vcmask 851712   ;;  %v10128_v54 = vmul.f32 %v3701_v35, %v10024_v3  ;;  %v10133_v40 = vsel %vm901_vm0, %v9834_v39, %v2173_v4  ;;  %v10136_v62 = vpop.eup %5276 }
 0x3dc   :  { %v10125_v19 = vsel %vm11079_vm15, %v4368_v42, %v9881_v55  ;;  %v2036_v17 = vand.u32 2147483647, %v10004_v25  ;;  %v3706_v16 = vadd.f32 1.0, %v10115_v32  ;;  %v2299_v60 = vsel %vm10082_vm1, %v10051_v28, %v2293_v63 }
 0x3dd   :  { %v2032_v55 = vmul.f32 0.6931472, %v5273_v2  ;;  %5288 = vpow2.f32 %v1285_v30  ;;  %v10142_v53 = vpop.eup %5278  ;;  %v10145_v6 = vmul.f32 %v3440_v38, %v10062_v49  ;;  %v3304_v39 = vmul.f32 -0.5, %v10080_v46 }
 0x3de   :  { %v1313_v15 = vmul.f32 1.442695, %v1060_v56  ;;  %v1062_v61 = vmin.f32 %v10119_v41, 20.0  ;;  %vm4547_vm8 = vcmask 1043459   ;;  %v3174_v47 = vsel %vm10091_vm5, %v10055_v58, %v3168_v22 }
 0x3df   :  { %v3307_v28 = vand.u32 2147483647, %v10080_v46  ;;  %v3445_v33 = vadd.f32 1.0, %v10133_v40  ;;  %v2035_v48 = vmul.f32 %v10004_v25, %v2034_v59  ;;  %v10158_v49 = vsel %vm915_vm3, %v9848_v57, %v2299_v60 }
 0x3e0   :  { %vm10160_vm2 = vcmp.lt.f32.partialorder %v2036_v17, 0.0004427343  ;;  %v2435_v24 = vadd.f32 1.0, %v10136_v62  ;;  %v10166_v31 = vadd.f32 %v5588_v26, %v674_v51  ;;  %v10168_v58 = vpop.eup %5280  ;;  %vm10170_vm6 = vcmp.lt.f32.partialorder %v3442_v13, 0.0004427343 }
 0x3e1   :  { %5290 = vlog2.f32 %v3706_v16  ;;  %v3709_v25 = vmul.f32 -0.5, %v10115_v32  ;;  %v2038_v57 = vsel %vm10160_vm2, %v2035_v48, %v2032_v55  ;;  %v2300_v42 = vadd.f32 1.0, %v10142_v53  ;;  %v5283_v35 = vpop.eup %5282 }
 0x3e2   :  { %v4225_v38 = vrot.slane %v3174_v47, %v11084_v45  ;;  %vm10181_vm13 = vcmp.lt.f32.partialorder %v3703_v9, 0.0004427343  ;;  %5292 = vpow2.f32 %v1313_v15  ;;  %v1317_v4 = vmul.f32 1.442695, %v1062_v61 }
 0x3e3   :  { %v3305_v30 = vadd.f32 1.0, %v3304_v39  ;;  %vm10186_vm10 = vcmp.lt.f32.partialorder %v3307_v28, 0.0004427343  ;;  %v3574_v56 = vmul.f32 -0.5, %v10158_v49  ;;  %5294 = vlog2.f32 %v3445_v33  ;;  %v10191_v22 = vpop.eup %5284 }
 0x3e4   :  { %v10196_v3 = vsel %vm886_vm9, %v9874_v34, %v2038_v57  ;;  %5296 = vlog2.f32 %v2435_v24  ;;  %v2309_v9 = vadd.f32 1.0, %v10168_v58  ;;  %v1061_v13 = vmin.f32 %v10166_v31, 20.0  ;;  %v5287_v59 = vpop.eup %5286 }
 0x3e5   :  { %v3710_v17 = vadd.f32 1.0, %v3709_v25  ;;  %v3571_v16 = vadd.f32 1.0, %v10158_v49  ;;  %5298 = vlog2.f32 %v2300_v42  ;;  %v2174_v60 = vadd.f32 1.0, %v10191_v22 }
 0x3e6   :  { %vm11089_vm14 = vcmask 1048512   ;;  %v10204_v51 = vmul.f32 0.6931472, %v5275_v7  ;;  %v3438_v39 = vmul.f32 0.6931472, %v5283_v35  ;;  %5300 = vpow2.f32 %v1317_v4 }
 0x3e7   :  { %v4226_v55 = vsel %vm11089_vm14, %v4225_v38, %v9972_v10  ;;  %v10206_v34 = vpop.eup %5288  ;;  %v3575_v15 = vadd.f32 1.0, %v3574_v56  ;;  %v3448_v61 = vmul.f32 -0.5, %v10133_v40  ;;  %v3310_v47 = vadd.f32 1.0, %v10196_v3 }
 0x3e8   :  { %5302 = vlog2.f32 %v2174_v60  ;;  %v3303_v28 = vmul.f32 0.6931472, %v5287_v59  ;;  %v2318_v33 = vadd.f32 1.0, %v10206_v34  ;;  %v1315_v48 = vmul.f32 1.442695, %v1061_v13 }
 0x3e9   :  { %5304 = vlog2.f32 %v2309_v9  ;;  %v3306_v29 = vmul.f32 %v3305_v30, %v10080_v46  ;;  %v10213_v10 = vmul.f32 %v3710_v17, %v10115_v32  ;;  %v2438_v7 = vmul.f32 -0.5, %v10136_v62 }
 0x3ea   :  { %5306 = vlog2.f32 %v3571_v16  ;;  %v10218_v24 = vsel %vm4547_vm8, %v4226_v55, %v9919_v44  ;;  %v3444_v25 = vsel %vm10170_vm6, %v10145_v6, %v3438_v39  ;;  %v3449_v35 = vadd.f32 1.0, %v3448_v61 }
 0x3eb   :  { %5308 = vlog2.f32 %v2318_v33  ;;  %v10224_v42 = vpop.eup %5290  ;;  %v2177_v38 = vmul.f32 -0.5, %v10191_v22  ;;  %v3309_v8 = vsel %vm10186_vm10, %v3306_v29, %v3303_v28  ;;  %v10236_v6 = vmul.f32 %v3575_v15, %v10158_v49 }
 0x3ec   :  { %5310 = vlog2.f32 %v3310_v47  ;;  %v10231_v44 = vpop.eup %5292  ;;  %v3451_v4 = vand.u32 2147483647, %v10133_v40  ;;  %v10240_v56 = vrot.slane %v3444_v25, %v11018_v0  ;;  %v3313_v9 = vmul.f32 -0.5, %v10196_v3 }
 0x3ed   :  { %5312 = vpow2.f32 %v1315_v48  ;;  %v5295_v30 = vpop.eup %5294  ;;  %v2439_v13 = vadd.f32 1.0, %v2438_v7  ;;  %v2441_v59 = vand.u32 2147483647, %v10136_v62  ;;  %v2303_v16 = vmul.f32 -0.5, %v10142_v53 }
 0x3ee   :  { %v5297_v17 = vpop.eup %5296  ;;  %v2306_v2 = vand.u32 2147483647, %v10142_v53  ;;  %v2312_v60 = vmul.f32 -0.5, %v10168_v58  ;;  %v2444_v55 = vadd.f32 1.0, %v10231_v44  ;;  %v10249_v15 = vrot.slane %v3309_v8, %v11055_v20 }
 0x3ef   :  { %v5299_v39 = vpop.eup %5298  ;;  %v10252_v61 = vmul.f32 %v3449_v35, %v10133_v40  ;;  %v3316_v47 = vand.u32 2147483647, %v10196_v3  ;;  %v2178_v28 = vadd.f32 1.0, %v2177_v38  ;;  %v10257_v48 = vmul.f32 0.6931472, %v5295_v30 }
 0x3f0   :  { %v10255_v33 = vpop.eup %5300  ;;  %v2180_v29 = vand.u32 2147483647, %v10191_v22  ;;  %v2321_v7 = vmul.f32 -0.5, %v10206_v34  ;;  %5314 = vlog2.f32 %v2444_v55  ;;  %v3314_v57 = vadd.f32 1.0, %v3313_v9 }
 0x3f1   :  { %vm931_vm7 = vcmp.gt.f32.partialorder %v9982_v5, 20.0  ;;  %vm10262_vm12 = vcmp.lt.f32.partialorder %v2441_v59, 0.0004427343  ;;  %v2315_v40 = vand.u32 2147483647, %v10168_v58  ;;  %vm902_vm0 = vcmp.gt.f32.partialorder %v10068_v52, 20.0 }
 0x3f2   :  { %v5303_v25 = vpop.eup %5302  ;;  %v2440_v38 = vmul.f32 %v10136_v62, %v2439_v13  ;;  %vm916_vm1 = vcmp.gt.f32.partialorder %v10040_v23, 20.0  ;;  %v2304_v30 = vadd.f32 1.0, %v2303_v16  ;;  %vm10270_vm5 = vcmp.lt.f32.partialorder %v2306_v2, 0.0004427343 }
 0x3f3   :  { %v5305_v35 = vpop.eup %5304  ;;  %v2313_v9 = vadd.f32 1.0, %v2312_v60  ;;  %vm10276_vm3 = vcmp.lt.f32.partialorder %v3316_v47, 0.0004427343  ;;  %v2437_v63 = vmul.f32 0.6931472, %v5297_v17  ;;  %vm917_vm11 = vcmp.gt.f32.partialorder %v10047_v37, 20.0 }
 0x3f4   :  { %v10274_v46 = vpop.eup %5306  ;;  %v2176_v21 = vmul.f32 0.6931472, %v5303_v25  ;;  %v2179_v62 = vmul.f32 %v10191_v22, %v2178_v28  ;;  %v2447_v13 = vmul.f32 -0.5, %v10231_v44  ;;  %v2302_v2 = vmul.f32 0.6931472, %v5299_v39 }
 0x3f5   :  { %v5309_v16 = vpop.eup %5308  ;;  %vm2181_vm9 = vcmp.lt.f32.partialorder %v2180_v29, 0.0004427343  ;;  %vm918_vm15 = vcmp.gt.f32.partialorder %v10073_v27, 20.0  ;;  %v2322_v60 = vadd.f32 1.0, %v2321_v7  ;;  %v2462_v43 = vadd.f32 1.0, %v10255_v33 }
 0x3f6   :  { %v5311_v47 = vpop.eup %5310  ;;  %vm10285_vm8 = vcmp.lt.f32.partialorder %v3451_v4, 0.0004427343  ;;  %v2311_v17 = vmul.f32 0.6931472, %v5305_v35  ;;  %vm10289_vm2 = vcmp.lt.f32.partialorder %v2315_v40, 0.0004427343  ;;  %v2182_v22 = vsel %vm2181_vm9, %v2179_v62, %v2176_v21 }
 0x3f7   :  { %v2324_v28 = vand.u32 2147483647, %v10206_v34  ;;  %v10294_v39 = vpop.eup %5312  ;;  %v2305_v29 = vmul.f32 %v10142_v53, %v2304_v30  ;;  %v10300_v7 = vsel %vm902_vm0, %v10068_v52, %v2182_v22  ;;  %v2320_v4 = vmul.f32 0.6931472, %v5309_v16 }
 0x3f8   :  { %5316 = vlog2.f32 %v2462_v43  ;;  %v2443_v40 = vsel %vm10262_vm12, %v2440_v38, %v2437_v63  ;;  %v2314_v35 = vmul.f32 %v10168_v58, %v2313_v9  ;;  %v3454_v21 = vadd.f32 1.0, %v10300_v7 }
 0x3f9   :  { %v2448_v62 = vadd.f32 1.0, %v2447_v13  ;;  %v3312_v14 = vmul.f32 0.6931472, %v5311_v47  ;;  %v2308_v1 = vsel %vm10270_vm5, %v2305_v29, %v2302_v2  ;;  %v2323_v53 = vmul.f32 %v10206_v34, %v2322_v60 }
 0x3fa   :  { %v2450_v30 = vand.u32 2147483647, %v10231_v44  ;;  %v2317_v52 = vsel %vm10289_vm2, %v2314_v35, %v2311_v17  ;;  %5318 = vlog2.f32 %v3454_v21  ;;  %vm10312_vm6 = vcmp.lt.f32.partialorder %v2324_v28, 0.0004427343  ;;  %v5315_v63 = vpop.eup %5314 }
 0x3fb   :  { %v2453_v58 = vadd.f32 1.0, %v10294_v39  ;;  %v3315_v8 = vmul.f32 %v3314_v57, %v10196_v3  ;;  %v10321_v38 = vsel %vm931_vm7, %v9982_v5, %v2443_v40  ;;  %v2326_v34 = vsel %vm10312_vm6, %v2323_v53, %v2320_v4 }
 0x3fc   :  { %v2465_v55 = vmul.f32 -0.5, %v10255_v33  ;;  %v10329_v9 = vsel %vm916_vm1, %v10040_v23, %v2308_v1  ;;  %v3457_v13 = vmul.f32 -0.5, %v10300_v7  ;;  %v2446_v16 = vmul.f32 0.6931472, %v5315_v63 }
 0x3fd   :  { %v2449_v3 = vmul.f32 %v10231_v44, %v2448_v62  ;;  %vm4549_vm10 = vcmask 1044484   ;;  %v3318_v5 = vsel %vm10276_vm3, %v3315_v8, %v3312_v14  ;;  %v10338_v57 = vsel %vm917_vm11, %v10047_v37, %v2317_v52 }
 0x3fe   :  { %vm932_vm14 = vcmp.gt.f32.partialorder %v10100_v36, 20.0  ;;  %vm2451_vm7 = vcmp.lt.f32.partialorder %v2450_v30, 0.0004427343  ;;  %v3715_v1 = vadd.f32 1.0, %v10321_v38  ;;  %v10345_v23 = vsel %vm918_vm15, %v10073_v27, %v2326_v34 }
 0x3ff   :  { %v2452_v44 = vsel %vm2451_vm7, %v2449_v3, %v2446_v16  ;;  %5320 = vlog2.f32 %v2453_v58  ;;  %v3453_v14 = vsel %vm10285_vm8, %v10252_v61, %v10257_v48  ;;  %v3580_v37 = vadd.f32 1.0, %v10329_v9 }
 0x400   :  { %v10353_v59 = vsel %vm932_vm14, %v10100_v36, %v2452_v44  ;;  %v2466_v2 = vadd.f32 1.0, %v2465_v55  ;;  %v4304_v60 = vrot.slane %v3318_v5, %v11084_v45  ;;  %v3589_v47 = vadd.f32 1.0, %v10338_v57 }
 0x401   :  { %v3458_v17 = vadd.f32 1.0, %v3457_v13  ;;  %v2468_v27 = vand.u32 2147483647, %v10255_v33  ;;  %v4374_v22 = vsel %vm3974_vm4, %v10240_v56, %v10125_v19  ;;  %vm11102_vm12 = vcmask 982912  }
 0x402   :  { %v5317_v25 = vpop.eup %5316  ;;  %v4300_v50 = vsel %vm11102_vm12, %v10249_v15, %v9968_v11  ;;  %v3598_v36 = vadd.f32 1.0, %v10345_v23  ;;  %v2456_v61 = vmul.f32 -0.5, %v10294_v39  ;;  %v4378_v48 = vrot.slane %v3453_v14, %v11055_v20  ;;  %vm11107_vm15 = vmmov %vm11102_vm12 }
 0x403   :  { %5322 = vlog2.f32 %v3715_v1  ;;  %v3460_v28 = vand.u32 2147483647, %v10300_v7  ;;  %v3724_v29 = vadd.f32 1.0, %v10353_v59  ;;  %vm934_vm0 = vcmp.gt.f32.partialorder %v10119_v41, 20.0 }
 0x404   :  { %5324 = vlog2.f32 %v3580_v37  ;;  %v2464_v4 = vmul.f32 0.6931472, %v5317_v25  ;;  %v2467_v19 = vmul.f32 %v10255_v33, %v2466_v2  ;;  %v5319_v56 = vpop.eup %5318  ;;  %vm11103_vm1 = vcmask 1048512  }
 0x405   :  { %v4305_v11 = vsel %vm11103_vm1, %v4304_v60, %v4300_v50  ;;  %5326 = vlog2.f32 %v3589_v47  ;;  %v3459_v15 = vmul.f32 %v3458_v17, %v10300_v7  ;;  %vm2469_vm5 = vcmp.lt.f32.partialorder %v2468_v27, 0.0004427343  ;;  %vm11108_vm8 = vmmov %vm11103_vm1 }
 0x406   :  { %v11104_v40 = vand.u32 2147483647, %v10115_v32  ;;  %v3456_v21 = vmul.f32 0.6931472, %v5319_v56  ;;  %5328 = vlog2.f32 %v3598_v36  ;;  %v2470_v62 = vsel %vm2469_vm5, %v2467_v19, %v2464_v4 }
 0x407   :  { %v2457_v53 = vadd.f32 1.0, %v2456_v61  ;;  %vm3461_vm11 = vcmp.lt.f32.partialorder %v3460_v28, 0.0004427343  ;;  %5330 = vlog2.f32 %v3724_v29  ;;  %v10380_v33 = vsel %vm934_vm0, %v10119_v41, %v2470_v62 }
 0x408   :  { %vm10375_vm3 = vcmp.lt.f32.partialorder %v11104_v40, 0.0004427343  ;;  %v2459_v30 = vand.u32 2147483647, %v10294_v39  ;;  %v10384_v7 = vmul.f32 0.6931472, %v10224_v42  ;;  %v3462_v32 = vsel %vm3461_vm11, %v3459_v15, %v3456_v21 }
 0x409   :  { %vm4551_vm9 = vcmask 1045509   ;;  %v3742_v52 = vadd.f32 1.0, %v10380_v33  ;;  %v5321_v43 = vpop.eup %5320  ;;  %v3573_v58 = vmul.f32 0.6931472, %v10274_v46  ;;  %v4379_v63 = vsel %vm11107_vm15, %v4378_v48, %v4374_v22 }
 0x40a   :  { %v4550_v8 = vsel %vm4549_vm10, %v4305_v11, %v10218_v24  ;;  %v4383_v41 = vrot.slane %v3462_v32, %v11084_v45  ;;  %v3718_v34 = vmul.f32 -0.5, %v10321_v38  ;;  %v2455_v55 = vmul.f32 0.6931472, %v5321_v43 }
 0x40b   :  { %5332 = vlog2.f32 %v3742_v52  ;;  %v2458_v42 = vmul.f32 %v10294_v39, %v2457_v53  ;;  %v3721_v13 = vand.u32 2147483647, %v10321_v38  ;;  %v3583_v16 = vmul.f32 -0.5, %v10329_v9 }
 0x40c   :  { %v4384_v3 = vsel %vm11108_vm8, %v4383_v41, %v4379_v63  ;;  %vm2460_vm2 = vcmp.lt.f32.partialorder %v2459_v30, 0.0004427343  ;;  %v3592_v46 = vmul.f32 -0.5, %v10338_v57  ;;  %vm933_vm6 = vcmp.gt.f32.partialorder %v10166_v31, 20.0 }
 0x40d   :  { %v10399_v5 = vsel %vm4551_vm9, %v4384_v3, %v4550_v8  ;;  %v2461_v24 = vsel %vm2460_vm2, %v2458_v42, %v2455_v55  ;;  %v5323_v1 = vpop.eup %5322  ;;  %v11109_v39 = vsel %vm10181_vm13, %v10128_v54, %v10204_v51  ;;  %v11110_v14 = vand.u32 2147483647, %v10158_v49  ;;  %v11123_v3 = vld [vmem:[#allocation6_spill] sm:$0xff] }
 0x40e   :  { %v10408_v44 = vrot.slane %v11109_v39, %v10963_v18  ;;  %v3601_v2 = vmul.f32 -0.5, %v10345_v23  ;;  %v10418_v60 = vsel %vm933_vm6, %v10166_v31, %v2461_v24  ;;  %v5325_v47 = vpop.eup %5324  ;;  %v3719_v17 = vadd.f32 1.0, %v3718_v34 }
 0x40f   :  { %vm10412_vm10 = vcmp.lt.f32.partialorder %v11110_v14, 0.0004427343  ;;  %v3727_v18 = vmul.f32 -0.5, %v10353_v59  ;;  %v3733_v54 = vadd.f32 1.0, %v10418_v60  ;;  %v5327_v49 = vpop.eup %5326  ;;  %v3714_v51 = vsel %vm10375_vm3, %v10213_v10, %v10384_v7 }
 0x410   :  { %v3579_v26 = vsel %vm10412_vm10, %v10236_v6, %v3573_v58  ;;  %vm10429_vm13 = vcmp.lt.f32.partialorder %v3721_v13, 0.0004427343  ;;  %v3584_v31 = vadd.f32 1.0, %v3583_v16  ;;  %v3586_v25 = vand.u32 2147483647, %v10329_v9  ;;  %v5329_v22 = vpop.eup %5328 }
 0x411   :  { %v3593_v6 = vadd.f32 1.0, %v3592_v46  ;;  %v3595_v50 = vand.u32 2147483647, %v10338_v57  ;;  %v3745_v36 = vmul.f32 -0.5, %v10380_v33  ;;  %5334 = vlog2.f32 %v3733_v54  ;;  %v5331_v61 = vpop.eup %5330  ;;  %v11124_v46 = vld [vmem:[#allocation15_spill] sm:$0xff] }
 0x412   :  { %v4447_v48 = vrot.slane %v3579_v26, %v11004_v12  ;;  %v3717_v28 = vmul.f32 0.6931472, %v5323_v1  ;;  %v3582_v29 = vmul.f32 0.6931472, %v5325_v47  ;;  %v3602_v10 = vadd.f32 1.0, %v3601_v2  ;;  %v11126_v1 = vld [vmem:[#allocation9_spill] sm:$0xff] }
 0x413   :  { %v3720_v4 = vmul.f32 %v3719_v17, %v10321_v38  ;;  %v3591_v19 = vmul.f32 0.6931472, %v5327_v49  ;;  %v3604_v56 = vand.u32 2147483647, %v10345_v23  ;;  %v3728_v11 = vadd.f32 1.0, %v3727_v18  ;;  %v11127_v2 = vld [vmem:[#allocation10_spill] sm:$0xff] }
 0x414   :  { %v3585_v15 = vmul.f32 %v3584_v31, %v10329_v9  ;;  %v3600_v40 = vmul.f32 0.6931472, %v5329_v22  ;;  %v3730_v35 = vand.u32 2147483647, %v10353_v59  ;;  %v3736_v21 = vmul.f32 -0.5, %v10418_v60 }
 0x415   :  { %v5333_v62 = vpop.eup %5332  ;;  %vm10442_vm14 = vcmp.lt.f32.partialorder %v3586_v25, 0.0004427343  ;;  %v3594_v30 = vmul.f32 %v3593_v6, %v10338_v57  ;;  %v3726_v7 = vmul.f32 0.6931472, %v5331_v61  ;;  %v3746_v38 = vadd.f32 1.0, %v3745_v36 }
 0x416   :  { %v3588_v32 = vsel %vm10442_vm14, %v3585_v15, %v3582_v29  ;;  %vm10449_vm7 = vcmp.lt.f32.partialorder %v3595_v50, 0.0004427343  ;;  %v3603_v9 = vmul.f32 %v3602_v10, %v10345_v23  ;;  %v3748_v43 = vand.u32 2147483647, %v10380_v33 }
 0x417   :  { %v3597_v58 = vsel %vm10449_vm7, %v3594_v30, %v3591_v19  ;;  %vm10457_vm12 = vcmp.lt.f32.partialorder %v3604_v56, 0.0004427343  ;;  %v3729_v57 = vmul.f32 %v3728_v11, %v10353_v59  ;;  %v3744_v8 = vmul.f32 0.6931472, %v5333_v62 }
 0x418   :  { %v3723_v41 = vsel %vm10429_vm13, %v3720_v4, %v3717_v28  ;;  %v3606_v34 = vsel %vm10457_vm12, %v3603_v9, %v3600_v40  ;;  %vm10466_vm0 = vcmp.lt.f32.partialorder %v3730_v35, 0.0004427343  ;;  %v3737_v55 = vadd.f32 1.0, %v3736_v21 }
 0x419   :  { %v4452_v42 = vrot.slane %v3588_v32, %v11018_v0  ;;  %v3732_v13 = vsel %vm10466_vm0, %v3729_v57, %v3726_v7  ;;  %v3747_v16 = vmul.f32 %v3746_v38, %v10380_v33  ;;  %v3739_v59 = vand.u32 2147483647, %v10418_v60 }
 0x41a   :  { %vm11125_vm1 = vcmask 720512   ;;  %v4521_v39 = vrot.slane %v3714_v51, %v11126_v1  ;;  %v4457_v14 = vrot.slane %v3597_v58, %v11055_v20  ;;  %vm3749_vm5 = vcmp.lt.f32.partialorder %v3748_v43, 0.0004427343  ;;  %v11130_v51 = vld [vmem:[#allocation16_spill] sm:$0xff] }
 0x41b   :  { %v4438_v24 = vsel %vm11125_vm1, %v11124_v46, %v11123_v3  ;;  %v5335_v37 = vpop.eup %5334  ;;  %vm11128_vm3 = vcmask 786112   ;;  %v4526_v26 = vrot.slane %v3723_v41, %v11004_v12  ;;  %v4462_v17 = vrot.slane %v3606_v34, %v11084_v45  ;;  %vm11131_vm9 = vmmov %vm11125_vm1 }
 0x41c   :  { %v4443_v47 = vsel %vm11128_vm3, %v11127_v2, %v4438_v24  ;;  %v3750_v33 = vsel %vm3749_vm5, %v3747_v16, %v3744_v8  ;;  %vm11129_vm11 = vcmask 851712   ;;  %v4531_v54 = vrot.slane %v3732_v13, %v11018_v0  ;;  %vm11132_vm8 = vmmov %vm11128_vm3 }
 0x41d   :  { %v4448_v18 = vsel %vm11129_vm11, %v4447_v48, %v4443_v47  ;;  %v3735_v49 = vmul.f32 0.6931472, %v5335_v37  ;;  %v3738_v27 = vmul.f32 %v3737_v55, %v10418_v60  ;;  %v4517_v31 = vsel %vm11131_vm9, %v10408_v44, %v11130_v51  ;;  %vm11134_vm6 = vmmov %vm11129_vm11 }
 0x41e   :  { %v4453_v25 = vsel %vm3974_vm4, %v4452_v42, %v4448_v18  ;;  %vm3740_vm15 = vcmp.lt.f32.partialorder %v3739_v59, 0.0004427343  ;;  %v4522_v22 = vsel %vm11132_vm8, %v4521_v39, %v4517_v31  ;;  %vm11133_vm2 = vcmask 982912  }
 0x41f   :  { %v4458_v12 = vsel %vm11133_vm2, %v4457_v14, %v4453_v25  ;;  %v4541_v6 = vrot.slane %v3750_v33, %v11084_v45  ;;  %v3741_v50 = vsel %vm3740_vm15, %v3738_v27, %v3735_v49  ;;  %v4527_v36 = vsel %vm11134_vm6, %v4526_v26, %v4522_v22  ;;  %vm11136_vm7 = vmmov %vm11133_vm2 }
 0x420   :  { %vm4553_vm10 = vcmask 1046534   ;;  %vm11135_vm13 = vcmask 1048512   ;;  %v4536_v60 = vrot.slane %v3741_v50, %v11055_v20  ;;  %v4532_v61 = vsel %vm3974_vm4, %v4531_v54, %v4527_v36 }
 0x421   :  { %v4463_v0 = vsel %vm11135_vm13, %v4462_v17, %v4458_v12  ;;  %vm4555_vm14 = vcmask 1047559   ;;  %vm11137_vm12 = vmmov %vm11135_vm13 }
 0x422   :  { %v4537_v44 = vsel %vm11136_vm7, %v4536_v60, %v4532_v61  ;;  %v4554_v48 = vsel %vm4553_vm10, %v4463_v0, %v10399_v5 }
 0x423   :  { %v4542_v28 = vsel %vm11137_vm12, %v4541_v6, %v4537_v44 }
 0x424   :  { %v4556_v29 = vsel %vm4555_vm14, %v4542_v28, %v4554_v48 }
 0x425   :  { %4558 = vst [vmem:[%s10507_s3] sm:$0xff] %v4556_v29 }
 0x426   :  { %4563 = vsyncpa [#allocation4], 1 }

</bundles_post_ra>
